<compile_context>
chip_gen: v6e
topology: v6e:2x2x1
jax: 0.10.0
libtpu: 0.0.40
codegen_flags: <defaults>
</compile_context>

<pallas_src>
import functools

import jax
import jax.numpy as jnp
from jax import lax
from jax.experimental import pallas as pl
from jax.experimental.pallas import tpu as pltpu


def _round_up(x, m):
    return (x + m - 1) // m * m


def _choose_row_tile(H, W):
    """Largest row tile Ht giving >=2 tiles with a lane-dense (Ht*W % 128 == 0) output block."""
    for ht in range(max(H // 2, 1), 0, -1):
        if H % ht == 0 and (ht * W) % 128 == 0:
            return ht
    return H  # fall back to one tile per batch element


# ----------------------------------------------------------------------------
# Pallas kernel: 3x3 "same" conv over the (virtual) concat of 2 NHWC inputs
# ----------------------------------------------------------------------------
def _pre_image_kernel(x12_ref, im_ref, w12_ref, wim_ref, o_ref, *, Ht, W):
    # x12_ref: (1, H+2, W+2, C12p)  spatially padded concat of x1,x2 (bf16)
    # im_ref : (1, H+2, W+2, C3p)   spatially padded image (bf16)
    # w*_ref : (3, 3, Ci, Cout_pad) HWIO weight slice (bf16, O zero-padded to 8)
    # o_ref  : (1, Ht*W, Cout_pad)  f32 output rows for this H-tile
    t = pl.program_id(1)
    row0 = pl.multiple_of(t * Ht, Ht)

    acc = None
    for x_ref, w_ref in ((x12_ref, w12_ref), (im_ref, wim_ref)):
        cin = x_ref.shape[-1]
        for dy in range(3):
            for dx in range(3):
                # ref slice -> Mosaic emits shifted loads (no value-slice relayout)
                patch = x_ref[0, pl.ds(row0 + dy, Ht), pl.ds(dx, W), :]
                d = jnp.dot(patch.reshape(Ht * W, cin), w_ref[dy, dx],
                            preferred_element_type=jnp.float32)
                acc = d if acc is None else acc + d

    o_ref[...] = acc.reshape(1, Ht * W, o_ref.shape[-1])


# ----------------------------------------------------------------------------
# Wrapper: PreImage.forward
# ----------------------------------------------------------------------------
def pre_image(x1, x2, image, weight):
    """x1:(B,C1,h,w), x2:(B,C2,H,W), image:(B,3,h,w) NCHW f32; weight:(Cout, C1+C2+3, 3, 3)."""
    B, C1, _, _ = x1.shape
    _, C2, H, W = x2.shape
    _, C3, Hi, Wi = image.shape
    Cout = weight.shape[0]

    # F.pad amounts (computed from image vs x2, applied to BOTH x1 and image,
    # exactly as in the PyTorch module), fused with the conv halo pad (+1).
    diffY = H - Hi
    diffX = W - Wi
    top, bot = diffY // 2 + 1, diffY - diffY // 2 + 1
    lft, rgt = diffX // 2 + 1, diffX - diffX // 2 + 1

    C12 = C1 + C2
    C12p = _round_up(C12, 8)
    C3p = _round_up(C3, 8)
    cout_pad = _round_up(Cout, 8)
    Hp, Wp = H + 2, W + 2

    def to_nhwc(t):
        return jnp.transpose(t, (0, 2, 3, 1)).astype(jnp.bfloat16)

    def pad(t, t_, b_, l_, r_, c_target):
        # lax.pad handles negative spatial amounts (cropping) like F.pad would.
        cfg = [(0, 0, 0), (t_, b_, 0), (l_, r_, 0), (0, c_target - t.shape[-1], 0)]
        return lax.pad(t, jnp.zeros((), t.dtype), cfg)

    # concat x1 + x2 into one lane-dense channel slab (zero-pad channels at the end)
    x12 = jnp.concatenate(
        [pad(to_nhwc(x1), top, bot, lft, rgt, C1),
         pad(to_nhwc(x2), 1, 1, 1, 1, C2 + (C12p - C12))], axis=-1)
    imn = pad(to_nhwc(image), top, bot, lft, rgt, C3p)

    # split OIHW weight by input, convert to HWIO, zero-pad I and O, cast bf16
    def prep_w(wk, cin_pad):
        wh = jnp.transpose(wk, (2, 3, 1, 0)).astype(jnp.bfloat16)  # (3,3,Ci,Cout)
        return jnp.pad(wh, ((0, 0), (0, 0),
                            (0, cin_pad - wh.shape[2]),
                            (0, cout_pad - Cout)))

    w12 = prep_w(weight[:, :C12], C12p)
    wim = prep_w(weight[:, C12:], C3p)

    Ht = _choose_row_tile(H, W)
    T = H // Ht

    kernel = functools.partial(_pre_image_kernel, Ht=Ht, W=W)
    out = pl.pallas_call(
        kernel,
        out_shape=jax.ShapeDtypeStruct((B, H * W, cout_pad), jnp.float32),
        grid=(B, T),
        in_specs=[
            # whole padded image per batch element; block index ignores the
            # H-tile axis so it is DMA'd once per batch element
            pl.BlockSpec((1, Hp, Wp, C12p), lambda b, t: (b, 0, 0, 0)),
            pl.BlockSpec((1, Hp, Wp, C3p), lambda b, t: (b, 0, 0, 0)),
            pl.BlockSpec((3, 3, C12p, cout_pad), lambda b, t: (0, 0, 0, 0)),
            pl.BlockSpec((3, 3, C3p, cout_pad), lambda b, t: (0, 0, 0, 0)),
        ],
        out_specs=pl.BlockSpec((1, Ht * W, cout_pad), lambda b, t: (b, t, 0)),
        compiler_params=pltpu.CompilerParams(
            dimension_semantics=("parallel", "arbitrary")),
    )(x12, imn, w12, wim)

    # drop the Cout padding; return NCHW like the PyTorch module
    out = jnp.transpose(out[..., :Cout], (0, 2, 1))
    return out.reshape(B, Cout, H, W)


# ----------------------------------------------------------------------------
# Pure-JAX reference (f32, HIGHEST precision) for correctness validation
# ----------------------------------------------------------------------------
def pre_image_reference(x1, x2, image, weight):
    diffY = x2.shape[2] - image.shape[2]
    diffX = x2.shape[3] - image.shape[3]
    padH = (diffY // 2, diffY - diffY // 2)
    padW = (diffX // 2, diffX - diffX // 2)
    image_p = jnp.pad(image, ((0, 0), (0, 0), padH, padW))
    x1_p = jnp.pad(x1, ((0, 0), (0, 0), padH, padW))
    x = jnp.concatenate([x1_p, x2, image_p], axis=1)
    return lax.conv_general_dilated(
        x, weight, window_strides=(1, 1), padding=((1, 1), (1, 1)),
        dimension_numbers=("NCHW", "OIHW", "NCHW"),
        precision=lax.Precision.HIGHEST)


# ----------------------------------------------------------------------------
if __name__ == "__main__":
    key = jax.random.PRNGKey(0)
    k1, k2, k3, kw = jax.random.split(key, 4)

    B, C1, C2, C3 = 2, 64, 64, 3
    H, W = 16, 16
    Hi, Wi = 14, 14   # x1 / image smaller than x2 -> exercises the F.pad path

    x1 = jax.random.normal(k1, (B, C1, Hi, Wi), jnp.float32)
    x2 = jax.random.normal(k2, (B, C2, H, W), jnp.float32)
    image = jax.random.normal(k3, (B, C3, Hi, Wi), jnp.float32)
    weight = 0.05 * jax.random.normal(kw, (3, C1 + C2 + C3, 3, 3), jnp.float32)

    out = jax.block_until_ready(pre_image(x1, x2, image, weight))
    assert out.shape == (B, 3, H, W), out.shape
    assert bool(jnp.all(jnp.isfinite(out)))

    ref = pre_image_reference(x1, x2, image, weight)
    err = float(jnp.max(jnp.abs(out - ref)))
    assert err < 0.1, f"max abs error vs reference: {err}"  # bf16 operands, f32 acc

    print("KERNEL_OK")
</pallas_src>

<mosaic_0001>
module attributes {stable_mosaic.version = 11 : i64} {
  func.func @_pre_image_kernel(%arg0: i32, %arg1: i32, %arg2: memref<1x18x18x128xbf16, #tpu.memory_space<vmem>>, %arg3: memref<1x18x18x8xbf16, #tpu.memory_space<vmem>>, %arg4: memref<3x3x128x8xbf16, #tpu.memory_space<vmem>>, %arg5: memref<3x3x8x8xbf16, #tpu.memory_space<vmem>>, %arg6: memref<1x128x8xf32, #tpu.memory_space<vmem>>) attributes {dimension_semantics = [#tpu.dimension_semantics<parallel>, #tpu.dimension_semantics<arbitrary>], iteration_bounds = array<i64: 2, 2>, scalar_prefetch = 0 : i64, scratch_operands = 0 : i64, tpu.core_type = #tpu.core_type<tc>, window_params = [{transform_indices = @transform_0, window_bounds = array<i64: 1, 18, 18, 128>}, {transform_indices = @transform_1, window_bounds = array<i64: 1, 18, 18, 8>}, {pipeline_mode = #tpu.pipeline_mode<synchronous>, transform_indices = @transform_2, window_bounds = array<i64: 3, 3, 128, 8>}, {pipeline_mode = #tpu.pipeline_mode<synchronous>, transform_indices = @transform_3, window_bounds = array<i64: 3, 3, 8, 8>}, {transform_indices = @transform_4, window_bounds = array<i64: 1, 128, 8>}]} {
    %c8_i32 = arith.constant 8 : i32
    %0 = arith.muli %arg1, %c8_i32 : i32
    %1 = tpu.assume_multiple %0, 8 : i32
    %c0_i32 = arith.constant 0 : i32
    %2 = arith.addi %1, %c0_i32 : i32
    %c0 = arith.constant 0 : index
    %3 = arith.index_cast %2 : i32 to index
    %c0_0 = arith.constant 0 : index
    %c0_1 = arith.constant 0 : index
    %4 = vector.load %arg2[%c0, %3, %c0_0, %c0_1] : memref<1x18x18x128xbf16, #tpu.memory_space<vmem>>, vector<1x8x16x128xbf16>
    %5 = vector.shape_cast %4 : vector<1x8x16x128xbf16> to vector<8x16x128xbf16>
    %6 = vector.shape_cast %5 : vector<8x16x128xbf16> to vector<128x128xbf16>
    %c0_2 = arith.constant 0 : index
    %c0_3 = arith.constant 0 : index
    %c0_4 = arith.constant 0 : index
    %c0_5 = arith.constant 0 : index
    %7 = vector.load %arg4[%c0_2, %c0_3, %c0_4, %c0_5] : memref<3x3x128x8xbf16, #tpu.memory_space<vmem>>, vector<1x1x128x8xbf16>
    %8 = vector.shape_cast %7 : vector<1x1x128x8xbf16> to vector<128x8xbf16>
    %cst = arith.constant dense<0.000000e+00> : vector<128x8xf32>
    %9 = tpu.matmul %6, %8, %cst {dimension_numbers = #tpu.dot_dimension_numbers<[1], [0], [0], [1], [0, 0, 1, 1], [], []>} : vector<128x128xbf16>, vector<128x8xbf16>, vector<128x8xf32> -> vector<128x8xf32>
    %c0_i32_6 = arith.constant 0 : i32
    %10 = arith.addi %1, %c0_i32_6 : i32
    %c0_7 = arith.constant 0 : index
    %11 = arith.index_cast %10 : i32 to index
    %c1 = arith.constant 1 : index
    %c0_8 = arith.constant 0 : index
    %12 = vector.load %arg2[%c0_7, %11, %c1, %c0_8] : memref<1x18x18x128xbf16, #tpu.memory_space<vmem>>, vector<1x8x16x128xbf16>
    %13 = vector.shape_cast %12 : vector<1x8x16x128xbf16> to vector<8x16x128xbf16>
    %14 = vector.shape_cast %13 : vector<8x16x128xbf16> to vector<128x128xbf16>
    %c0_9 = arith.constant 0 : index
    %c1_10 = arith.constant 1 : index
    %c0_11 = arith.constant 0 : index
    %c0_12 = arith.constant 0 : index
    %15 = vector.load %arg4[%c0_9, %c1_10, %c0_11, %c0_12] : memref<3x3x128x8xbf16, #tpu.memory_space<vmem>>, vector<1x1x128x8xbf16>
    %16 = vector.shape_cast %15 : vector<1x1x128x8xbf16> to vector<128x8xbf16>
    %cst_13 = arith.constant dense<0.000000e+00> : vector<128x8xf32>
    %17 = tpu.matmul %14, %16, %cst_13 {dimension_numbers = #tpu.dot_dimension_numbers<[1], [0], [0], [1], [0, 0, 1, 1], [], []>} : vector<128x128xbf16>, vector<128x8xbf16>, vector<128x8xf32> -> vector<128x8xf32>
    %18 = arith.addf %9, %17 : vector<128x8xf32>
    %c0_i32_14 = arith.constant 0 : i32
    %19 = arith.addi %1, %c0_i32_14 : i32
    %c0_15 = arith.constant 0 : index
    %20 = arith.index_cast %19 : i32 to index
    %c2 = arith.constant 2 : index
    %c0_16 = arith.constant 0 : index
    %21 = vector.load %arg2[%c0_15, %20, %c2, %c0_16] : memref<1x18x18x128xbf16, #tpu.memory_space<vmem>>, vector<1x8x16x128xbf16>
    %22 = vector.shape_cast %21 : vector<1x8x16x128xbf16> to vector<8x16x128xbf16>
    %23 = vector.shape_cast %22 : vector<8x16x128xbf16> to vector<128x128xbf16>
    %c0_17 = arith.constant 0 : index
    %c2_18 = arith.constant 2 : index
    %c0_19 = arith.constant 0 : index
    %c0_20 = arith.constant 0 : index
    %24 = vector.load %arg4[%c0_17, %c2_18, %c0_19, %c0_20] : memref<3x3x128x8xbf16, #tpu.memory_space<vmem>>, vector<1x1x128x8xbf16>
    %25 = vector.shape_cast %24 : vector<1x1x128x8xbf16> to vector<128x8xbf16>
    %cst_21 = arith.constant dense<0.000000e+00> : vector<128x8xf32>
    %26 = tpu.matmul %23, %25, %cst_21 {dimension_numbers = #tpu.dot_dimension_numbers<[1], [0], [0], [1], [0, 0, 1, 1], [], []>} : vector<128x128xbf16>, vector<128x8xbf16>, vector<128x8xf32> -> vector<128x8xf32>
    %27 = arith.addf %18, %26 : vector<128x8xf32>
    %c1_i32 = arith.constant 1 : i32
    %28 = arith.addi %1, %c1_i32 : i32
    %c0_22 = arith.constant 0 : index
    %29 = arith.index_cast %28 : i32 to index
    %c0_23 = arith.constant 0 : index
    %c0_24 = arith.constant 0 : index
    %30 = vector.load %arg2[%c0_22, %29, %c0_23, %c0_24] : memref<1x18x18x128xbf16, #tpu.memory_space<vmem>>, vector<1x8x16x128xbf16>
    %31 = vector.shape_cast %30 : vector<1x8x16x128xbf16> to vector<8x16x128xbf16>
    %32 = vector.shape_cast %31 : vector<8x16x128xbf16> to vector<128x128xbf16>
    %c1_25 = arith.constant 1 : index
    %c0_26 = arith.constant 0 : index
    %c0_27 = arith.constant 0 : index
    %c0_28 = arith.constant 0 : index
    %33 = vector.load %arg4[%c1_25, %c0_26, %c0_27, %c0_28] : memref<3x3x128x8xbf16, #tpu.memory_space<vmem>>, vector<1x1x128x8xbf16>
    %34 = vector.shape_cast %33 : vector<1x1x128x8xbf16> to vector<128x8xbf16>
    %cst_29 = arith.constant dense<0.000000e+00> : vector<128x8xf32>
    %35 = tpu.matmul %32, %34, %cst_29 {dimension_numbers = #tpu.dot_dimension_numbers<[1], [0], [0], [1], [0, 0, 1, 1], [], []>} : vector<128x128xbf16>, vector<128x8xbf16>, vector<128x8xf32> -> vector<128x8xf32>
    %36 = arith.addf %27, %35 : vector<128x8xf32>
    %c1_i32_30 = arith.constant 1 : i32
    %37 = arith.addi %1, %c1_i32_30 : i32
    %c0_31 = arith.constant 0 : index
    %38 = arith.index_cast %37 : i32 to index
    %c1_32 = arith.constant 1 : index
    %c0_33 = arith.constant 0 : index
    %39 = vector.load %arg2[%c0_31, %38, %c1_32, %c0_33] : memref<1x18x18x128xbf16, #tpu.memory_space<vmem>>, vector<1x8x16x128xbf16>
    %40 = vector.shape_cast %39 : vector<1x8x16x128xbf16> to vector<8x16x128xbf16>
    %41 = vector.shape_cast %40 : vector<8x16x128xbf16> to vector<128x128xbf16>
    %c1_34 = arith.constant 1 : index
    %c1_35 = arith.constant 1 : index
    %c0_36 = arith.constant 0 : index
    %c0_37 = arith.constant 0 : index
    %42 = vector.load %arg4[%c1_34, %c1_35, %c0_36, %c0_37] : memref<3x3x128x8xbf16, #tpu.memory_space<vmem>>, vector<1x1x128x8xbf16>
    %43 = vector.shape_cast %42 : vector<1x1x128x8xbf16> to vector<128x8xbf16>
    %cst_38 = arith.constant dense<0.000000e+00> : vector<128x8xf32>
    %44 = tpu.matmul %41, %43, %cst_38 {dimension_numbers = #tpu.dot_dimension_numbers<[1], [0], [0], [1], [0, 0, 1, 1], [], []>} : vector<128x128xbf16>, vector<128x8xbf16>, vector<128x8xf32> -> vector<128x8xf32>
    %45 = arith.addf %36, %44 : vector<128x8xf32>
    %c1_i32_39 = arith.constant 1 : i32
    %46 = arith.addi %1, %c1_i32_39 : i32
    %c0_40 = arith.constant 0 : index
    %47 = arith.index_cast %46 : i32 to index
    %c2_41 = arith.constant 2 : index
    %c0_42 = arith.constant 0 : index
    %48 = vector.load %arg2[%c0_40, %47, %c2_41, %c0_42] : memref<1x18x18x128xbf16, #tpu.memory_space<vmem>>, vector<1x8x16x128xbf16>
    %49 = vector.shape_cast %48 : vector<1x8x16x128xbf16> to vector<8x16x128xbf16>
    %50 = vector.shape_cast %49 : vector<8x16x128xbf16> to vector<128x128xbf16>
    %c1_43 = arith.constant 1 : index
    %c2_44 = arith.constant 2 : index
    %c0_45 = arith.constant 0 : index
    %c0_46 = arith.constant 0 : index
    %51 = vector.load %arg4[%c1_43, %c2_44, %c0_45, %c0_46] : memref<3x3x128x8xbf16, #tpu.memory_space<vmem>>, vector<1x1x128x8xbf16>
    %52 = vector.shape_cast %51 : vector<1x1x128x8xbf16> to vector<128x8xbf16>
    %cst_47 = arith.constant dense<0.000000e+00> : vector<128x8xf32>
    %53 = tpu.matmul %50, %52, %cst_47 {dimension_numbers = #tpu.dot_dimension_numbers<[1], [0], [0], [1], [0, 0, 1, 1], [], []>} : vector<128x128xbf16>, vector<128x8xbf16>, vector<128x8xf32> -> vector<128x8xf32>
    %54 = arith.addf %45, %53 : vector<128x8xf32>
    %c2_i32 = arith.constant 2 : i32
    %55 = arith.addi %1, %c2_i32 : i32
    %c0_48 = arith.constant 0 : index
    %56 = arith.index_cast %55 : i32 to index
    %c0_49 = arith.constant 0 : index
    %c0_50 = arith.constant 0 : index
    %57 = vector.load %arg2[%c0_48, %56, %c0_49, %c0_50] : memref<1x18x18x128xbf16, #tpu.memory_space<vmem>>, vector<1x8x16x128xbf16>
    %58 = vector.shape_cast %57 : vector<1x8x16x128xbf16> to vector<8x16x128xbf16>
    %59 = vector.shape_cast %58 : vector<8x16x128xbf16> to vector<128x128xbf16>
    %c2_51 = arith.constant 2 : index
    %c0_52 = arith.constant 0 : index
    %c0_53 = arith.constant 0 : index
    %c0_54 = arith.constant 0 : index
    %60 = vector.load %arg4[%c2_51, %c0_52, %c0_53, %c0_54] : memref<3x3x128x8xbf16, #tpu.memory_space<vmem>>, vector<1x1x128x8xbf16>
    %61 = vector.shape_cast %60 : vector<1x1x128x8xbf16> to vector<128x8xbf16>
    %cst_55 = arith.constant dense<0.000000e+00> : vector<128x8xf32>
    %62 = tpu.matmul %59, %61, %cst_55 {dimension_numbers = #tpu.dot_dimension_numbers<[1], [0], [0], [1], [0, 0, 1, 1], [], []>} : vector<128x128xbf16>, vector<128x8xbf16>, vector<128x8xf32> -> vector<128x8xf32>
    %63 = arith.addf %54, %62 : vector<128x8xf32>
    %c2_i32_56 = arith.constant 2 : i32
    %64 = arith.addi %1, %c2_i32_56 : i32
    %c0_57 = arith.constant 0 : index
    %65 = arith.index_cast %64 : i32 to index
    %c1_58 = arith.constant 1 : index
    %c0_59 = arith.constant 0 : index
    %66 = vector.load %arg2[%c0_57, %65, %c1_58, %c0_59] : memref<1x18x18x128xbf16, #tpu.memory_space<vmem>>, vector<1x8x16x128xbf16>
    %67 = vector.shape_cast %66 : vector<1x8x16x128xbf16> to vector<8x16x128xbf16>
    %68 = vector.shape_cast %67 : vector<8x16x128xbf16> to vector<128x128xbf16>
    %c2_60 = arith.constant 2 : index
    %c1_61 = arith.constant 1 : index
    %c0_62 = arith.constant 0 : index
    %c0_63 = arith.constant 0 : index
    %69 = vector.load %arg4[%c2_60, %c1_61, %c0_62, %c0_63] : memref<3x3x128x8xbf16, #tpu.memory_space<vmem>>, vector<1x1x128x8xbf16>
    %70 = vector.shape_cast %69 : vector<1x1x128x8xbf16> to vector<128x8xbf16>
    %cst_64 = arith.constant dense<0.000000e+00> : vector<128x8xf32>
    %71 = tpu.matmul %68, %70, %cst_64 {dimension_numbers = #tpu.dot_dimension_numbers<[1], [0], [0], [1], [0, 0, 1, 1], [], []>} : vector<128x128xbf16>, vector<128x8xbf16>, vector<128x8xf32> -> vector<128x8xf32>
    %72 = arith.addf %63, %71 : vector<128x8xf32>
    %c2_i32_65 = arith.constant 2 : i32
    %73 = arith.addi %1, %c2_i32_65 : i32
    %c0_66 = arith.constant 0 : index
    %74 = arith.index_cast %73 : i32 to index
    %c2_67 = arith.constant 2 : index
    %c0_68 = arith.constant 0 : index
    %75 = vector.load %arg2[%c0_66, %74, %c2_67, %c0_68] : memref<1x18x18x128xbf16, #tpu.memory_space<vmem>>, vector<1x8x16x128xbf16>
    %76 = vector.shape_cast %75 : vector<1x8x16x128xbf16> to vector<8x16x128xbf16>
    %77 = vector.shape_cast %76 : vector<8x16x128xbf16> to vector<128x128xbf16>
    %c2_69 = arith.constant 2 : index
    %c2_70 = arith.constant 2 : index
    %c0_71 = arith.constant 0 : index
    %c0_72 = arith.constant 0 : index
    %78 = vector.load %arg4[%c2_69, %c2_70, %c0_71, %c0_72] : memref<3x3x128x8xbf16, #tpu.memory_space<vmem>>, vector<1x1x128x8xbf16>
    %79 = vector.shape_cast %78 : vector<1x1x128x8xbf16> to vector<128x8xbf16>
    %cst_73 = arith.constant dense<0.000000e+00> : vector<128x8xf32>
    %80 = tpu.matmul %77, %79, %cst_73 {dimension_numbers = #tpu.dot_dimension_numbers<[1], [0], [0], [1], [0, 0, 1, 1], [], []>} : vector<128x128xbf16>, vector<128x8xbf16>, vector<128x8xf32> -> vector<128x8xf32>
    %81 = arith.addf %72, %80 : vector<128x8xf32>
    %c0_i32_74 = arith.constant 0 : i32
    %82 = arith.addi %1, %c0_i32_74 : i32
    %c0_75 = arith.constant 0 : index
    %83 = arith.index_cast %82 : i32 to index
    %c0_76 = arith.constant 0 : index
    %c0_77 = arith.constant 0 : index
    %84 = vector.load %arg3[%c0_75, %83, %c0_76, %c0_77] : memref<1x18x18x8xbf16, #tpu.memory_space<vmem>>, vector<1x8x16x8xbf16>
    %85 = vector.shape_cast %84 : vector<1x8x16x8xbf16> to vector<8x16x8xbf16>
    %86 = vector.shape_cast %85 : vector<8x16x8xbf16> to vector<128x8xbf16>
    %c0_78 = arith.constant 0 : index
    %c0_79 = arith.constant 0 : index
    %c0_80 = arith.constant 0 : index
    %c0_81 = arith.constant 0 : index
    %87 = vector.load %arg5[%c0_78, %c0_79, %c0_80, %c0_81] : memref<3x3x8x8xbf16, #tpu.memory_space<vmem>>, vector<1x1x8x8xbf16>
    %88 = vector.shape_cast %87 : vector<1x1x8x8xbf16> to vector<8x8xbf16>
    %cst_82 = arith.constant dense<0.000000e+00> : vector<128x8xf32>
    %89 = tpu.matmul %86, %88, %cst_82 {dimension_numbers = #tpu.dot_dimension_numbers<[1], [0], [0], [1], [0, 0, 1, 1], [], []>} : vector<128x8xbf16>, vector<8x8xbf16>, vector<128x8xf32> -> vector<128x8xf32>
    %90 = arith.addf %81, %89 : vector<128x8xf32>
    %c0_i32_83 = arith.constant 0 : i32
    %91 = arith.addi %1, %c0_i32_83 : i32
    %c0_84 = arith.constant 0 : index
    %92 = arith.index_cast %91 : i32 to index
    %c1_85 = arith.constant 1 : index
    %c0_86 = arith.constant 0 : index
    %93 = vector.load %arg3[%c0_84, %92, %c1_85, %c0_86] : memref<1x18x18x8xbf16, #tpu.memory_space<vmem>>, vector<1x8x16x8xbf16>
    %94 = vector.shape_cast %93 : vector<1x8x16x8xbf16> to vector<8x16x8xbf16>
    %95 = vector.shape_cast %94 : vector<8x16x8xbf16> to vector<128x8xbf16>
    %c0_87 = arith.constant 0 : index
    %c1_88 = arith.constant 1 : index
    %c0_89 = arith.constant 0 : index
    %c0_90 = arith.constant 0 : index
    %96 = vector.load %arg5[%c0_87, %c1_88, %c0_89, %c0_90] : memref<3x3x8x8xbf16, #tpu.memory_space<vmem>>, vector<1x1x8x8xbf16>
    %97 = vector.shape_cast %96 : vector<1x1x8x8xbf16> to vector<8x8xbf16>
    %cst_91 = arith.constant dense<0.000000e+00> : vector<128x8xf32>
    %98 = tpu.matmul %95, %97, %cst_91 {dimension_numbers = #tpu.dot_dimension_numbers<[1], [0], [0], [1], [0, 0, 1, 1], [], []>} : vector<128x8xbf16>, vector<8x8xbf16>, vector<128x8xf32> -> vector<128x8xf32>
    %99 = arith.addf %90, %98 : vector<128x8xf32>
    %c0_i32_92 = arith.constant 0 : i32
    %100 = arith.addi %1, %c0_i32_92 : i32
    %c0_93 = arith.constant 0 : index
    %101 = arith.index_cast %100 : i32 to index
    %c2_94 = arith.constant 2 : index
    %c0_95 = arith.constant 0 : index
    %102 = vector.load %arg3[%c0_93, %101, %c2_94, %c0_95] : memref<1x18x18x8xbf16, #tpu.memory_space<vmem>>, vector<1x8x16x8xbf16>
    %103 = vector.shape_cast %102 : vector<1x8x16x8xbf16> to vector<8x16x8xbf16>
    %104 = vector.shape_cast %103 : vector<8x16x8xbf16> to vector<128x8xbf16>
    %c0_96 = arith.constant 0 : index
    %c2_97 = arith.constant 2 : index
    %c0_98 = arith.constant 0 : index
    %c0_99 = arith.constant 0 : index
    %105 = vector.load %arg5[%c0_96, %c2_97, %c0_98, %c0_99] : memref<3x3x8x8xbf16, #tpu.memory_space<vmem>>, vector<1x1x8x8xbf16>
    %106 = vector.shape_cast %105 : vector<1x1x8x8xbf16> to vector<8x8xbf16>
    %cst_100 = arith.constant dense<0.000000e+00> : vector<128x8xf32>
    %107 = tpu.matmul %104, %106, %cst_100 {dimension_numbers = #tpu.dot_dimension_numbers<[1], [0], [0], [1], [0, 0, 1, 1], [], []>} : vector<128x8xbf16>, vector<8x8xbf16>, vector<128x8xf32> -> vector<128x8xf32>
    %108 = arith.addf %99, %107 : vector<128x8xf32>
    %c1_i32_101 = arith.constant 1 : i32
    %109 = arith.addi %1, %c1_i32_101 : i32
    %c0_102 = arith.constant 0 : index
    %110 = arith.index_cast %109 : i32 to index
    %c0_103 = arith.constant 0 : index
    %c0_104 = arith.constant 0 : index
    %111 = vector.load %arg3[%c0_102, %110, %c0_103, %c0_104] : memref<1x18x18x8xbf16, #tpu.memory_space<vmem>>, vector<1x8x16x8xbf16>
    %112 = vector.shape_cast %111 : vector<1x8x16x8xbf16> to vector<8x16x8xbf16>
    %113 = vector.shape_cast %112 : vector<8x16x8xbf16> to vector<128x8xbf16>
    %c1_105 = arith.constant 1 : index
    %c0_106 = arith.constant 0 : index
    %c0_107 = arith.constant 0 : index
    %c0_108 = arith.constant 0 : index
    %114 = vector.load %arg5[%c1_105, %c0_106, %c0_107, %c0_108] : memref<3x3x8x8xbf16, #tpu.memory_space<vmem>>, vector<1x1x8x8xbf16>
    %115 = vector.shape_cast %114 : vector<1x1x8x8xbf16> to vector<8x8xbf16>
    %cst_109 = arith.constant dense<0.000000e+00> : vector<128x8xf32>
    %116 = tpu.matmul %113, %115, %cst_109 {dimension_numbers = #tpu.dot_dimension_numbers<[1], [0], [0], [1], [0, 0, 1, 1], [], []>} : vector<128x8xbf16>, vector<8x8xbf16>, vector<128x8xf32> -> vector<128x8xf32>
    %117 = arith.addf %108, %116 : vector<128x8xf32>
    %c1_i32_110 = arith.constant 1 : i32
    %118 = arith.addi %1, %c1_i32_110 : i32
    %c0_111 = arith.constant 0 : index
    %119 = arith.index_cast %118 : i32 to index
    %c1_112 = arith.constant 1 : index
    %c0_113 = arith.constant 0 : index
    %120 = vector.load %arg3[%c0_111, %119, %c1_112, %c0_113] : memref<1x18x18x8xbf16, #tpu.memory_space<vmem>>, vector<1x8x16x8xbf16>
    %121 = vector.shape_cast %120 : vector<1x8x16x8xbf16> to vector<8x16x8xbf16>
    %122 = vector.shape_cast %121 : vector<8x16x8xbf16> to vector<128x8xbf16>
    %c1_114 = arith.constant 1 : index
    %c1_115 = arith.constant 1 : index
    %c0_116 = arith.constant 0 : index
    %c0_117 = arith.constant 0 : index
    %123 = vector.load %arg5[%c1_114, %c1_115, %c0_116, %c0_117] : memref<3x3x8x8xbf16, #tpu.memory_space<vmem>>, vector<1x1x8x8xbf16>
    %124 = vector.shape_cast %123 : vector<1x1x8x8xbf16> to vector<8x8xbf16>
    %cst_118 = arith.constant dense<0.000000e+00> : vector<128x8xf32>
    %125 = tpu.matmul %122, %124, %cst_118 {dimension_numbers = #tpu.dot_dimension_numbers<[1], [0], [0], [1], [0, 0, 1, 1], [], []>} : vector<128x8xbf16>, vector<8x8xbf16>, vector<128x8xf32> -> vector<128x8xf32>
    %126 = arith.addf %117, %125 : vector<128x8xf32>
    %c1_i32_119 = arith.constant 1 : i32
    %127 = arith.addi %1, %c1_i32_119 : i32
    %c0_120 = arith.constant 0 : index
    %128 = arith.index_cast %127 : i32 to index
    %c2_121 = arith.constant 2 : index
    %c0_122 = arith.constant 0 : index
    %129 = vector.load %arg3[%c0_120, %128, %c2_121, %c0_122] : memref<1x18x18x8xbf16, #tpu.memory_space<vmem>>, vector<1x8x16x8xbf16>
    %130 = vector.shape_cast %129 : vector<1x8x16x8xbf16> to vector<8x16x8xbf16>
    %131 = vector.shape_cast %130 : vector<8x16x8xbf16> to vector<128x8xbf16>
    %c1_123 = arith.constant 1 : index
    %c2_124 = arith.constant 2 : index
    %c0_125 = arith.constant 0 : index
    %c0_126 = arith.constant 0 : index
    %132 = vector.load %arg5[%c1_123, %c2_124, %c0_125, %c0_126] : memref<3x3x8x8xbf16, #tpu.memory_space<vmem>>, vector<1x1x8x8xbf16>
    %133 = vector.shape_cast %132 : vector<1x1x8x8xbf16> to vector<8x8xbf16>
    %cst_127 = arith.constant dense<0.000000e+00> : vector<128x8xf32>
    %134 = tpu.matmul %131, %133, %cst_127 {dimension_numbers = #tpu.dot_dimension_numbers<[1], [0], [0], [1], [0, 0, 1, 1], [], []>} : vector<128x8xbf16>, vector<8x8xbf16>, vector<128x8xf32> -> vector<128x8xf32>
    %135 = arith.addf %126, %134 : vector<128x8xf32>
    %c2_i32_128 = arith.constant 2 : i32
    %136 = arith.addi %1, %c2_i32_128 : i32
    %c0_129 = arith.constant 0 : index
    %137 = arith.index_cast %136 : i32 to index
    %c0_130 = arith.constant 0 : index
    %c0_131 = arith.constant 0 : index
    %138 = vector.load %arg3[%c0_129, %137, %c0_130, %c0_131] : memref<1x18x18x8xbf16, #tpu.memory_space<vmem>>, vector<1x8x16x8xbf16>
    %139 = vector.shape_cast %138 : vector<1x8x16x8xbf16> to vector<8x16x8xbf16>
    %140 = vector.shape_cast %139 : vector<8x16x8xbf16> to vector<128x8xbf16>
    %c2_132 = arith.constant 2 : index
    %c0_133 = arith.constant 0 : index
    %c0_134 = arith.constant 0 : index
    %c0_135 = arith.constant 0 : index
    %141 = vector.load %arg5[%c2_132, %c0_133, %c0_134, %c0_135] : memref<3x3x8x8xbf16, #tpu.memory_space<vmem>>, vector<1x1x8x8xbf16>
    %142 = vector.shape_cast %141 : vector<1x1x8x8xbf16> to vector<8x8xbf16>
    %cst_136 = arith.constant dense<0.000000e+00> : vector<128x8xf32>
    %143 = tpu.matmul %140, %142, %cst_136 {dimension_numbers = #tpu.dot_dimension_numbers<[1], [0], [0], [1], [0, 0, 1, 1], [], []>} : vector<128x8xbf16>, vector<8x8xbf16>, vector<128x8xf32> -> vector<128x8xf32>
    %144 = arith.addf %135, %143 : vector<128x8xf32>
    %c2_i32_137 = arith.constant 2 : i32
    %145 = arith.addi %1, %c2_i32_137 : i32
    %c0_138 = arith.constant 0 : index
    %146 = arith.index_cast %145 : i32 to index
    %c1_139 = arith.constant 1 : index
    %c0_140 = arith.constant 0 : index
    %147 = vector.load %arg3[%c0_138, %146, %c1_139, %c0_140] : memref<1x18x18x8xbf16, #tpu.memory_space<vmem>>, vector<1x8x16x8xbf16>
    %148 = vector.shape_cast %147 : vector<1x8x16x8xbf16> to vector<8x16x8xbf16>
    %149 = vector.shape_cast %148 : vector<8x16x8xbf16> to vector<128x8xbf16>
    %c2_141 = arith.constant 2 : index
    %c1_142 = arith.constant 1 : index
    %c0_143 = arith.constant 0 : index
    %c0_144 = arith.constant 0 : index
    %150 = vector.load %arg5[%c2_141, %c1_142, %c0_143, %c0_144] : memref<3x3x8x8xbf16, #tpu.memory_space<vmem>>, vector<1x1x8x8xbf16>
    %151 = vector.shape_cast %150 : vector<1x1x8x8xbf16> to vector<8x8xbf16>
    %cst_145 = arith.constant dense<0.000000e+00> : vector<128x8xf32>
    %152 = tpu.matmul %149, %151, %cst_145 {dimension_numbers = #tpu.dot_dimension_numbers<[1], [0], [0], [1], [0, 0, 1, 1], [], []>} : vector<128x8xbf16>, vector<8x8xbf16>, vector<128x8xf32> -> vector<128x8xf32>
    %153 = arith.addf %144, %152 : vector<128x8xf32>
    %c2_i32_146 = arith.constant 2 : i32
    %154 = arith.addi %1, %c2_i32_146 : i32
    %c0_147 = arith.constant 0 : index
    %155 = arith.index_cast %154 : i32 to index
    %c2_148 = arith.constant 2 : index
    %c0_149 = arith.constant 0 : index
    %156 = vector.load %arg3[%c0_147, %155, %c2_148, %c0_149] : memref<1x18x18x8xbf16, #tpu.memory_space<vmem>>, vector<1x8x16x8xbf16>
    %157 = vector.shape_cast %156 : vector<1x8x16x8xbf16> to vector<8x16x8xbf16>
    %158 = vector.shape_cast %157 : vector<8x16x8xbf16> to vector<128x8xbf16>
    %c2_150 = arith.constant 2 : index
    %c2_151 = arith.constant 2 : index
    %c0_152 = arith.constant 0 : index
    %c0_153 = arith.constant 0 : index
    %159 = vector.load %arg5[%c2_150, %c2_151, %c0_152, %c0_153] : memref<3x3x8x8xbf16, #tpu.memory_space<vmem>>, vector<1x1x8x8xbf16>
    %160 = vector.shape_cast %159 : vector<1x1x8x8xbf16> to vector<8x8xbf16>
    %cst_154 = arith.constant dense<0.000000e+00> : vector<128x8xf32>
    %161 = tpu.matmul %158, %160, %cst_154 {dimension_numbers = #tpu.dot_dimension_numbers<[1], [0], [0], [1], [0, 0, 1, 1], [], []>} : vector<128x8xbf16>, vector<8x8xbf16>, vector<128x8xf32> -> vector<128x8xf32>
    %162 = arith.addf %153, %161 : vector<128x8xf32>
    %163 = vector.shape_cast %162 : vector<128x8xf32> to vector<1x128x8xf32>
    %c0_155 = arith.constant 0 : index
    %c0_156 = arith.constant 0 : index
    %c0_157 = arith.constant 0 : index
    %164 = vector.load %arg6[%c0_155, %c0_156, %c0_157] : memref<1x128x8xf32, #tpu.memory_space<vmem>>, vector<1x128x8xf32>
    tpu.vector_store %arg6[%c0_155, %c0_156, %c0_157], %163 {strides = array<i32>} : memref<1x128x8xf32, #tpu.memory_space<vmem>>, vector<1x128x8xf32>,
    return
  }
  func.func @transform_0(%arg0: i32, %arg1: i32) -> (i32, i32, i32, i32) {
    %c0_i32 = arith.constant 0 : i32
    %c0_i32_0 = arith.constant 0 : i32
    %c0_i32_1 = arith.constant 0 : i32
    %c0_i32_2 = arith.constant 0 : i32
    return %arg0, %c0_i32, %c0_i32_0, %c0_i32_1 : i32, i32, i32, i32
  }
  func.func @transform_1(%arg0: i32, %arg1: i32) -> (i32, i32, i32, i32) {
    %c0_i32 = arith.constant 0 : i32
    %c0_i32_0 = arith.constant 0 : i32
    %c0_i32_1 = arith.constant 0 : i32
    %c0_i32_2 = arith.constant 0 : i32
    return %arg0, %c0_i32, %c0_i32_0, %c0_i32_1 : i32, i32, i32, i32
  }
  func.func @transform_2(%arg0: i32, %arg1: i32) -> (i32, i32, i32, i32) {
    %c0_i32 = arith.constant 0 : i32
    %c0_i32_0 = arith.constant 0 : i32
    %c0_i32_1 = arith.constant 0 : i32
    %c0_i32_2 = arith.constant 0 : i32
    %c0_i32_3 = arith.constant 0 : i32
    return %c0_i32, %c0_i32_0, %c0_i32_1, %c0_i32_2 : i32, i32, i32, i32
  }
  func.func @transform_3(%arg0: i32, %arg1: i32) -> (i32, i32, i32, i32) {
    %c0_i32 = arith.constant 0 : i32
    %c0_i32_0 = arith.constant 0 : i32
    %c0_i32_1 = arith.constant 0 : i32
    %c0_i32_2 = arith.constant 0 : i32
    %c0_i32_3 = arith.constant 0 : i32
    return %c0_i32, %c0_i32_0, %c0_i32_1, %c0_i32_2 : i32, i32, i32, i32
  }
  func.func @transform_4(%arg0: i32, %arg1: i32) -> (i32, i32, i32) {
    %c0_i32 = arith.constant 0 : i32
    %c0_i32_0 = arith.constant 0 : i32
    return %arg0, %arg1, %c0_i32 : i32, i32, i32
  }
}

</mosaic_0001>

<bundles_post_ra>
// kernel: tpu_custom_call.1
= control target key start
LH: loop header
LB: loop body
LE: loop exit
PB: predicated region body
PF: predicated region fallthrough
CT: control target
= control target key end

     0   :  { %s7342_s15 = smov 0   ;;  %s7344_s16 = smov 0   ;;  %s9246_s0 = inlined_call_operand.vmem [shape: bf16[2,18,18,128], index: 0, kind: input, shape index: {}]   ;;  %s9247_s1 = inlined_call_operand.vmem [shape: bf16[2,18,18,8], index: 1, kind: input, shape index: {}]   ;;  %s9248_s2 = inlined_call_operand.vmem [shape: bf16[3,3,128,8], index: 2, kind: input, shape index: {}]   ;;  %s9249_s3 = inlined_call_operand.vmem [shape: bf16[3,3,8,8], index: 3, kind: input, shape index: {}]   ;;  %s9250_s4 = inlined_call_operand.vmem [shape: f32[2,256,8], index: 4, kind: output, shape index: {}]  }
   0x1   :  { %s7346_s17 = smov 0   ;;  %s7348_s18 = smov 0  }
   0x2   :  { %s7350_s19 = smov 0  }
   0x3 LB: > { %s23_s20 = sadd.s32 1, %s7307_s17  ;;  %s26_s21 = sadd.s32 1, %s7311_s18  ;;  %s7315_s19 = sphi %s7350_s19, %s14_s19   ;;  %s7311_s18 = sphi %s7348_s18, %s9294_s18   ;;  %s7307_s17 = sphi %s7346_s17, %s9293_s17   ;;  %s7303_s16 = sphi %s7344_s16, %s9292_s16   ;;  %s7299_s15 = sphi %s7342_s15, %s9291_s15  }
   0x4   : > { %p24_p0 = scmp.ge.s32.totalorder %s23_s20, 2  ;;  %p5746_p1 = scmp.ge.s32.totalorder %s7315_s19, 1 }
   0x5   : > { %p186_p2 = scmp.lt.s32.totalorder %s7315_s19, 5 }
   0x6   : > { %s9296_s20 = smov (%p24_p0, %s23_s20), 0  ;;  %s9298_s21 = smov (!%p24_p0, %s26_s21), %s7311_s18 }
   0x7   : > { %p187_p3 = pnand %p5746_p1, %p186_p2  ;;  %p28_p4 = scmp.ge.s32.totalorder %s9298_s21, 2 }
   0x9   : > { %s9300_s21 = smov (%p28_p4, %s9298_s21), 0  ;;  %190 = sbr.rel (%p187_p3) target bundleno = 561 (0x231), region = 36 }
   0xe   : > { %v7157_v0 = vld [vmem:[%s9248_s2 + $0x78] sm:$0xff]   ;;  %p221_p5 = scmp.lt.s32.totalorder %s7303_s16, 1  ;;  %v7159_v2 = vld [vmem:[%s9248_s2 + $0x70] sm:$0xff]   ;;  %v7161_v4 = vld [vmem:[%s9248_s2 + $0x68] sm:$0xff]   ;;  %s6430_s9 = smul.u32 96, %s7299_s15  ;;  %vm892_vm3 = vcmask 1042432  }
   0xf   : > { %v7158_v1 = vld [vmem:[%s9248_s2 + $0x38] sm:$0xff]   ;;  %6657 = vmatprep.subr.bf16.mxu0 %v7157_v0  ;;  %v7160_v3 = vld [vmem:[%s9248_s2 + $0x30] sm:$0xff]   ;;  %v7162_v5 = vld [vmem:[%s9248_s2 + $0x28] sm:$0xff]   ;;  %vm286_vm0 = vsmask.f32 3328  ;;  %vm893_vm4 = vcmask 1046532  }
  0x10   : > { %s9302_s16 = smov (!%p221_p5, %s7303_s16), 1  ;;  %6689 = vmatprep.subr.bf16.mxu1 %v7158_v1  ;;  %6658 = vmatpush3.bf16.msra.mxu0 %v7157_v0  ;;  %v7163_v6 = vld [vmem:[%s9248_s2 + $0x60] sm:$0xff]   ;;  %v7165_v8 = vld [vmem:[%s9248_s2 + $0x58] sm:$0xff]   ;;  %v7167_v10 = vld [vmem:[%s9248_s2 + $0x50] sm:$0xff]   ;;  %vm287_vm1 = vsmask.f32 7440 }
  0x11   : > { %6690 = vmatpush3.bf16.msra.mxu1 %v7158_v1  ;;  %6659 = vmatprep.subr.bf16.mxu0 %v7159_v2  ;;  %s7116_s6 = smul.u32 216, %s9302_s16  ;;  %v7164_v7 = vld [vmem:[%s9248_s2 + $0x20] sm:$0xff]   ;;  %v7166_v9 = vld [vmem:[%s9248_s2 + $0x18] sm:$0xff]   ;;  %v7168_v11 = vld [vmem:[%s9248_s2 + $0x10] sm:$0xff]   ;;  %vm3185_vm6 = vcmask 1043456   ;;  %vm3160_vm7 = vcmask 64512  }
  0x12   : > { %6691 = vmatprep.subr.bf16.mxu1 %v7160_v3  ;;  %v7169_v26 = vld [vmem:[%s9248_s2 + $0x48] sm:$0xff]   ;;  %v7171_v35 = vld [vmem:[%s9248_s2 + $0x40] sm:$0xff]   ;;  %vm7459_vm2 = vmor %vm286_vm0, %vm287_vm1 }
  0x13   : > { %s230_s12 = scalar_lea.vmem %s9247_s1, %s7116_s6  ;;  %s225_s27 = scalar_lea.vmem %s9246_s0, %s7116_s6  ;;  %v7170_v30 = vld [vmem:[%s9248_s2 + $0x8] sm:$0xff]   ;;  %v7172_v47 = vld [vmem:[%s9248_s2] sm:$0xff]   ;;  %v7175_v55 = vld [vmem:[%s9248_s2 + $0xb8] sm:$0xff]  }
  0x14   : > { %6660 = vmatpush3.bf16.msra.mxu0 %v7159_v2  ;;  %s7399_s13 = scalar_lea.vmem %s230_s12, %s6430_s9  ;;  %s7416_s7 = scalar_lea.vmem %s225_s27, %s6430_s9  ;;  %v7176_v61 = vld [vmem:[%s9248_s2 + $0xf8] sm:$0xff]   ;;  %vm7632_vm5 = vmor %vm892_vm3, %vm893_vm4 }
  0x15   : > { %6692 = vmatpush3.bf16.msra.mxu1 %v7160_v3  ;;  %6661 = vmatprep.subr.bf16.mxu0 %v7161_v4  ;;  %v246_v12 = vld [vmem:[%s7416_s7] sm:$0xf]  ;;  %v7426_v13 = vld [vmem:[%s7416_s7 + $0x4] sm:$0xf]  ;;  %v7429_v14 = vld [vmem:[%s7416_s7 + $0x8] sm:$0x1] }
  0x16   : > { %6693 = vmatprep.subr.bf16.mxu1 %v7162_v5  ;;  %v290_v15 = vshrl.u32 %v246_v12, 16  ;;  %v293_v16 = vshll.u32 %v246_v12, 16  ;;  %v299_v17 = vshll.u32 %v7426_v13, 16  ;;  %v303_v18 = vshrl.u32 %v7426_v13, 16  ;;  %v7435_v20 = vld [vmem:[%s7416_s7 + $0xc] sm:$0xf] }
  0x17   : > { %v309_v19 = vshll.u32 %v7429_v14, 16  ;;  %v5787_v23 = vcombine.low %v246_v12, %v7426_v13  ;;  %v7439_v24 = vld [vmem:[%s7416_s7 + $0x10] sm:$0xf]  ;;  %v7442_v25 = vld [vmem:[%s7416_s7 + $0x14] sm:$0x1]  ;;  %v314_v29 = vshrl.u32 %v7435_v20, 16 }
  0x18   : > { %6662 = vmatpush3.bf16.msra.mxu0 %v7161_v4  ;;  %v292_v21 = vrot.slane %v290_v15, 4  ;;  %v295_v22 = vrot.slane %v293_v16, 5  ;;  %v301_v27 = vrot.slane %v299_v17, 5  ;;  %v305_v28 = vrot.slane %v303_v18, 4  ;;  %v7479_v56 = vld [vmem:[%s7416_s7 + $0x18] sm:$0xf] }
  0x19   : > { %6694 = vmatpush3.bf16.msra.mxu1 %v7162_v5  ;;  %6663 = vmatprep.subr.bf16.mxu0 %v7163_v6  ;;  %v317_v32 = vshll.u32 %v7435_v20, 16  ;;  %v323_v33 = vshll.u32 %v7439_v24, 16  ;;  %v327_v34 = vshrl.u32 %v7439_v24, 16  ;;  %v311_v38 = vrot.slane %v309_v19, 5  ;;  %v7482_v57 = vld [vmem:[%s7416_s7 + $0x1c] sm:$0xf] }
  0x1a   : > { %6695 = vmatprep.subr.bf16.mxu1 %v7164_v7  ;;  %v296_v31 = vor.u32 %v295_v22, %v292_v21  ;;  %6705 = vmatprep.mubr.bf16.mxu1 %v5787_v23  ;;  %v306_v37 = vor.u32 %v305_v28, %v301_v27  ;;  %v316_v39 = vrot.slane %v314_v29, 4  ;;  %v333_v40 = vshll.u32 %v7442_v25, 16  ;;  %v7488_v62 = vld [vmem:[%s7416_s7 + $0x20] sm:$0x1]  ;;  %v7496_v4 = vld [vmem:[%s7416_s7 + $0x24] sm:$0xf] }
  0x1b   : > { %v319_v42 = vrot.slane %v317_v32, 5  ;;  %v325_v43 = vrot.slane %v323_v33, 5  ;;  %v329_v44 = vrot.slane %v327_v34, 4  ;;  %v900_v46 = vrot.slane %v7429_v14, 5  ;;  %v7177_v12 = vld [vmem:[%s9248_s2 + $0xb0] sm:$0xff]  }
  0x1c   : > { %6664 = vmatpush3.bf16.msra.mxu0 %v7163_v6  ;;  %v297_v41 = vrot.slane %v296_v31, 4  ;;  %v307_v45 = vrot.slane %v306_v37, 4  ;;  %v335_v51 = vrot.slane %v333_v40, 5  ;;  %v907_v53 = vrot.slane %v7442_v25, 5  ;;  %v7178_v28 = vld [vmem:[%s9248_s2 + $0xf0] sm:$0xff]  }
  0x1d   : > { %6696 = vmatpush3.bf16.msra.mxu1 %v7164_v7  ;;  %6665 = vmatprep.subr.bf16.mxu0 %v7165_v8  ;;  %v320_v49 = vor.u32 %v319_v42, %v316_v39  ;;  %v330_v50 = vor.u32 %v329_v44, %v325_v43  ;;  %v5788_v54 = vcombine.low %v7435_v20, %v7439_v24  ;;  %v338_v63 = vshrl.u32 %v7479_v56, 16  ;;  %v7525_v40 = vld [vmem:[%s7416_s7 + $0x30] sm:$0xf]  ;;  %v7181_v44 = vld [vmem:[%s9248_s2 + $0xa8] sm:$0xff]  }
  0x1e   : > { %6697 = vmatprep.subr.bf16.mxu1 %v7166_v9  ;;  %v302_v48 = vsel %vm7459_vm2, %v297_v41, %v301_v27  ;;  %v312_v52 = vsel %vm7459_vm2, %v307_v45, %v311_v38  ;;  %v341_v0 = vshll.u32 %v7479_v56, 16  ;;  %v347_v1 = vshll.u32 %v7482_v57, 16  ;;  %v7535_v45 = vld [vmem:[%s7416_s7 + $0x34] sm:$0xf] }
  0x1f   : > { %v5771_v58 = vcombine.low %v302_v48, %v312_v52  ;;  %v321_v59 = vrot.slane %v320_v49, 4  ;;  %v331_v60 = vrot.slane %v330_v50, 4  ;;  %v351_v2 = vshrl.u32 %v7482_v57, 16 }
  0x20   : > { %6666 = vmatpush3.bf16.msra.mxu0 %v7165_v8  ;;  %v357_v3 = vshll.u32 %v7488_v62, 16  ;;  %v340_v7 = vrot.slane %v338_v63, 4  ;;  %v7503_v8 = vld [vmem:[%s7416_s7 + $0x28] sm:$0xf]  ;;  %v343_v15 = vrot.slane %v341_v0, 5  ;;  %v349_v16 = vrot.slane %v347_v1, 5 }
  0x21   : > { %6698 = vmatpush3.bf16.msra.mxu1 %v7166_v9  ;;  %6667 = vmatprep.subr.bf16.mxu0 %v7167_v10  ;;  %v326_v5 = vsel %vm7459_vm2, %v321_v59, %v325_v43  ;;  %v336_v6 = vsel %vm7459_vm2, %v331_v60, %v335_v51  ;;  %v7506_v9 = vld [vmem:[%s7416_s7 + $0x2c] sm:$0x1]  ;;  %v353_v17 = vrot.slane %v351_v2, 4  ;;  %v362_v19 = vshrl.u32 %v7496_v4, 16  ;;  %v7183_v0 = vld [vmem:[%s9248_s2 + $0xa0] sm:$0xff]  }
  0x22   : > { %6699 = vmatprep.subr.bf16.mxu1 %v7168_v11  ;;  %6673 = vmatprep.mubr.bf16.mxu0 %v5771_v58  ;;  %v359_v18 = vrot.slane %v357_v3, 5  ;;  %v365_v20 = vshll.u32 %v7496_v4, 16  ;;  %v371_v21 = vshll.u32 %v7503_v8, 16  ;;  %v344_v22 = vor.u32 %v343_v15, %v340_v7  ;;  %v7182_v51 = vld [vmem:[%s9248_s2 + $0xe8] sm:$0xff]  }
  0x23   : > { %v354_v23 = vor.u32 %v353_v17, %v349_v16  ;;  %v381_v27 = vshll.u32 %v7506_v9, 16  ;;  %v5789_v29 = vcombine.low %v7479_v56, %v7482_v57  ;;  %v5790_v39 = vcombine.low %v7496_v4, %v7503_v8  ;;  %v7562_v4 = vld [vmem:[%s7416_s7 + $0x44] sm:$0x1] }
  0x24   : > { %6668 = vmatpush3.bf16.msra.mxu0 %v7167_v10  ;;  %v897_v10 = vrot.slane %v7426_v13, 5  ;;  %v367_v31 = vrot.slane %v365_v20, 5  ;;  %v373_v32 = vrot.slane %v371_v21, 5  ;;  %v345_v33 = vrot.slane %v344_v22, 4 }
  0x25   : > { %6700 = vmatpush3.bf16.msra.mxu1 %v7168_v11  ;;  %6669 = vmatprep.subr.bf16.mxu0 %v7169_v26  ;;  %v5772_v11 = vcombine.low %v326_v5, %v336_v6  ;;  %v355_v34 = vrot.slane %v354_v23, 4  ;;  %v383_v37 = vrot.slane %v381_v27, 5  ;;  %v386_v48 = vshrl.u32 %v7525_v40, 16  ;;  %v7184_v6 = vld [vmem:[%s9248_s2 + $0xe0] sm:$0xff]  }
  0x26   : > { %6701 = vmatprep.subr.bf16.mxu1 %v7170_v30  ;;  %v350_v41 = vsel %vm7459_vm2, %v345_v33, %v349_v16  ;;  %v389_v52 = vshll.u32 %v7525_v40, 16  ;;  %v399_v59 = vshrl.u32 %v7535_v45, 16  ;;  %v5791_v3 = vcombine.low %v7525_v40, %v7535_v45 }
  0x27   : > { %v360_v42 = vsel %vm7459_vm2, %v355_v34, %v359_v18  ;;  %v388_v58 = vrot.slane %v386_v48, 4  ;;  %v429_v22 = vshll.u32 %v7562_v4, 16  ;;  %v925_v25 = vrot.slane %v7535_v45, 5 }
  0x28   : > { %6670 = vmatpush3.bf16.msra.mxu0 %v7169_v26  ;;  %v375_v26 = vshrl.u32 %v7503_v8, 16  ;;  %v5773_v49 = vcombine.low %v350_v41, %v360_v42  ;;  %v391_v1 = vrot.slane %v389_v52, 5  ;;  %v401_v7 = vrot.slane %v399_v59, 4  ;;  %v7591_v41 = vld [vmem:[%s7416_s7 + $0x50] sm:$0x1] }
  0x29   : > { %6702 = vmatpush3.bf16.msra.mxu1 %v7170_v30  ;;  %6671 = vmatprep.subr.bf16.mxu0 %v7171_v35  ;;  %v364_v30 = vrot.slane %v362_v19, 4 }
  0x2a   : > { %6703 = vmatprep.subr.bf16.mxu1 %v7172_v47  ;;  %v392_v16 = vor.u32 %v391_v1, %v388_v58 }
  0x2b   : > { %v368_v38 = vor.u32 %v367_v31, %v364_v30  ;;  %v431_v31 = vrot.slane %v429_v22, 5 }
  0x2c   : > { %6672 = vmatpush3.bf16.msra.mxu0 %v7171_v35  ;;  %v377_v35 = vrot.slane %v375_v26, 4  ;;  %v393_v23 = vrot.slane %v392_v16, 4 }
  0x2d   : > { %6704 = vmatpush3.bf16.msra.mxu1 %v7172_v47  ;;  %6721 = vmatprep.subr.bf16.mxu0 %v7175_v55  ;;  %v7538_v47 = vld [vmem:[%s7416_s7 + $0x38] sm:$0x1]  ;;  %v369_v50 = vrot.slane %v368_v38, 4  ;;  %v7586_v38 = vld [vmem:[%s7416_s7 + $0x4c] sm:$0xf] }
  0x2e   : > { %6753 = vmatprep.subr.bf16.mxu1 %v7176_v61  ;;  %v378_v43 = vor.u32 %v377_v35, %v373_v32  ;;  %v405_v60 = vshll.u32 %v7538_v47, 16  ;;  %v447_v52 = vshrl.u32 %v7586_v38, 16 }
  0x2f   : > { %6674 = vmatmul.mubr.bf16.vlgmr.msra.gmra.mxu0 %v5772_v11  ;;  %v374_v63 = vsel %vm7459_vm2, %v369_v50, %v373_v32  ;;  %v7188_v32 = vld [vmem:[%s9248_s2 + $0xd8] sm:$0xff]   ;;  %v7189_v50 = vld [vmem:[%s9248_s2 + $0x90] sm:$0xff]  }
  0x30   : > { %6706 = vmatmul.mubr.bf16.vlgmr.msra.gmra.mxu1 %v5788_v54  ;;  %6722 = vmatpush3.bf16.msra.mxu0 %v7175_v55  ;;  %v395_v54 = vshll.u32 %v7535_v45, 16  ;;  %v7547_v55 = vld [vmem:[%s7416_s7 + $0x3c] sm:$0xf]  ;;  %v379_v56 = vrot.slane %v378_v43, 4  ;;  %v407_v11 = vrot.slane %v405_v60, 5  ;;  %v453_v60 = vshll.u32 %v7591_v41, 16 }
  0x31   : > { %6754 = vmatpush3.bf16.msra.mxu1 %v7176_v61  ;;  %6723 = vmatprep.subr.bf16.mxu0 %v7177_v12  ;;  %v7552_v61 = vld [vmem:[%s7416_s7 + $0x40] sm:$0xf]  ;;  %v413_v17 = vshll.u32 %v7547_v55, 16 }
  0x32   : > { %6755 = vmatprep.subr.bf16.mxu1 %v7178_v28  ;;  %6709 = vmatprep.mubr.bf16.mxu1 %v5789_v29  ;;  %v397_v2 = vrot.slane %v395_v54, 5  ;;  %v384_v5 = vsel %vm7459_vm2, %v379_v56, %v383_v37  ;;  %v419_v18 = vshll.u32 %v7552_v61, 16  ;;  %v423_v21 = vshrl.u32 %v7552_v61, 16  ;;  %v258_v37 = vld [vmem:[%s7416_s7 + $0x48] sm:$0xf]  ;;  %v7190_v56 = vld [vmem:[%s9248_s2 + $0xd0] sm:$0xff]  }
  0x33   : > { %6677 = vmatprep.mubr.bf16.mxu0 %v5773_v49  ;;  %v5774_v15 = vcombine.low %v374_v63, %v384_v5  ;;  %v415_v26 = vrot.slane %v413_v17, 5  ;;  %v5792_v35 = vcombine.low %v7547_v55, %v7552_v61  ;;  %v434_v42 = vshrl.u32 %v258_v37, 16  ;;  %v7602_v54 = vld [vmem:[%s7416_s7 + $0x58] sm:$0xf]  ;;  %v7609_v63 = vld [vmem:[%s7416_s7 + $0x5c] sm:$0x1] }
  0x34   : > { %6724 = vmatpush3.bf16.msra.mxu0 %v7177_v12  ;;  %v410_v12 = vshrl.u32 %v7547_v55, 16  ;;  %v402_v19 = vor.u32 %v401_v7, %v397_v2  ;;  %v421_v27 = vrot.slane %v419_v18, 5  ;;  %v425_v30 = vrot.slane %v423_v21, 4  ;;  %v7193_v18 = vld [vmem:[%s9248_s2 + $0x88] sm:$0xff]  }
  0x35   : > { %6756 = vmatpush3.bf16.msra.mxu1 %v7178_v28  ;;  %6725 = vmatprep.subr.bf16.mxu0 %v7181_v44  ;;  %v7187_v28 = vld [vmem:[%s9248_s2 + $0x98] sm:$0xff]   ;;  %v398_v33 = vsel %vm7459_vm2, %v393_v23, %v397_v2  ;;  %v437_v43 = vshll.u32 %v258_v37, 16  ;;  %v436_v58 = vrot.slane %v434_v42, 4  ;;  %v455_v7 = vrot.slane %v453_v60, 5 }
  0x36   : > { %6757 = vmatprep.subr.bf16.mxu1 %v7182_v51  ;;  %v412_v20 = vrot.slane %v410_v12, 4  ;;  %v403_v29 = vrot.slane %v402_v19, 4  ;;  %v426_v40 = vor.u32 %v425_v30, %v421_v27  ;;  %v467_v17 = vshll.u32 %v7602_v54, 16 }
  0x37   : > { %6678 = vmatmul.mubr.bf16.gmra.mxu0 %v5774_v15  ;;  %v439_v59 = vrot.slane %v437_v43, 5  ;;  %v471_v21 = vshrl.u32 %v7602_v54, 16  ;;  %v477_v22 = vshll.u32 %v7609_v63, 16  ;;  %v932_v45 = vrot.slane %v7552_v61, 5 }
  0x38   : > { %6710 = vmatmul.mubr.bf16.gmra.mxu1 %v5790_v39  ;;  %6726 = vmatpush3.bf16.msra.mxu0 %v7181_v44  ;;  %v416_v34 = vor.u32 %v415_v26, %v412_v20  ;;  %v408_v39 = vsel %vm7459_vm2, %v403_v29, %v407_v11  ;;  %v7594_v44 = vld [vmem:[%s7416_s7 + $0x54] sm:$0xf]  ;;  %v427_v55 = vrot.slane %v426_v40, 4  ;;  %v7194_v29 = vld [vmem:[%s9248_s2 + $0xc8] sm:$0xff]   ;;  %v7195_v40 = vld [vmem:[%s9248_s2 + $0x80] sm:$0xff]  }
  0x39   : > { %6758 = vmatpush3.bf16.msra.mxu1 %v7182_v51  ;;  %6727 = vmatprep.subr.bf16.mxu0 %v7183_v0  ;;  %v5775_v48 = vcombine.low %v398_v33, %v408_v39  ;;  %v443_v51 = vshll.u32 %v7586_v38, 16  ;;  %v458_v11 = vshrl.u32 %v7594_v44, 16  ;;  %v461_v16 = vshll.u32 %v7594_v44, 16 }
  0x3a   : > { %6759 = vmatprep.subr.bf16.mxu1 %v7184_v6  ;;  %6713 = vmatprep.mubr.bf16.mxu1 %v5791_v3  ;;  %v417_v49 = vrot.slane %v416_v34, 4  ;;  %v449_v3 = vrot.slane %v447_v52, 4  ;;  %v432_v5 = vsel %vm7459_vm2, %v427_v55, %v431_v31  ;;  %v473_v30 = vrot.slane %v471_v21, 4  ;;  %v868_v31 = vld [vmem:[%s7416_s7] sm:$0xe]  ;;  %v7197_v52 = vld [vmem:[%s7416_s7 + $0xc] sm:$0xff]  }
  0x3b   : > { %6681 = vmatprep.mubr.bf16.mxu0 %v5775_v48  ;;  %v445_v2 = vrot.slane %v443_v51, 5  ;;  %v460_v20 = vrot.slane %v458_v11, 4  ;;  %v463_v26 = vrot.slane %v461_v16, 5  ;;  %v899_v33 = vrot.slane %v897_v10, 4  ;;  %v869_v55 = vld [vmem:[%s7416_s7 + $0xc] sm:$0xe] }
  0x3c   : > { %6728 = vmatpush3.bf16.msra.mxu0 %v7183_v0  ;;  %v422_v1 = vsel %vm7459_vm2, %v417_v49, %v421_v27  ;;  %v5793_v0 = vcombine.low %v258_v37, %v7586_v38  ;;  %v469_v27 = vrot.slane %v467_v17, 5  ;;  %v904_v34 = vrot.slane %v7439_v24, 5  ;;  %v7196_v24 = vld [vmem:[%s9248_s2 + $0xc0] sm:$0xff]  }
  0x3d   : > { %6760 = vmatpush3.bf16.msra.mxu1 %v7184_v6  ;;  %6729 = vmatprep.subr.bf16.mxu0 %v7187_v28  ;;  %v440_v6 = vor.u32 %v439_v59, %v436_v58  ;;  %v5776_v12 = vcombine.low %v422_v1, %v432_v5  ;;  %v450_v15 = vor.u32 %v449_v3, %v445_v2  ;;  %v5803_v42 = vrot.slane %v868_v31, 9  ;;  %v7200_v3 = vld [vmem:[%s9248_s2 + $0x178] sm:$0xff]   ;;  %v7208_v31 = vld [vmem:[%s9248_s2 + $0x160] sm:$0xff]  }
  0x3e   : > { %6761 = vmatprep.subr.bf16.mxu1 %v7188_v32  ;;  %v464_v37 = vor.u32 %v463_v26, %v460_v20  ;;  %v5794_v39 = vcombine.low %v7594_v44, %v7602_v54  ;;  %v474_v48 = vor.u32 %v473_v30, %v469_v27  ;;  %v479_v49 = vrot.slane %v477_v22, 5  ;;  %v872_v22 = vld [vmem:[%s7416_s7 + $0x30] sm:$0xe]  ;;  %v7205_v30 = vld [vmem:[%s9248_s2 + $0x128] sm:$0xff]  }
  0x3f   : > { %v441_v19 = vrot.slane %v440_v6, 4  ;;  %6682 = vmatmul.mubr.bf16.gmra.mxu0 %v5776_v12  ;;  %v451_v23 = vrot.slane %v450_v15, 4  ;;  %v906_v58 = vrot.slane %v904_v34, 4  ;;  %v5804_v13 = vrot.slane %v869_v55, 9  ;;  %v7198_v6 = vld [vmem:[%s7416_s7 + $0x18] sm:$0xff]   ;;  %v7203_v15 = vld [vmem:[%s7416_s7 + $0x24] sm:$0xff]  }
  0x40   : > { %6714 = vmatmul.mubr.bf16.gmra.mxu1 %v5792_v35  ;;  %6730 = vmatpush3.bf16.msra.mxu0 %v7187_v28  ;;  %v465_v51 = vrot.slane %v464_v37, 4  ;;  %v475_v44 = vrot.slane %v474_v48, 4  ;;  %v911_v1 = vrot.slane %v7482_v57, 5  ;;  %v914_v57 = vrot.slane %v7488_v62, 5  ;;  %v871_v62 = vld [vmem:[%s7416_s7 + $0x24] sm:$0xe] }
  0x41   : > { %6762 = vmatpush3.bf16.msra.mxu1 %v7188_v32  ;;  %6731 = vmatprep.subr.bf16.mxu0 %v7189_v50  ;;  %v446_v28 = vsel %vm7459_vm2, %v441_v19, %v445_v2  ;;  %v456_v35 = vsel %vm7459_vm2, %v451_v23, %v455_v7  ;;  %v870_v2 = vld [vmem:[%s7416_s7 + $0x18] sm:$0xe]  ;;  %v7202_v7 = vld [vmem:[%s9248_s2 + $0x170] sm:$0xff]   ;;  %v905_v11 = vsel %vm7632_vm5, %v5804_v13, %v904_v34  ;;  %v918_v16 = vrot.slane %v7503_v8, 5 }
  0x42   : > { %6763 = vmatprep.subr.bf16.mxu1 %v7190_v56  ;;  %6717 = vmatprep.mubr.bf16.mxu1 %v5793_v0  ;;  %v5777_v43 = vcombine.low %v446_v28, %v456_v35  ;;  %v470_v59 = vsel %vm7459_vm2, %v465_v51, %v469_v27  ;;  %v480_v60 = vsel %vm7459_vm2, %v475_v44, %v479_v49  ;;  %v5805_v0 = vrot.slane %v870_v2, 9  ;;  %v7204_v26 = vld [vmem:[%s7416_s7 + $0x30] sm:$0xff]   ;;  %v7206_v27 = vld [vmem:[%s9248_s2 + $0x168] sm:$0xff]  }
  0x43   : > { %v913_v5 = vrot.slane %v911_v1, 4  ;;  %v908_v12 = vsel %vm7632_vm5, %v906_v58, %v907_v53  ;;  %v7201_v53 = vld [vmem:[%s9248_s2 + $0x130] sm:$0xff]   ;;  %v921_v8 = vrot.slane %v7506_v9, 5  ;;  %v5806_v20 = vrot.slane %v871_v62, 9 }
  0x44   : > { %6732 = vmatpush3.bf16.msra.mxu0 %v7189_v50  ;;  %6685 = vmatprep.mubr.bf16.mxu0 %v5777_v43  ;;  %v898_v50 = vsel %vm7632_vm5, %v5803_v42, %v897_v10  ;;  %v5778_v10 = vcombine.low %v470_v59, %v480_v60  ;;  %v912_v17 = vsel %vm7632_vm5, %v5805_v0, %v911_v1  ;;  %v920_v21 = vrot.slane %v918_v16, 4  ;;  %v875_v44 = vld [vmem:[%s7416_s7 + $0x54] sm:$0xe]  ;;  %v7210_v60 = vld [vmem:[%s7416_s7 + $0x48] sm:$0xff]  }
  0x45   : > { %6764 = vmatpush3.bf16.msra.mxu1 %v7190_v56  ;;  %6733 = vmatprep.subr.bf16.mxu0 %v7193_v18  ;;  %v901_v56 = vsel %vm7632_vm5, %v899_v33, %v900_v46  ;;  %v7199_v46 = vld [vmem:[%s9248_s2 + $0x138] sm:$0xff]   ;;  %v5828_v19 = vcombine.low %v905_v11, %v908_v12  ;;  %v927_v28 = vrot.slane %v925_v25, 4  ;;  %v928_v9 = vrot.slane %v7538_v47, 5  ;;  %v5893_v0 = vld [vmem:[%s7416_s7 + $0xc] sm:$0xf] }
  0x46   : > { %6765 = vmatprep.subr.bf16.mxu1 %v7194_v29  ;;  %v5827_v14 = vcombine.low %v898_v50, %v901_v56  ;;  %v873_v33 = vld [vmem:[%s7416_s7 + $0x3c] sm:$0xe]  ;;  %v919_v61 = vsel %vm7632_vm5, %v5806_v20, %v918_v16  ;;  %v922_v34 = vsel %vm7632_vm5, %v920_v21, %v921_v8  ;;  %v939_v35 = vrot.slane %v7586_v38, 5  ;;  %v5895_v11 = vld [vmem:[%s7416_s7 + $0x14] sm:$0x1]  ;;  %v7218_v16 = vld [vmem:[%s9248_s2 + $0x148] sm:$0xff]  }
  0x47   : > { %6686 = vmatmul.mubr.bf16.gmra.mxu0 %v5778_v10  ;;  %v7209_v47 = vld [vmem:[%s7416_s7 + $0x3c] sm:$0xff]   ;;  %v934_v37 = vrot.slane %v932_v45, 4  ;;  %v929_v42 = vsel %vm7632_vm5, %v927_v28, %v928_v9  ;;  %v5808_v43 = vrot.slane %v873_v33, 9  ;;  %v942_v48 = vrot.slane %v7591_v41, 5  ;;  %v7217_v9 = vld [vmem:[%s9248_s2 + $0x108] sm:$0xff]  }
  0x48   : > { %6718 = vmatmul.mubr.bf16.gmra.mxu1 %v5794_v39  ;;  %6734 = vmatpush3.bf16.msra.mxu0 %v7193_v18  ;;  %v915_v18 = vsel %vm7632_vm5, %v913_v5, %v914_v57  ;;  %v935_v39 = vrot.slane %v7562_v4, 5  ;;  %v5830_v49 = vcombine.low %v919_v61, %v922_v34  ;;  %v941_v38 = vrot.slane %v939_v35, 4  ;;  %v7207_v4 = vld [vmem:[%s9248_s2 + $0x120] sm:$0xff]   ;;  %v7213_v5 = vld [vmem:[%s9248_s2 + $0x110] sm:$0xff]   ;;  %v5897_v28 = vld [vmem:[%s7416_s7 + $0x1c] sm:$0xf] }
  0x49   : > { %6766 = vmatpush3.bf16.msra.mxu1 %v7194_v29  ;;  %6735 = vmatprep.subr.bf16.mxu0 %v7195_v40  ;;  %v5829_v23 = vcombine.low %v912_v17, %v915_v18  ;;  %v5807_v29 = vrot.slane %v872_v22, 9  ;;  %v946_v51 = vrot.slane %v7602_v54, 5  ;;  %v949_v41 = vrot.slane %v7609_v63, 5  ;;  %v7212_v54 = vld [vmem:[%s9248_s2 + $0x158] sm:$0xff]   ;;  %v5898_v33 = vld [vmem:[%s7416_s7 + $0x20] sm:$0x1] }
  0x4a   : > { %6767 = vmatprep.subr.bf16.mxu1 %v7196_v24  ;;  %6769 = vmatprep.mubr.bf16.mxu1 %v7197_v52  ;;  %v5810_v56 = vrot.slane %v875_v44, 9  ;;  %v933_v58 = vsel %vm7632_vm5, %v5808_v43, %v932_v45  ;;  %v936_v59 = vsel %vm7632_vm5, %v934_v37, %v935_v39  ;;  %v943_v13 = vsel %vm7632_vm5, %v941_v38, %v942_v48  ;;  %v7211_v63 = vld [vmem:[%s9248_s2 + $0x118] sm:$0xff]  }
  0x4b   : > { %6737 = vmatprep.mubr.bf16.mxu0 %v5827_v14  ;;  %v948_v50 = vrot.slane %v946_v51, 4  ;;  %v5832_v2 = vcombine.low %v933_v58, %v936_v59  ;;  %v1432_v12 = vshrl.u32 %v5893_v0, 16  ;;  %v1451_v18 = vshll.u32 %v5895_v11, 16 }
  0x4c   : > { %6736 = vmatpush3.bf16.msra.mxu0 %v7195_v40  ;;  %v926_v40 = vsel %vm7632_vm5, %v5807_v29, %v925_v25  ;;  %v7744_v10 = vsel %vm7632_vm5, %v5810_v56, %v946_v51  ;;  %v5949_v25 = vld [vmem:[%s7416_s7 + $0xc] sm:$0xe]  ;;  %v1870_v22 = vrot.slane %v5895_v11, 5  ;;  %v1465_v39 = vshll.u32 %v5897_v28, 16  ;;  %v5901_v11 = vld [vmem:[%s7416_s7 + $0x2c] sm:$0x1] }
  0x4d   : > { %6768 = vmatpush3.bf16.msra.mxu1 %v7196_v24  ;;  %6785 = vmatprep.subr.bf16.mxu0 %v7199_v46  ;;  %v874_v24 = vld [vmem:[%s7416_s7 + $0x48] sm:$0xe]  ;;  %v5831_v55 = vcombine.low %v926_v40, %v929_v42  ;;  %v7748_v14 = vsel %vm7632_vm5, %v948_v50, %v949_v41  ;;  %v1434_v8 = vrot.slane %v1432_v12, 4  ;;  %v5957_v21 = vrot.slane %v5949_v25, 9  ;;  %v7220_v42 = vld [vmem:[%s9248_s2 + $0x140] sm:$0xff]  }
  0x4e   : > { %6817 = vmatprep.subr.bf16.mxu1 %v7200_v3  ;;  %v5809_v52 = vrot.slane %v874_v24, 9  ;;  %v1469_v40 = vshrl.u32 %v5897_v28, 16  ;;  %v1467_v51 = vrot.slane %v1465_v39, 5  ;;  %v1874_v41 = vrot.slane %v5897_v28, 5 }
  0x4f   : > { %6738 = vmatmul.mubr.bf16.vlgmr.msra.gmra.mxu0 %v5828_v19  ;;  %v1877_v59 = vrot.slane %v5898_v33, 5 }
  0x50   : > { %6770 = vmatmul.mubr.bf16.vlgmr.msra.gmra.mxu1 %v7198_v6  ;;  %6786 = vmatpush3.bf16.msra.mxu0 %v7199_v46  ;;  %v940_v1 = vsel %vm7632_vm5, %v5809_v52, %v939_v35  ;;  %v7214_v46 = vld [vmem:[%s9248_s2 + $0x150] sm:$0xff]   ;;  %v5834_v6 = vcombine.low %v7744_v10, %v7748_v14  ;;  %v1475_v52 = vshll.u32 %v5898_v33, 16  ;;  %v7221_v10 = vld [vmem:[%s9248_s2 + $0x1b8] sm:$0xff]  }
  0x51   : > { %6818 = vmatpush3.bf16.msra.mxu1 %v7200_v3  ;;  %6773 = vmatprep.mubr.bf16.mxu1 %v7203_v15  ;;  %v7215_v3 = vld [vmem:[%s7416_s7 + $0x54] sm:$0xff]   ;;  %v5833_v57 = vcombine.low %v940_v1, %v943_v13  ;;  %v1435_v15 = vshll.u32 %v5893_v0, 16  ;;  %v5899_v0 = vld [vmem:[%s7416_s7 + $0x24] sm:$0xf]  ;;  %v5952_v33 = vld [vmem:[%s7416_s7 + $0x30] sm:$0xe] }
  0x52   : > { %6819 = vmatprep.subr.bf16.mxu1 %v7202_v7  ;;  %6787 = vmatprep.subr.bf16.mxu0 %v7201_v53  ;;  %v1477_v58 = vrot.slane %v1475_v52, 5  ;;  %v1480_v12 = vshrl.u32 %v5899_v0, 16 }
  0x53   : > { %6741 = vmatprep.mubr.bf16.mxu0 %v5829_v23  ;;  %v1437_v20 = vrot.slane %v1435_v15, 5  ;;  %v5896_v23 = vld [vmem:[%s7416_s7 + $0x18] sm:$0xf]  ;;  %v1483_v15 = vshll.u32 %v5899_v0, 16 }
  0x54   : > { %6788 = vmatpush3.bf16.msra.mxu0 %v7201_v53  ;;  %v7216_v53 = vld [vmem:[%s7416_s7 + $0x60] sm:$0xff]   ;;  %v1456_v61 = vshrl.u32 %v5896_v23, 16  ;;  %v1459_v34 = vshll.u32 %v5896_v23, 16 }
  0x55   : > { %6820 = vmatpush3.bf16.msra.mxu1 %v7202_v7  ;;  %6789 = vmatprep.subr.bf16.mxu0 %v7205_v30  ;;  %v5894_v7 = vld [vmem:[%s7416_s7 + $0x10] sm:$0xf] }
  0x56   : > { %6821 = vmatprep.subr.bf16.mxu1 %v7206_v27  ;;  %v1441_v62 = vshll.u32 %v5894_v7, 16  ;;  %v1445_v17 = vshrl.u32 %v5894_v7, 16  ;;  %v1867_v19 = vrot.slane %v5894_v7, 5  ;;  %v1461_v24 = vrot.slane %v1459_v34, 5 }
  0x57   : > { %6742 = vmatmul.mubr.bf16.gmra.mxu0 %v5830_v49  ;;  %v1458_v49 = vrot.slane %v1456_v61, 4 }
  0x58   : > { %6774 = vmatmul.mubr.bf16.gmra.mxu1 %v7204_v26  ;;  %6790 = vmatpush3.bf16.msra.mxu0 %v7205_v30  ;;  %v1443_v26 = vrot.slane %v1441_v62, 5  ;;  %v1447_v45 = vrot.slane %v1445_v17, 4  ;;  %v1869_v29 = vrot.slane %v1867_v19, 4  ;;  %v1438_v30 = vor.u32 %v1437_v20, %v1434_v8 }
  0x59   : > { %6822 = vmatpush3.bf16.msra.mxu1 %v7206_v27  ;;  %6777 = vmatprep.mubr.bf16.mxu1 %v7209_v47  ;;  %v1453_v27 = vrot.slane %v1451_v18, 5  ;;  %v5950_v47 = vld [vmem:[%s7416_s7 + $0x18] sm:$0xe]  ;;  %v1462_v44 = vor.u32 %v1461_v24, %v1458_v49  ;;  %v5902_v18 = vld [vmem:[%s7416_s7 + $0x30] sm:$0xf]  ;;  %v1485_v8 = vrot.slane %v1483_v15, 5 }
  0x5a   : > { %6823 = vmatprep.subr.bf16.mxu1 %v7208_v31  ;;  %6791 = vmatprep.subr.bf16.mxu0 %v7207_v4  ;;  %v1448_v35 = vor.u32 %v1447_v45, %v1443_v26  ;;  %v1871_v37 = vsel %vm7632_vm5, %v1869_v29, %v1870_v22  ;;  %v1439_v43 = vrot.slane %v1438_v30, 4  ;;  %v5958_v50 = vrot.slane %v5950_v47, 9  ;;  %v7223_v29 = vld [vmem:[%s9248_s2 + $0x1b0] sm:$0xff]  }
  0x5b   : > { %6745 = vmatprep.mubr.bf16.mxu0 %v5831_v55  ;;  %v1499_v20 = vshll.u32 %v5901_v11, 16  ;;  %v1884_v30 = vrot.slane %v5901_v11, 5 }
  0x5c   : > { %6792 = vmatpush3.bf16.msra.mxu0 %v7207_v4  ;;  %v1449_v38 = vrot.slane %v1448_v35, 4  ;;  %v1471_v4 = vrot.slane %v1469_v40, 4  ;;  %v1444_v55 = vsel %vm7459_vm2, %v1439_v43, %v1443_v26  ;;  %v1875_v1 = vsel %vm7632_vm5, %v5958_v50, %v1874_v41 }
  0x5d   : > { %6824 = vmatpush3.bf16.msra.mxu1 %v7208_v31  ;;  %6793 = vmatprep.subr.bf16.mxu0 %v7211_v63  ;;  %v1868_v31 = vsel %vm7632_vm5, %v5957_v21, %v1867_v19  ;;  %v7224_v19 = vld [vmem:[%s9248_s2 + $0x1f0] sm:$0xff]   ;;  %v1507_v35 = vshll.u32 %v5902_v18, 16 }
  0x5e   : > { %6825 = vmatprep.subr.bf16.mxu1 %v7212_v54  ;;  %v5981_v48 = vcombine.low %v1868_v31, %v1871_v37  ;;  %v1472_v56 = vor.u32 %v1471_v4, %v1467_v51  ;;  %v5903_v21 = vld [vmem:[%s7416_s7 + $0x34] sm:$0xf]  ;;  %v1504_v31 = vshrl.u32 %v5902_v18, 16 }
  0x5f   : > { %6746 = vmatmul.mubr.bf16.gmra.mxu0 %v5832_v2  ;;  %v1513_v40 = vshll.u32 %v5903_v21, 16  ;;  %v1509_v49 = vrot.slane %v1507_v35, 5 }
  0x60   : > { %6778 = vmatmul.mubr.bf16.gmra.mxu1 %v7210_v60  ;;  %6794 = vmatpush3.bf16.msra.mxu0 %v7211_v63  ;;  %v7219_v60 = vld [vmem:[%s9248_s2 + $0x100] sm:$0xff]   ;;  %v1463_v63 = vrot.slane %v1462_v44, 4  ;;  %v1473_v2 = vrot.slane %v1472_v56, 4  ;;  %v1506_v39 = vrot.slane %v1504_v31, 4  ;;  %v5905_v56 = vld [vmem:[%s7416_s7 + $0x3c] sm:$0xf] }
  0x61   : > { %6826 = vmatpush3.bf16.msra.mxu1 %v7212_v54  ;;  %6781 = vmatprep.mubr.bf16.mxu1 %v7215_v3  ;;  %v1454_v54 = vsel %vm7459_vm2, %v1449_v38, %v1453_v27  ;;  %v7222_v3 = vld [vmem:[%s9248_s2 + $0x1f8] sm:$0xff]   ;;  %v7226_v38 = vld [vmem:[%s9248_s2 + $0x1e8] sm:$0xff]   ;;  %v1515_v52 = vrot.slane %v1513_v40, 5  ;;  %v1528_v0 = vshrl.u32 %v5905_v56, 16 }
  0x62   : > { %6827 = vmatprep.subr.bf16.mxu1 %v7214_v46  ;;  %6795 = vmatprep.subr.bf16.mxu0 %v7213_v5  ;;  %v5933_v13 = vcombine.low %v1444_v55, %v1454_v54  ;;  %v1478_v62 = vsel %vm7459_vm2, %v1473_v2, %v1477_v58  ;;  %v7815_v27 = vld [vmem:[%s7416_s7 + $0x38] sm:$0x1]  ;;  %v1510_v50 = vor.u32 %v1509_v49, %v1506_v39  ;;  %v5960_v54 = vrot.slane %v5952_v33, 9  ;;  %v5954_v31 = vld [vmem:[%s7416_s7 + $0x48] sm:$0xe] }
  0x63   : > { %6749 = vmatprep.mubr.bf16.mxu0 %v5833_v57  ;;  %v1468_v57 = vsel %vm7459_vm2, %v1463_v63, %v1467_v51  ;;  %v1523_v24 = vshll.u32 %v7815_v27, 16  ;;  %v7225_v63 = vld [vmem:[%s9248_s2 + $0x1a8] sm:$0xff]  }
  0x64   : > { %6796 = vmatpush3.bf16.msra.mxu0 %v7213_v5  ;;  %v5900_v5 = vld [vmem:[%s7416_s7 + $0x28] sm:$0xf]  ;;  %v5934_v25 = vcombine.low %v1468_v57, %v1478_v62  ;;  %v1511_v2 = vrot.slane %v1510_v50, 4 }
  0x65   : > { %6828 = vmatpush3.bf16.msra.mxu1 %v7214_v46  ;;  %6797 = vmatprep.subr.bf16.mxu0 %v7217_v9  ;;  %v1876_v46 = vrot.slane %v1874_v41, 4  ;;  %v1489_v14 = vshll.u32 %v5900_v5, 16  ;;  %v1881_v45 = vrot.slane %v5900_v5, 5  ;;  %v1525_v41 = vrot.slane %v1523_v24, 5 }
  0x66   : > { %6829 = vmatprep.subr.bf16.mxu1 %v7218_v16  ;;  %v1516_v62 = vsel %vm7459_vm2, %v1511_v2, %v1515_v52 }
  0x67   : > { %6750 = vmatmul.mubr.bf16.gmra.mxu0 %v5834_v6  ;;  %v1878_v7 = vsel %vm7632_vm5, %v1876_v46, %v1877_v59  ;;  %v1493_v6 = vshrl.u32 %v5900_v5, 16  ;;  %v1491_v22 = vrot.slane %v1489_v14, 5  ;;  %v1883_v47 = vrot.slane %v1881_v45, 4  ;;  %v5906_v46 = vld [vmem:[%s7416_s7 + $0x40] sm:$0xf] }
  0x68   : > { %6782 = vmatmul.mubr.bf16.gmra.mxu1 %v7216_v53  ;;  %6798 = vmatpush3.bf16.msra.mxu0 %v7217_v9  ;;  %v5982_v17 = vcombine.low %v1875_v1, %v1878_v7  ;;  %v1482_v53 = vrot.slane %v1480_v12, 4  ;;  %v1501_v9 = vrot.slane %v1499_v20, 5  ;;  %v7228_v1 = vld [vmem:[%s9248_s2 + $0x1e0] sm:$0xff]   ;;  %v1531_v5 = vshll.u32 %v5905_v56, 16  ;;  %v5909_v20 = vld [vmem:[%s7416_s7 + $0x4c] sm:$0xf] }
  0x69   : > { %6830 = vmatpush3.bf16.msra.mxu1 %v7218_v16  ;;  %6833 = vmatprep.mubr.bf16.mxu1 %v5981_v48  ;;  %v5951_v16 = vld [vmem:[%s7416_s7 + $0x24] sm:$0xe]  ;;  %v1495_v23 = vrot.slane %v1493_v6, 4  ;;  %v1885_v48 = vsel %vm7632_vm5, %v1883_v47, %v1884_v30  ;;  %v1537_v57 = vshll.u32 %v5906_v46, 16  ;;  %v1541_v15 = vshrl.u32 %v5906_v46, 16 }
  0x6a   : > { %6831 = vmatprep.subr.bf16.mxu1 %v7220_v42  ;;  %6799 = vmatprep.subr.bf16.mxu0 %v7219_v60  ;;  %v5959_v26 = vrot.slane %v5951_v16, 9  ;;  %v1486_v28 = vor.u32 %v1485_v8, %v1482_v53  ;;  %v5953_v16 = vld [vmem:[%s7416_s7 + $0x3c] sm:$0xe]  ;;  %v1533_v14 = vrot.slane %v1531_v5, 5  ;;  %v5908_v8 = vld [vmem:[%s7416_s7 + $0x48] sm:$0xf] }
  0x6b   : > { %6801 = vmatprep.mubr.bf16.mxu0 %v5933_v13  ;;  %v1496_v61 = vor.u32 %v1495_v23, %v1491_v22  ;;  %v1891_v13 = vrot.slane %v7815_v27, 5  ;;  %v1539_v6 = vrot.slane %v1537_v57, 5  ;;  %v7230_v27 = vld [vmem:[%s9248_s2 + $0x1d8] sm:$0xff]   ;;  %v1561_v47 = vshll.u32 %v5909_v20, 16  ;;  %v5911_v56 = vld [vmem:[%s7416_s7 + $0x54] sm:$0xf] }
  0x6c   : > { %6800 = vmatpush3.bf16.msra.mxu0 %v7219_v60  ;;  %v1882_v34 = vsel %vm7632_vm5, %v5959_v26, %v1881_v45  ;;  %v1487_v37 = vrot.slane %v1486_v28, 4  ;;  %v1888_v60 = vrot.slane %v5903_v21, 5  ;;  %v5961_v26 = vrot.slane %v5953_v16, 9  ;;  %v7858_v45 = vld [vmem:[%s7416_s7 + $0x50] sm:$0x1] }
  0x6d   : > { %6832 = vmatpush3.bf16.msra.mxu1 %v7220_v42  ;;  %6849 = vmatprep.subr.bf16.mxu0 %v7221_v10  ;;  %v1517_v42 = vshrl.u32 %v5903_v21, 16  ;;  %v1497_v43 = vrot.slane %v1496_v61, 4  ;;  %v5983_v4 = vcombine.low %v1882_v34, %v1885_v48  ;;  %v1552_v61 = vshrl.u32 %v5908_v8, 16  ;;  %v5955_v16 = vld [vmem:[%s7416_s7 + $0x54] sm:$0xe] }
  0x6e   : > { %6881 = vmatprep.subr.bf16.mxu1 %v7222_v3  ;;  %v1492_v51 = vsel %vm7459_vm2, %v1487_v37, %v1491_v22  ;;  %v1889_v11 = vsel %vm7632_vm5, %v5960_v54, %v1888_v60  ;;  %v1890_v12 = vrot.slane %v1888_v60, 4  ;;  %v1555_v34 = vshll.u32 %v5908_v8, 16  ;;  %v5914_v8 = vld [vmem:[%s7416_s7 + $0x60] sm:$0xf] }
  0x6f   : > { %6802 = vmatmul.mubr.bf16.vlgmr.msra.gmra.mxu0 %v5934_v25  ;;  %v1519_v55 = vrot.slane %v1517_v42, 4  ;;  %v1502_v44 = vsel %vm7459_vm2, %v1497_v43, %v1501_v9  ;;  %v1895_v9 = vrot.slane %v5906_v46, 5  ;;  %v1565_v40 = vshrl.u32 %v5909_v20, 16  ;;  %v7229_v42 = vld [vmem:[%s9248_s2 + $0x198] sm:$0xff]   ;;  %v7234_v46 = vld [vmem:[%s9248_s2 + $0x1c8] sm:$0xff]  }
  0x70   : > { %6834 = vmatmul.mubr.bf16.vlgmr.msra.gmra.mxu1 %v5982_v17  ;;  %6850 = vmatpush3.bf16.msra.mxu0 %v7221_v10  ;;  %v5935_v58 = vcombine.low %v1492_v51, %v1502_v44  ;;  %v7227_v17 = vld [vmem:[%s9248_s2 + $0x1a0] sm:$0xff]   ;;  %v1530_v10 = vrot.slane %v1528_v0, 4  ;;  %v1892_v25 = vsel %vm7632_vm5, %v1890_v12, %v1891_v13  ;;  %v1554_v48 = vrot.slane %v1552_v61, 4 }
  0x71   : > { %6882 = vmatpush3.bf16.msra.mxu1 %v7222_v3  ;;  %6851 = vmatprep.subr.bf16.mxu0 %v7223_v29  ;;  %v1520_v59 = vor.u32 %v1519_v55, %v1515_v52  ;;  %v5907_v3 = vld [vmem:[%s7416_s7 + $0x44] sm:$0x1]  ;;  %v5984_v22 = vcombine.low %v1889_v11, %v1892_v25  ;;  %v1896_v37 = vsel %vm7632_vm5, %v5961_v26, %v1895_v9  ;;  %v1897_v39 = vrot.slane %v1895_v9, 4 }
  0x72   : > { %6883 = vmatprep.subr.bf16.mxu1 %v7224_v19  ;;  %6837 = vmatprep.mubr.bf16.mxu1 %v5983_v4  ;;  %v1547_v53 = vshll.u32 %v5907_v3, 16  ;;  %v1534_v23 = vor.u32 %v1533_v14, %v1530_v10  ;;  %v1898_v30 = vrot.slane %v5907_v3, 5  ;;  %v1557_v49 = vrot.slane %v1555_v34, 5  ;;  %v5913_v3 = vld [vmem:[%s7416_s7 + $0x5c] sm:$0x1] }
  0x73   : > { %6805 = vmatprep.mubr.bf16.mxu0 %v5935_v58  ;;  %v1521_v7 = vrot.slane %v1520_v59, 4  ;;  %v1563_v24 = vrot.slane %v1561_v47, 5  ;;  %v1567_v52 = vrot.slane %v1565_v40, 4  ;;  %v1571_v55 = vshll.u32 %v7858_v45, 16  ;;  %v5912_v58 = vld [vmem:[%s7416_s7 + $0x58] sm:$0xf] }
  0x74   : > { %6852 = vmatpush3.bf16.msra.mxu0 %v7223_v29  ;;  %v1549_v28 = vrot.slane %v1547_v53, 5  ;;  %v1535_v33 = vrot.slane %v1534_v23, 4  ;;  %v1899_v4 = vsel %vm7632_vm5, %v1897_v39, %v1898_v30  ;;  %v5962_v54 = vrot.slane %v5954_v31, 9  ;;  %v5956_v31 = vld [vmem:[%s7416_s7 + $0x60] sm:$0xe] }
  0x75   : > { %6884 = vmatpush3.bf16.msra.mxu1 %v7224_v19  ;;  %v1526_v18 = vsel %vm7459_vm2, %v1521_v7, %v1525_v41  ;;  %6853 = vmatprep.subr.bf16.mxu0 %v7225_v63  ;;  %v1543_v19 = vrot.slane %v1541_v15, 4  ;;  %v5985_v50 = vcombine.low %v1896_v37, %v1899_v4  ;;  %v1558_v41 = vor.u32 %v1557_v49, %v1554_v48 }
  0x76   : > { %6885 = vmatprep.subr.bf16.mxu1 %v7226_v38  ;;  %v5936_v21 = vcombine.low %v1516_v62, %v1526_v18  ;;  %v1540_v43 = vsel %vm7459_vm2, %v1535_v33, %v1539_v6  ;;  %v1568_v59 = vor.u32 %v1567_v52, %v1563_v24  ;;  %v1573_v60 = vrot.slane %v1571_v55, 5 }
  0x77   : > { %v1544_v29 = vor.u32 %v1543_v19, %v1539_v6  ;;  %v1902_v13 = vrot.slane %v5909_v20, 5  ;;  %v1559_v2 = vrot.slane %v1558_v41, 4  ;;  %v1576_v0 = vshrl.u32 %v5911_v56, 16  ;;  %v7233_v6 = vld [vmem:[%s9248_s2 + $0x188] sm:$0xff]   ;;  %v5915_v20 = vld [vmem:[%s7416_s7 + $0x64] sm:$0xf] }
  0x78   : > { %6806 = vmatmul.mubr.bf16.gmra.mxu0 %v5936_v21  ;;  %6838 = vmatmul.mubr.bf16.gmra.mxu1 %v5984_v22  ;;  %v1579_v5 = vshll.u32 %v5911_v56, 16  ;;  %v1585_v57 = vshll.u32 %v5912_v58, 16  ;;  %v1569_v7 = vrot.slane %v1568_v59, 4  ;;  %v1589_v15 = vshrl.u32 %v5912_v58, 16 }
  0x79   : > { %6886 = vmatpush3.bf16.msra.mxu1 %v7226_v38  ;;  %6854 = vmatpush3.bf16.msra.mxu0 %v7225_v63  ;;  %v1545_v35 = vrot.slane %v1544_v29, 4  ;;  %v7232_v38 = vld [vmem:[%s9248_s2 + $0x1d0] sm:$0xff]   ;;  %v1905_v63 = vrot.slane %v7858_v45, 5  ;;  %v1903_v11 = vsel %vm7632_vm5, %v5962_v54, %v1902_v13  ;;  %v1904_v12 = vrot.slane %v1902_v13, 4  ;;  %v7904_v45 = vld [vmem:[%s7416_s7 + $0x68] sm:$0x1] }
  0x7a   : > { %6887 = vmatprep.subr.bf16.mxu1 %v7228_v1  ;;  %6855 = vmatprep.subr.bf16.mxu0 %v7227_v17  ;;  %v1564_v62 = vsel %vm7459_vm2, %v1559_v2, %v1563_v24  ;;  %v1581_v10 = vrot.slane %v1579_v5, 5  ;;  %v1587_v14 = vrot.slane %v1585_v57, 5  ;;  %v1574_v18 = vsel %vm7459_vm2, %v1569_v7, %v1573_v60  ;;  %v7235_v24 = vld [vmem:[%s9248_s2 + $0x180] sm:$0xff]   ;;  %v6047_v60 = vld [vmem:[%s7416_s7 + $0x18] sm:$0xf] }
  0x7b   : > { %v1550_v51 = vsel %vm7459_vm2, %v1545_v35, %v1549_v28  ;;  %6841 = vmatprep.mubr.bf16.mxu1 %v5985_v50  ;;  %v1906_v25 = vsel %vm7632_vm5, %v1904_v12, %v1905_v63  ;;  %v1591_v19 = vrot.slane %v1589_v15, 4  ;;  %v1595_v53 = vshll.u32 %v5913_v3, 16  ;;  %v7927_v13 = vld [vmem:[%s9248_s2 + $0x238] sm:$0xff]  }
  0x7c   : > { %v5937_v44 = vcombine.low %v1540_v43, %v1550_v51  ;;  %v5938_v21 = vcombine.low %v1564_v62, %v1574_v18  ;;  %v5986_v22 = vcombine.low %v1903_v11, %v1906_v25  ;;  %v5963_v26 = vrot.slane %v5955_v16, 9  ;;  %v7237_v11 = vld [vmem:[%s7416_s7 + $0x18] sm:$0xff]   ;;  %v7949_v18 = vld [vmem:[%s7416_s7 + $0x28] sm:$0xf] }
  0x7d   : > { %6888 = vmatpush3.bf16.msra.mxu1 %v7228_v1  ;;  %6856 = vmatpush3.bf16.msra.mxu0 %v7227_v17  ;;  %v7231_v1 = vld [vmem:[%s9248_s2 + $0x190] sm:$0xff]   ;;  %v1578_v17 = vrot.slane %v1576_v0, 4  ;;  %v1592_v29 = vor.u32 %v1591_v19, %v1587_v14  ;;  %v1597_v28 = vrot.slane %v1595_v53, 5  ;;  %v1909_v9 = vrot.slane %v5912_v58, 5 }
  0x7e   : > { %6889 = vmatprep.subr.bf16.mxu1 %v7230_v27  ;;  %6809 = vmatprep.mubr.bf16.mxu0 %v5937_v44  ;;  %v1912_v30 = vrot.slane %v5913_v3, 5  ;;  %v1600_v61 = vshrl.u32 %v5914_v8, 16  ;;  %v1603_v34 = vshll.u32 %v5914_v8, 16  ;;  %v1609_v47 = vshll.u32 %v5915_v20, 16 }
  0x7f   : > { %6857 = vmatprep.subr.bf16.mxu0 %v7229_v42  ;;  %v1582_v23 = vor.u32 %v1581_v10, %v1578_v17  ;;  %v1593_v35 = vrot.slane %v1592_v29, 4  ;;  %v1910_v37 = vsel %vm7632_vm5, %v5963_v26, %v1909_v9  ;;  %v1911_v39 = vrot.slane %v1909_v9, 4  ;;  %v3119_v9 = vld [vmem:[%s9249_s3] sm:$0xf] }
  0x80   : > { %6810 = vmatmul.mubr.bf16.gmra.mxu0 %v5938_v21  ;;  %6842 = vmatmul.mubr.bf16.gmra.mxu1 %v5986_v22  ;;  %v1613_v40 = vshrl.u32 %v5915_v20, 16  ;;  %v1602_v43 = vrot.slane %v1600_v61, 4  ;;  %v1605_v48 = vrot.slane %v1603_v34, 5  ;;  %v1611_v49 = vrot.slane %v1609_v47, 5  ;;  %v7238_v47 = vld [vmem:[%s7416_s7 + $0x24] sm:$0xff]  }
  0x81   : > { %6890 = vmatpush3.bf16.msra.mxu1 %v7230_v27  ;;  %6858 = vmatpush3.bf16.msra.mxu0 %v7229_v42  ;;  %v7236_v27 = vld [vmem:[%s9248_s2 + $0x1c0] sm:$0xff]   ;;  %v1583_v33 = vrot.slane %v1582_v23, 4  ;;  %v1913_v51 = vsel %vm7632_vm5, %v1911_v39, %v1912_v30  ;;  %v1619_v52 = vshll.u32 %v7904_v45, 16  ;;  %v5964_v41 = vrot.slane %v5956_v31, 9 }
  0x82   : > { %6891 = vmatprep.subr.bf16.mxu1 %v7232_v38  ;;  %6859 = vmatprep.subr.bf16.mxu0 %v7231_v1  ;;  %v1615_v4 = vrot.slane %v1613_v40, 4  ;;  %v5987_v44 = vcombine.low %v1910_v37, %v1913_v51  ;;  %v1606_v50 = vor.u32 %v1605_v48, %v1602_v43  ;;  %v1916_v58 = vrot.slane %v5915_v20, 5  ;;  %v7952_v20 = vld [vmem:[%s7416_s7 + $0x2c] sm:$0x1]  ;;  %v6053_v43 = vld [vmem:[%s7416_s7 + $0x30] sm:$0xf] }
  0x83   : > { %v1588_v42 = vsel %vm7459_vm2, %v1583_v33, %v1587_v14  ;;  %v1621_v56 = vrot.slane %v1619_v52, 5  ;;  %v1919_v59 = vrot.slane %v7904_v45, 5  ;;  %v2402_v2 = vshrl.u32 %v6047_v60, 16  ;;  %v7976_v51 = vld [vmem:[%s7416_s7 + $0x38] sm:$0x1] }
  0x84   : > { %v1616_v54 = vor.u32 %v1615_v4, %v1611_v49  ;;  %6845 = vmatprep.mubr.bf16.mxu1 %v5987_v44  ;;  %v1607_v63 = vrot.slane %v1606_v50, 4  ;;  %v1917_v0 = vsel %vm7632_vm5, %v5964_v41, %v1916_v58  ;;  %v1918_v5 = vrot.slane %v1916_v58, 4  ;;  %v7241_v50 = vld [vmem:[%s7416_s7 + $0x30] sm:$0xff]  }
  0x85   : > { %6892 = vmatpush3.bf16.msra.mxu1 %v7232_v38  ;;  %6860 = vmatpush3.bf16.msra.mxu0 %v7231_v1  ;;  %v1598_v38 = vsel %vm7459_vm2, %v1593_v35, %v1597_v28  ;;  %v7930_v1 = vld [vmem:[%s7416_s7 + $0x1c] sm:$0xf]  ;;  %v2405_v57 = vshll.u32 %v6047_v60, 16  ;;  %v2404_v12 = vrot.slane %v2402_v2, 4  ;;  %v2439_v29 = vshrl.u32 %v7949_v18, 16 }
  0x86   : > { %6893 = vmatprep.subr.bf16.mxu1 %v7234_v46  ;;  %6861 = vmatprep.subr.bf16.mxu0 %v7233_v6  ;;  %v5939_v55 = vcombine.low %v1588_v42, %v1598_v38  ;;  %v1617_v3 = vrot.slane %v1616_v54, 4  ;;  %v1612_v7 = vsel %vm7459_vm2, %v1607_v63, %v1611_v49  ;;  %v2411_v15 = vshll.u32 %v7930_v1, 16  ;;  %v7973_v38 = vld [vmem:[%s7416_s7 + $0x34] sm:$0xf] }
  0x87   : > { %v2415_v16 = vshrl.u32 %v7930_v1, 16  ;;  %v1920_v17 = vsel %vm7632_vm5, %v1918_v5, %v1919_v59  ;;  %v2407_v10 = vrot.slane %v2405_v57, 5  ;;  %v2445_v28 = vshll.u32 %v7952_v20, 16  ;;  %v7986_v5 = vld [vmem:[%s7416_s7 + $0x40] sm:$0xf] }
  0x88   : > { %6813 = vmatprep.mubr.bf16.mxu0 %v5939_v55  ;;  %v1622_v62 = vsel %vm7459_vm2, %v1617_v3, %v1621_v56  ;;  %v5988_v19 = vcombine.low %v1917_v0, %v1920_v17  ;;  %v2413_v53 = vrot.slane %v2411_v15, 5  ;;  %v3187_v61 = vsel %vm3185_vm6, %v3119_v9, 0  ;;  %v6056_v0 = vld [vmem:[%s7416_s7 + $0x3c] sm:$0xf] }
  0x89   : > { %6894 = vmatpush3.bf16.msra.mxu1 %v7234_v46  ;;  %6862 = vmatpush3.bf16.msra.mxu0 %v7233_v6  ;;  %v7933_v46 = vld [vmem:[%s7416_s7 + $0x20] sm:$0x1]  ;;  %v6050_v6 = vld [vmem:[%s7416_s7 + $0x24] sm:$0xf]  ;;  %v5940_v25 = vcombine.low %v1612_v7, %v1622_v62  ;;  %v2417_v8 = vrot.slane %v2415_v16, 4  ;;  %v2408_v21 = vor.u32 %v2407_v10, %v2404_v12  ;;  %v2441_v37 = vrot.slane %v2439_v29, 4 }
  0x8a   : > { %6895 = vmatprep.subr.bf16.mxu1 %v7236_v27  ;;  %6863 = vmatprep.subr.bf16.mxu0 %v7235_v24  ;;  %v2421_v14 = vshll.u32 %v7933_v46, 16  ;;  %v2426_v23 = vshrl.u32 %v6050_v6, 16  ;;  %v2429_v26 = vshll.u32 %v6050_v6, 16  ;;  %v2447_v39 = vrot.slane %v2445_v28, 5  ;;  %v7991_v12 = vld [vmem:[%s7416_s7 + $0x44] sm:$0x1] }
  0x8b   : > { %6814 = vmatmul.mubr.bf16.gmra.mxu0 %v5940_v25  ;;  %6846 = vmatmul.mubr.bf16.gmra.mxu1 %v5988_v19  ;;  %v2418_v45 = vor.u32 %v2417_v8, %v2413_v53  ;;  %v2409_v30 = vrot.slane %v2408_v21, 4  ;;  %v2450_v4 = vshrl.u32 %v6053_v43, 16  ;;  %v2453_v52 = vshll.u32 %v6053_v43, 16  ;;  %v7243_v16 = vld [vmem:[%s9248_s2 + $0x228] sm:$0xff]   ;;  %v7242_v25 = vld [vmem:[%s7416_s7 + $0x3c] sm:$0xff]  }
  0x8c   : > { %v2423_v22 = vrot.slane %v2421_v14, 5  ;;  %6865 = vmatprep.mubr.bf16.mxu0 %v7237_v11  ;;  %v2428_v31 = vrot.slane %v2426_v23, 4  ;;  %v2431_v33 = vrot.slane %v2429_v26, 5  ;;  %v2459_v41 = vshll.u32 %v7973_v38, 16  ;;  %v7245_v23 = vld [vmem:[%s7416_s7 + $0x48] sm:$0xff]   ;;  %v7244_v29 = vld [vmem:[%s9248_s2 + $0x220] sm:$0xff]  }
  0x8d   : > { %6896 = vmatpush3.bf16.msra.mxu1 %v7236_v27  ;;  %6864 = vmatpush3.bf16.msra.mxu0 %v7235_v24  ;;  %v2435_v27 = vshll.u32 %v7949_v18, 16  ;;  %v2419_v34 = vrot.slane %v2418_v45, 4  ;;  %v2414_v40 = vsel %vm7459_vm2, %v2409_v30, %v2413_v53  ;;  %v7240_v24 = vld [vmem:[%s9248_s2 + $0x230] sm:$0xff]   ;;  %v2463_v54 = vshrl.u32 %v7973_v38, 16  ;;  %v6059_v28 = vld [vmem:[%s7416_s7 + $0x48] sm:$0xf] }
  0x8e   : > { %6913 = vmatprep.subr.bf16.mxu0 %v7927_v13  ;;  %7107 = vmatprep.subr.msk.bf16.mxu1 %vm3185_vm6, %v3119_v9  ;;  %v2432_v42 = vor.u32 %v2431_v33, %v2428_v31  ;;  %v2452_v58 = vrot.slane %v2450_v4, 4  ;;  %v2455_v59 = vrot.slane %v2453_v52, 5  ;;  %v2469_v60 = vshll.u32 %v7976_v51, 16  ;;  %v8011_v31 = vld [vmem:[%s7416_s7 + $0x4c] sm:$0xf] }
  0x8f   : > { %v2437_v35 = vrot.slane %v2435_v27, 5  ;;  %v2424_v48 = vsel %vm7459_vm2, %v2419_v34, %v2423_v22  ;;  %v2461_v2 = vrot.slane %v2459_v41, 5  ;;  %v2465_v3 = vrot.slane %v2463_v54, 4  ;;  %v8014_v33 = vld [vmem:[%s7416_s7 + $0x50] sm:$0x1] }
  0x90   : > { %v6087_v55 = vcombine.low %v2414_v40, %v2424_v48  ;;  %v2433_v44 = vrot.slane %v2432_v42, 4  ;;  %v2456_v7 = vor.u32 %v2455_v59, %v2452_v58  ;;  %v2471_v11 = vrot.slane %v2469_v60, 5  ;;  %v8029_v58 = vld [vmem:[%s7416_s7 + $0x5c] sm:$0x1] }
  0x91   : > { %v2442_v49 = vor.u32 %v2441_v37, %v2437_v35  ;;  %v2474_v15 = vshrl.u32 %v6056_v0, 16  ;;  %v2466_v17 = vor.u32 %v2465_v3, %v2461_v2  ;;  %v2477_v10 = vshll.u32 %v6056_v0, 16 }
  0x92   : > { %6897 = vmatprep.mubr.bf16.mxu1 %v6087_v55  ;;  %v2438_v63 = vsel %vm7459_vm2, %v2433_v44, %v2437_v35  ;;  %v2483_v14 = vshll.u32 %v7986_v5, 16  ;;  %v2457_v6 = vrot.slane %v2456_v7, 4  ;;  %v2487_v53 = vshrl.u32 %v7986_v5, 16  ;;  %v8021_v55 = vld [vmem:[%s7416_s7 + $0x58] sm:$0xf] }
  0x93   : > { %v2443_v56 = vrot.slane %v2442_v49, 4  ;;  %6866 = vmatmul.mubr.bf16.vlgmr.msra.gmra.mxu0 %v7238_v47  ;;  %v2476_v19 = vrot.slane %v2474_v15, 4  ;;  %v2493_v8 = vshll.u32 %v7991_v12, 16  ;;  %v2467_v21 = vrot.slane %v2466_v17, 4  ;;  %v6062_v49 = vld [vmem:[%s7416_s7 + $0x54] sm:$0xf] }
  0x94   : > { %6914 = vmatpush3.bf16.msra.mxu0 %v7927_v13  ;;  %6869 = vmatprep.mubr.bf16.mxu0 %v7241_v50  ;;  %v2479_v22 = vrot.slane %v2477_v10, 5  ;;  %v2485_v13 = vrot.slane %v2483_v14, 5  ;;  %v2462_v26 = vsel %vm7459_vm2, %v2457_v6, %v2461_v2  ;;  %v2489_v45 = vrot.slane %v2487_v53, 4  ;;  %v7247_v50 = vld [vmem:[%s9248_s2 + $0x218] sm:$0xff]   ;;  %v7248_v10 = vld [vmem:[%s9248_s2 + $0x210] sm:$0xff]   ;;  %v7249_v14 = vld [vmem:[%s7416_s7 + $0x60] sm:$0xff]  }
  0x95   : > { %v2448_v57 = vsel %vm7459_vm2, %v2443_v56, %v2447_v39  ;;  %6915 = vmatprep.subr.bf16.mxu0 %v7240_v24  ;;  %v2495_v27 = vrot.slane %v2493_v8, 5  ;;  %v2472_v9 = vsel %vm7459_vm2, %v2467_v21, %v2471_v11  ;;  %v2501_v34 = vshll.u32 %v6059_v28, 16  ;;  %v7246_v7 = vld [vmem:[%s7416_s7 + $0x54] sm:$0xff]   ;;  %v6065_v8 = vld [vmem:[%s7416_s7 + $0x60] sm:$0xf] }
  0x96   : > { %v6088_v62 = vcombine.low %v2438_v63, %v2448_v57  ;;  %v2480_v30 = vor.u32 %v2479_v22, %v2476_v19  ;;  %v6089_v47 = vcombine.low %v2462_v26, %v2472_v9  ;;  %v2490_v35 = vor.u32 %v2489_v45, %v2485_v13  ;;  %v8052_v26 = vld [vmem:[%s7416_s7 + $0x68] sm:$0x1] }
  0x97   : > { %v2507_v37 = vshll.u32 %v8011_v31, 16  ;;  %v2511_v39 = vshrl.u32 %v8011_v31, 16  ;;  %v2503_v43 = vrot.slane %v2501_v34, 5  ;;  %v2517_v48 = vshll.u32 %v8014_v33, 16 }
  0x98   : > { %6898 = vmatmul.mubr.bf16.vlgmr.msra.gmra.mxu1 %v6088_v62  ;;  %6916 = vmatpush3.bf16.msra.mxu0 %v7240_v24  ;;  %v2481_v40 = vrot.slane %v2480_v30, 4  ;;  %v2491_v24 = vrot.slane %v2490_v35, 4  ;;  %v2522_v44 = vshrl.u32 %v6062_v49, 16  ;;  %v2525_v59 = vshll.u32 %v6062_v49, 16  ;;  %v6068_v35 = vld [vmem:[%s7416_s7 + $0x6c] sm:$0xf] }
  0x99   : > { %6946 = vmatpush3.bf16.msra.mxu1 %v3187_v61  ;;  %v2498_v61 = vshrl.u32 %v6059_v28, 16  ;;  %6917 = vmatprep.subr.bf16.mxu0 %v7243_v16  ;;  %v2509_v4 = vrot.slane %v2507_v37, 5  ;;  %v2513_v52 = vrot.slane %v2511_v39, 4  ;;  %v2519_v56 = vrot.slane %v2517_v48, 5  ;;  %v7251_v37 = vld [vmem:[%s9248_s2 + $0x208] sm:$0xff]  }
  0x9a   : > { %6901 = vmatprep.mubr.bf16.mxu1 %v6089_v47  ;;  %v2486_v41 = vsel %vm7459_vm2, %v2481_v40, %v2485_v13  ;;  %v2496_v60 = vsel %vm7459_vm2, %v2491_v24, %v2495_v27  ;;  %v2524_v2 = vrot.slane %v2522_v44, 4  ;;  %v2531_v3 = vshll.u32 %v8021_v55, 16  ;;  %v8067_v48 = vld [vmem:[%s7416_s7 + $0x74] sm:$0x1] }
  0x9b   : > { %v2500_v42 = vrot.slane %v2498_v61, 4  ;;  %6870 = vmatmul.mubr.bf16.gmra.mxu0 %v7242_v25  ;;  %v2514_v63 = vor.u32 %v2513_v52, %v2509_v4  ;;  %v6090_v0 = vcombine.low %v2486_v41, %v2496_v60  ;;  %v2527_v11 = vrot.slane %v2525_v59, 5  ;;  %v7250_v52 = vld [vmem:[%s7416_s7 + $0x6c] sm:$0xff]  }
  0x9c   : > { %6918 = vmatpush3.bf16.msra.mxu0 %v7243_v16  ;;  %6873 = vmatprep.mubr.bf16.mxu0 %v7245_v23  ;;  %v2535_v15 = vshrl.u32 %v8021_v55, 16  ;;  %v2533_v62 = vrot.slane %v2531_v3, 5  ;;  %v2541_v17 = vshll.u32 %v8029_v58, 16  ;;  %v2837_v6 = vrot.slane %v7930_v1, 5  ;;  %v8049_v23 = vld [vmem:[%s7416_s7 + $0x64] sm:$0xf] }
  0x9d   : > { %v2504_v54 = vor.u32 %v2503_v43, %v2500_v42  ;;  %6919 = vmatprep.subr.bf16.mxu0 %v7244_v29  ;;  %v2515_v16 = vrot.slane %v2514_v63, 4  ;;  %v2528_v19 = vor.u32 %v2527_v11, %v2524_v2  ;;  %v2840_v21 = vrot.slane %v7933_v46, 5  ;;  %v8064_v43 = vld [vmem:[%s7416_s7 + $0x70] sm:$0xf]  ;;  %v7252_v3 = vld [vmem:[%s9248_s2 + $0x200] sm:$0xff]  }
  0x9e   : > { %v2537_v53 = vrot.slane %v2535_v15, 4  ;;  %v2543_v13 = vrot.slane %v2541_v17, 5  ;;  %v2546_v45 = vshrl.u32 %v6065_v8, 16  ;;  %v2549_v9 = vshll.u32 %v6065_v8, 16  ;;  %v6193_v1 = vld [vmem:[%s9249_s3 + $0x8] sm:$0xf] }
  0x9f   : > { %v2505_v57 = vrot.slane %v2504_v54, 4  ;;  %v2520_v22 = vsel %vm7459_vm2, %v2515_v16, %v2519_v56  ;;  %v2555_v61 = vshll.u32 %v8049_v23, 16  ;;  %v2559_v34 = vshrl.u32 %v8049_v23, 16  ;;  %7109 = vmatprep.subr.msk.bf16.mxu1 %vm3185_vm6, %v6193_v1 }
  0xa0   : > { %6902 = vmatmul.mubr.bf16.gmra.mxu1 %v6090_v0  ;;  %6920 = vmatpush3.bf16.msra.mxu0 %v7244_v29  ;;  %v2529_v29 = vrot.slane %v2528_v19, 4  ;;  %v2538_v28 = vor.u32 %v2537_v53, %v2533_v62  ;;  %v2548_v30 = vrot.slane %v2546_v45, 4  ;;  %v2565_v47 = vshll.u32 %v8052_v26, 16  ;;  %v6103_v0 = vld [vmem:[%s7416_s7 + $0x18] sm:$0xe] }
  0xa1   : > { %v2510_v25 = vsel %vm7459_vm2, %v2505_v57, %v2509_v4  ;;  %6921 = vmatprep.subr.bf16.mxu0 %v7247_v50  ;;  %v2551_v42 = vrot.slane %v2549_v9, 5  ;;  %v2557_v49 = vrot.slane %v2555_v61, 5  ;;  %v2561_v24 = vrot.slane %v2559_v34, 4 }
  0xa2   : > { %v6091_v27 = vcombine.low %v2510_v25, %v2520_v22  ;;  %v2534_v39 = vsel %vm7459_vm2, %v2529_v29, %v2533_v62  ;;  %v2539_v40 = vrot.slane %v2538_v28, 4  ;;  %v2567_v4 = vrot.slane %v2565_v47, 5  ;;  %v6168_v29 = vld [vmem:[%s9249_s3 + $0x4] sm:$0xf] }
  0xa3   : > { %6874 = vmatmul.mubr.bf16.gmra.mxu0 %v7246_v7  ;;  %v2570_v44 = vshrl.u32 %v6068_v35, 16  ;;  %v2552_v54 = vor.u32 %v2551_v42, %v2548_v30  ;;  %v2573_v56 = vshll.u32 %v6068_v35, 16  ;;  %v2562_v60 = vor.u32 %v2561_v24, %v2557_v49  ;;  %v7253_v47 = vld [vmem:[%s7399_s13] sm:$0xff]   ;;  %v6106_v24 = vld [vmem:[%s7416_s7 + $0x3c] sm:$0xe] }
  0xa4   : > { %6905 = vmatprep.mubr.bf16.mxu1 %v6091_v27  ;;  %6922 = vmatpush3.bf16.msra.mxu0 %v7247_v50  ;;  %v2544_v41 = vsel %vm7459_vm2, %v2539_v40, %v2543_v13  ;;  %v2579_v50 = vshll.u32 %v8064_v43, 16  ;;  %v2583_v2 = vshrl.u32 %v8064_v43, 16  ;;  %v2589_v15 = vshll.u32 %v8067_v48, 16 }
  0xa5   : > { %6923 = vmatprep.subr.bf16.mxu0 %v7248_v10  ;;  %6877 = vmatprep.mubr.bf16.mxu0 %v7249_v14  ;;  %v6092_v59 = vcombine.low %v2534_v39, %v2544_v41  ;;  %v2572_v63 = vrot.slane %v2570_v44, 4  ;;  %v2553_v57 = vrot.slane %v2552_v54, 4  ;;  %v2575_v7 = vrot.slane %v2573_v56, 5  ;;  %v6107_v54 = vld [vmem:[%s7416_s7 + $0x48] sm:$0xe] }
  0xa6   : > { %v2581_v11 = vrot.slane %v2579_v50, 5  ;;  %v2563_v16 = vrot.slane %v2562_v60, 4  ;;  %v2585_v62 = vrot.slane %v2583_v2, 4  ;;  %v6111_v17 = vrot.slane %v6103_v0, 9 }
  0xa7   : > { %v2839_v14 = vrot.slane %v2837_v6, 4  ;;  %v2558_v25 = vsel %vm7459_vm2, %v2553_v57, %v2557_v49  ;;  %v2576_v19 = vor.u32 %v2575_v7, %v2572_v63  ;;  %v2591_v53 = vrot.slane %v2589_v15, 5  ;;  %v7254_v57 = vld [vmem:[%s7399_s13 + $0xc] sm:$0xff]   ;;  %v6109_v15 = vld [vmem:[%s7416_s7 + $0x60] sm:$0xe] }
  0xa8   : > { %6924 = vmatpush3.bf16.msra.mxu0 %v7248_v10  ;;  %6906 = vmatmul.mubr.bf16.gmra.mxu1 %v6092_v59  ;;  %v6104_v10 = vld [vmem:[%s7416_s7 + $0x24] sm:$0xe]  ;;  %v2844_v8 = vrot.slane %v7949_v18, 5  ;;  %v2568_v22 = vsel %vm7459_vm2, %v2563_v16, %v2567_v4  ;;  %v2586_v13 = vor.u32 %v2585_v62, %v2581_v11  ;;  %v2838_v45 = vsel %vm7632_vm5, %v6111_v17, %v2837_v6  ;;  %v6105_v6 = vld [vmem:[%s7416_s7 + $0x30] sm:$0xe] }
  0xa9   : > { %6925 = vmatprep.subr.bf16.mxu0 %v7251_v37  ;;  %v2841_v27 = vsel %vm7632_vm5, %v2839_v14, %v2840_v21  ;;  %v6093_v18 = vcombine.low %v2558_v25, %v2568_v22  ;;  %v2577_v28 = vrot.slane %v2576_v19, 4  ;;  %v6112_v30 = vrot.slane %v6104_v10, 9  ;;  %v7255_v10 = vld [vmem:[%s7399_s13 + $0x18] sm:$0xff]  }
  0xaa   : > { %v6135_v9 = vcombine.low %v2838_v45, %v2841_v27  ;;  %v2587_v61 = vrot.slane %v2586_v13, 4  ;;  %v2846_v46 = vrot.slane %v2844_v8, 4  ;;  %v2847_v21 = vrot.slane %v7952_v20, 5 }
  0xab   : > { %6878 = vmatmul.mubr.bf16.gmra.mxu0 %v7250_v52  ;;  %6909 = vmatprep.mubr.bf16.mxu1 %v6093_v18  ;;  %v2582_v34 = vsel %vm7459_vm2, %v2577_v28, %v2581_v11  ;;  %v2845_v35 = vsel %vm7632_vm5, %v6112_v30, %v2844_v8  ;;  %v6113_v39 = vrot.slane %v6105_v6, 9  ;;  %v2851_v42 = vrot.slane %v7973_v38, 5  ;;  %v3302_v18 = vld [vmem:[%s7399_s13] sm:$0xf]  ;;  %v3303_v28 = vld [vmem:[%s7399_s13 + $0x4] sm:$0xf] }
  0xac   : > { %6926 = vmatpush3.bf16.msra.mxu0 %v7251_v37  ;;  %6929 = vmatprep.mubr.bf16.mxu0 %v6135_v9  ;;  %v3569_v37 = vsel %vm3185_vm6, %v6168_v29, 0  ;;  %v2592_v40 = vsel %vm7459_vm2, %v2587_v61, %v2591_v53  ;;  %v2848_v20 = vsel %vm7632_vm5, %v2846_v46, %v2847_v21  ;;  %v2854_v49 = vrot.slane %v7976_v51, 5  ;;  %v6110_v53 = vld [vmem:[%s7416_s7 + $0x6c] sm:$0xe]  ;;  %v3304_v30 = vld [vmem:[%s7399_s13 + $0x8] sm:$0x1] }
  0xad   : > { %6927 = vmatprep.subr.bf16.mxu0 %v7252_v3  ;;  %v6094_v4 = vcombine.low %v2582_v34, %v2592_v40  ;;  %v6136_v52 = vcombine.low %v2845_v35, %v2848_v20  ;;  %v6114_v44 = vrot.slane %v6106_v24, 9  ;;  %v2858_v41 = vrot.slane %v7986_v5, 5  ;;  %v3305_v40 = vld [vmem:[%s7399_s13 + $0xc] sm:$0xf] }
  0xae   : > { %v2852_v56 = vsel %vm7632_vm5, %v6113_v39, %v2851_v42  ;;  %v2853_v50 = vrot.slane %v2851_v42, 4  ;;  %v2861_v38 = vrot.slane %v7991_v12, 5  ;;  %v6115_v59 = vrot.slane %v6107_v54, 9 }
  0xaf   : > { %v2860_v51 = vrot.slane %v2858_v41, 4  ;;  %v2865_v60 = vrot.slane %v8011_v31, 5  ;;  %v2868_v63 = vrot.slane %v8014_v33, 5  ;;  %v2859_v2 = vsel %vm7632_vm5, %v6114_v44, %v2858_v41 }
  0xb0   : > { %6928 = vmatpush3.bf16.msra.mxu0 %v7252_v3  ;;  %6910 = vmatmul.mubr.bf16.gmra.mxu1 %v6094_v4  ;;  %v2855_v5 = vsel %vm7632_vm5, %v2853_v50, %v2854_v49  ;;  %v6108_v3 = vld [vmem:[%s7416_s7 + $0x54] sm:$0xe]  ;;  %v2872_v12 = vrot.slane %v8021_v55, 5  ;;  %v2875_v0 = vrot.slane %v8029_v58, 5  ;;  %v3823_v16 = vsel %vm3185_vm6, %v6193_v1, 0 }
  0xb1   : > { %7108 = vmatprep.subr.msk.bf16.mxu0 %vm3185_vm6, %v6168_v29  ;;  %6947 = vmatprep.mubr.msk.bf16.mxu1 %vm3160_vm7, %v7253_v47  ;;  %v6137_v31 = vcombine.low %v2852_v56, %v2855_v5  ;;  %v2862_v33 = vsel %vm7632_vm5, %v2860_v51, %v2861_v38  ;;  %v2866_v7 = vsel %vm7632_vm5, %v6115_v59, %v2865_v60  ;;  %v2867_v11 = vrot.slane %v2865_v60, 4  ;;  %v3684_v47 = vld [vmem:[%s7399_s13] sm:$0xe]  ;;  %v3306_v4 = vld [vmem:[%s7399_s13 + $0x10] sm:$0xf]  ;;  %v7256_v38 = vld [vmem:[%s7399_s13 + $0x24] sm:$0xff]  }
  0xb2   : > { %v6116_v62 = vrot.slane %v6108_v3, 9  ;;  %v2874_v17 = vrot.slane %v2872_v12, 4  ;;  %v6117_v55 = vrot.slane %v6109_v15, 9  ;;  %v6138_v58 = vcombine.low %v2859_v2, %v2862_v33  ;;  %v3307_v56 = vld [vmem:[%s7399_s13 + $0x14] sm:$0x1] }
  0xb3   : > { %6930 = vmatmul.mubr.bf16.vlgmr.msra.gmra.mxu0 %v6136_v52  ;;  %v2869_v14 = vsel %vm7632_vm5, %v2867_v11, %v2868_v63  ;;  %v2879_v25 = vrot.slane %v8049_v23, 5  ;;  %v2882_v19 = vrot.slane %v8052_v26, 5  ;;  %v6118_v45 = vrot.slane %v6110_v53, 9  ;;  %v6228_v50 = vld [vmem:[%s9249_s3 + $0xc] sm:$0xf]  ;;  %v7257_v2 = vld [vmem:[%s7399_s13 + $0x30] sm:$0xff]  }
  0xb4   : > { %6964 = vmatpush3.bf16.msra.mxu0 %v3569_v37  ;;  %6933 = vmatprep.mubr.bf16.mxu0 %v6137_v31  ;;  %v6139_v8 = vcombine.low %v2866_v7, %v2869_v14  ;;  %v8148_v22 = vsel %vm7632_vm5, %v6116_v62, %v2872_v12  ;;  %v8152_v13 = vsel %vm7632_vm5, %v2874_v17, %v2875_v0  ;;  %v2886_v29 = vrot.slane %v8064_v43, 5  ;;  %v6269_v5 = vld [vmem:[%s9249_s3 + $0x10] sm:$0xf]  ;;  %v3685_v15 = vld [vmem:[%s7399_s13 + $0xc] sm:$0xe] }
  0xb5   : > { %v6140_v27 = vcombine.low %v8148_v22, %v8152_v13  ;;  %v8158_v23 = vsel %vm7632_vm5, %v6117_v55, %v2879_v25  ;;  %v2881_v26 = vrot.slane %v2879_v25, 4  ;;  %v2889_v9 = vrot.slane %v8067_v48, 5  ;;  %7110 = vmatprep.subr.msk.bf16.mxu0 %vm3185_vm6, %v6228_v50  ;;  %v3308_v53 = vld [vmem:[%s7399_s13 + $0x18] sm:$0xf]  ;;  %v7258_v13 = vld [vmem:[%s7399_s13 + $0x3c] sm:$0xff]  }
  0xb6   : > { %v3327_v1 = vshrl.u32 %v3302_v18, 16  ;;  %v3330_v6 = vshll.u32 %v3302_v18, 16  ;;  %v3336_v61 = vshll.u32 %v3303_v28, 16  ;;  %v8172_v21 = vsel %vm7632_vm5, %v6118_v45, %v2886_v29 }
  0xb7   : > { %v8168_v46 = vsel %vm7632_vm5, %v2881_v26, %v2882_v19  ;;  %v2888_v43 = vrot.slane %v2886_v29, 4  ;;  %v3340_v34 = vshrl.u32 %v3303_v28, 16  ;;  %v3346_v49 = vshll.u32 %v3304_v30, 16  ;;  %v3309_v26 = vld [vmem:[%s7399_s13 + $0x1c] sm:$0xf] }
  0xb8   : > { %6948 = vmatmul.mubr.msk.bf16.vlgmr.msra.gmra.mxu1 %vm3160_vm7, %v7254_v57  ;;  %v6141_v48 = vcombine.low %v8158_v23, %v8168_v46  ;;  %v3329_v35 = vrot.slane %v3327_v1, 4  ;;  %v3332_v37 = vrot.slane %v3330_v6, 5  ;;  %v3338_v39 = vrot.slane %v3336_v61, 5 }
  0xb9   : > { %6982 = vmatpush3.bf16.msra.mxu1 %v3823_v16  ;;  %6951 = vmatprep.mubr.msk.bf16.mxu1 %vm3160_vm7, %v7255_v10  ;;  %v8181_v20 = vsel %vm7632_vm5, %v2888_v43, %v2889_v9  ;;  %v3342_v42 = vrot.slane %v3340_v34, 4  ;;  %v6185_v24 = vrot.slane %v3684_v47, 9  ;;  %v3718_v41 = vrot.slane %v3303_v28, 5  ;;  %v3686_v47 = vld [vmem:[%s7399_s13 + $0x18] sm:$0xe] }
  0xba   : > { %v6142_v52 = vcombine.low %v8172_v21, %v8181_v20  ;;  %v3333_v44 = vor.u32 %v3332_v37, %v3329_v35  ;;  %v3721_v54 = vrot.slane %v3304_v30, 5  ;;  %v3348_v51 = vrot.slane %v3346_v49, 5  ;;  %7111 = vmatprep.subr.msk.bf16.mxu1 %vm3185_vm6, %v6269_v5  ;;  %v3310_v30 = vld [vmem:[%s7399_s13 + $0x20] sm:$0x1] }
  0xbb   : > { %6934 = vmatmul.mubr.bf16.gmra.mxu0 %v6138_v58  ;;  %v3343_v59 = vor.u32 %v3342_v42, %v3338_v39  ;;  %v3351_v60 = vshrl.u32 %v3305_v40, 16  ;;  %v3354_v63 = vshll.u32 %v3305_v40, 16  ;;  %v8198_v12 = vsel %vm7632_vm5, %v6185_v24, %v3718_v41  ;;  %v3311_v42 = vld [vmem:[%s7399_s13 + $0x24] sm:$0xf] }
  0xbc   : > { %6937 = vmatprep.mubr.bf16.mxu0 %v6139_v8  ;;  %v3334_v3 = vrot.slane %v3333_v44, 4  ;;  %v3720_v0 = vrot.slane %v3718_v41, 4  ;;  %v3360_v57 = vshll.u32 %v3306_v4, 16  ;;  %v3364_v11 = vshrl.u32 %v3306_v4, 16  ;;  %v3312_v41 = vld [vmem:[%s7399_s13 + $0x28] sm:$0xf] }
  0xbd   : > { %v3344_v31 = vrot.slane %v3343_v59, 4  ;;  %v3353_v33 = vrot.slane %v3351_v60, 4  ;;  %v3356_v7 = vrot.slane %v3354_v63, 5  ;;  %v3370_v55 = vshll.u32 %v3307_v56, 16  ;;  %v3313_v63 = vld [vmem:[%s7399_s13 + $0x2c] sm:$0x1] }
  0xbe   : > { %v3339_v16 = vsel %vm7459_vm2, %v3334_v3, %v3338_v39  ;;  %v8206_v62 = vsel %vm7632_vm5, %v3720_v0, %v3721_v54  ;;  %v3362_v17 = vrot.slane %v3360_v57, 5  ;;  %v3366_v19 = vrot.slane %v3364_v11, 4 }
  0xbf   : > { %v3349_v58 = vsel %vm7459_vm2, %v3344_v31, %v3348_v51  ;;  %v6194_v14 = vcombine.low %v8198_v12, %v8206_v62  ;;  %v3357_v25 = vor.u32 %v3356_v7, %v3353_v33  ;;  %v3372_v8 = vrot.slane %v3370_v55, 5  ;;  %v3687_v31 = vld [vmem:[%s7399_s13 + $0x24] sm:$0xe] }
  0xc0   : > { %6952 = vmatmul.mubr.msk.bf16.gmra.mxu1 %vm3160_vm7, %v7256_v38  ;;  %v6169_v10 = vcombine.low %v3339_v16, %v3349_v58  ;;  %v6186_v45 = vrot.slane %v3685_v15, 9  ;;  %v3725_v23 = vrot.slane %v3306_v4, 5  ;;  %v3367_v18 = vor.u32 %v3366_v19, %v3362_v17 }
  0xc1   : > { %6955 = vmatprep.mubr.msk.bf16.mxu1 %vm3160_vm7, %v7257_v2  ;;  %v3358_v29 = vrot.slane %v3357_v25, 4  ;;  %v3728_v28 = vrot.slane %v3307_v56, 5  ;;  %v8220_v9 = vsel %vm3185_vm6, %v6228_v50, 0  ;;  %v8228_v61 = vsel %vm3185_vm6, %v6269_v5, 0  ;;  %v7260_v25 = vld [vmem:[%s7399_s13 + $0x54] sm:$0xff]  }
  0xc2   : > { %v8225_v1 = vsel %vm7632_vm5, %v6186_v45, %v3725_v23  ;;  %v3727_v6 = vrot.slane %v3725_v23, 4  ;;  %v3375_v22 = vshrl.u32 %v3308_v53, 16  ;;  %v3368_v46 = vrot.slane %v3367_v18, 4 }
  0xc3   : > { %6938 = vmatmul.mubr.bf16.gmra.mxu0 %v6140_v27  ;;  %v3363_v27 = vsel %vm7459_vm2, %v3358_v29, %v3362_v17  ;;  %v3378_v43 = vshll.u32 %v3308_v53, 16  ;;  %v3384_v34 = vshll.u32 %v3309_v26, 16  ;;  %v3388_v39 = vshrl.u32 %v3309_v26, 16  ;;  %v3314_v53 = vld [vmem:[%s7399_s13 + $0x30] sm:$0xf] }
  0xc4   : > { %6941 = vmatprep.mubr.bf16.mxu0 %v6141_v48  ;;  %v7259_v48 = vld [vmem:[%s7399_s13 + $0x48] sm:$0xff]   ;;  %v8237_v35 = vsel %vm7632_vm5, %v3727_v6, %v3728_v28  ;;  %v3377_v37 = vrot.slane %v3375_v22, 4  ;;  %v3394_v40 = vshll.u32 %v3310_v30, 16  ;;  %v3373_v49 = vsel %vm7459_vm2, %v3368_v46, %v3372_v8  ;;  %v3316_v6 = vld [vmem:[%s7399_s13 + $0x38] sm:$0x1] }
  0xc5   : > { %v6195_v24 = vcombine.low %v8225_v1, %v8237_v35  ;;  %v3380_v4 = vrot.slane %v3378_v43, 5  ;;  %v3386_v44 = vrot.slane %v3384_v34, 5  ;;  %v6170_v54 = vcombine.low %v3363_v27, %v3373_v49  ;;  %v3688_v22 = vld [vmem:[%s7399_s13 + $0x30] sm:$0xe] }
  0xc6   : > { %v3390_v56 = vrot.slane %v3388_v39, 4  ;;  %v3396_v50 = vrot.slane %v3394_v40, 5  ;;  %v6187_v38 = vrot.slane %v3686_v47, 9  ;;  %v3732_v51 = vrot.slane %v3309_v26, 5  ;;  %v3315_v26 = vld [vmem:[%s7399_s13 + $0x34] sm:$0xf] }
  0xc7   : > { %v3381_v59 = vor.u32 %v3380_v4, %v3377_v37  ;;  %v3735_v60 = vrot.slane %v3310_v30, 5  ;;  %v3399_v5 = vshrl.u32 %v3311_v42, 16  ;;  %v3402_v3 = vshll.u32 %v3311_v42, 16  ;;  %v3317_v4 = vld [vmem:[%s7399_s13 + $0x3c] sm:$0xf] }
  0xc8   : > { %6956 = vmatmul.mubr.msk.bf16.gmra.mxu1 %vm3160_vm7, %v7258_v13  ;;  %v3391_v2 = vor.u32 %v3390_v56, %v3386_v44  ;;  %v3408_v0 = vshll.u32 %v3312_v41, 16  ;;  %v3412_v57 = vshrl.u32 %v3312_v41, 16  ;;  %v8254_v7 = vsel %vm7632_vm5, %v6187_v38, %v3732_v51 }
  0xc9   : > { %6959 = vmatprep.mubr.msk.bf16.mxu1 %vm3160_vm7, %v7259_v48  ;;  %v3382_v33 = vrot.slane %v3381_v59, 4  ;;  %v3734_v11 = vrot.slane %v3732_v51, 4  ;;  %v3401_v15 = vrot.slane %v3399_v5, 4  ;;  %v3404_v17 = vrot.slane %v3402_v3, 5  ;;  %v3319_v59 = vld [vmem:[%s7399_s13 + $0x44] sm:$0x1] }
  0xca   : > { %v3392_v16 = vrot.slane %v3391_v2, 4  ;;  %v3410_v55 = vrot.slane %v3408_v0, 5  ;;  %v3414_v58 = vrot.slane %v3412_v57, 4  ;;  %v6188_v19 = vrot.slane %v3687_v31, 9  ;;  %v3689_v2 = vld [vmem:[%s7399_s13 + $0x3c] sm:$0xe] }
  0xcb   : > { %6942 = vmatmul.mubr.bf16.gmra.mxu0 %v6142_v52  ;;  %v3387_v21 = vsel %vm7459_vm2, %v3382_v33, %v3386_v44  ;;  %v8262_v20 = vsel %vm7632_vm5, %v3734_v11, %v3735_v60  ;;  %v3418_v52 = vshll.u32 %v3313_v63, 16  ;;  %v3405_v45 = vor.u32 %v3404_v17, %v3401_v15  ;;  %v3320_v31 = vld [vmem:[%s7399_s13 + $0x48] sm:$0xf]  ;;  %v3321_v17 = vld [vmem:[%s7399_s13 + $0x4c] sm:$0xf] }
  0xcc   : > { %6965 = vmatprep.mubr.msk.bf16.mxu0 %vm3160_vm7, %v6169_v10  ;;  %v3397_v10 = vsel %vm7459_vm2, %v3392_v16, %v3396_v50  ;;  %v6196_v8 = vcombine.low %v8254_v7, %v8262_v20  ;;  %v3415_v23 = vor.u32 %v3414_v58, %v3410_v55  ;;  %v3739_v28 = vrot.slane %v3312_v41, 5 }
  0xcd   : > { %v6171_v29 = vcombine.low %v3387_v21, %v3397_v10  ;;  %v3420_v18 = vrot.slane %v3418_v52, 5  ;;  %v3742_v30 = vrot.slane %v3313_v63, 5  ;;  %v3406_v13 = vrot.slane %v3405_v45, 4 }
  0xce   : > { %v3416_v27 = vrot.slane %v3415_v23, 4  ;;  %v3423_v46 = vshrl.u32 %v3314_v53, 16  ;;  %v3426_v43 = vshll.u32 %v3314_v53, 16  ;;  %v8275_v34 = vsel %vm7632_vm5, %v6188_v19, %v3739_v28  ;;  %v8314_v19 = vld [vmem:[%s9249_s3 + $0x18] sm:$0xf] }
  0xcf   : > { %v3741_v47 = vrot.slane %v3739_v28, 4  ;;  %v3432_v48 = vshll.u32 %v3315_v26, 16  ;;  %v3436_v37 = vshrl.u32 %v3315_v26, 16  ;;  %v3411_v39 = vsel %vm7459_vm2, %v3406_v13, %v3410_v55  ;;  %v8305_v55 = vld [vmem:[%s9249_s3 + $0x14] sm:$0xf] }
  0xd0   : > { %6960 = vmatmul.mubr.msk.bf16.gmra.mxu1 %vm3160_vm7, %v7260_v25  ;;  %v3421_v40 = vsel %vm7459_vm2, %v3416_v27, %v3420_v18  ;;  %v3425_v42 = vrot.slane %v3423_v46, 4  ;;  %v3428_v49 = vrot.slane %v3426_v43, 5  ;;  %v3442_v38 = vshll.u32 %v3316_v6, 16 }
  0xd1   : > { %6983 = vmatprep.mubr.msk.bf16.mxu1 %vm3160_vm7, %v6194_v14  ;;  %v6172_v44 = vcombine.low %v3411_v39, %v3421_v40  ;;  %v8289_v41 = vsel %vm7632_vm5, %v3741_v47, %v3742_v30  ;;  %v3434_v12 = vrot.slane %v3432_v48, 5  ;;  %v3438_v62 = vrot.slane %v3436_v37, 4  ;;  %v3318_v14 = vld [vmem:[%s7399_s13 + $0x40] sm:$0xf] }
  0xd2   : > { %v6197_v56 = vcombine.low %v8275_v34, %v8289_v41  ;;  %v3429_v50 = vor.u32 %v3428_v49, %v3425_v42  ;;  %v3746_v60 = vrot.slane %v3315_v26, 5  ;;  %v3749_v63 = vrot.slane %v3316_v6, 5 }
  0xd3   : > { %6966 = vmatmul.mubr.msk.bf16.vlgmr.msra.gmra.mxu0 %vm3160_vm7, %v6170_v54  ;;  %v6189_v54 = vrot.slane %v3688_v22, 9  ;;  %v3439_v51 = vor.u32 %v3438_v62, %v3434_v12  ;;  %v3447_v5 = vshrl.u32 %v3317_v4, 16  ;;  %v3444_v0 = vrot.slane %v3442_v38, 5  ;;  %v3690_v22 = vld [vmem:[%s7399_s13 + $0x48] sm:$0xe] }
  0xd4   : > { %7000 = vmatpush3.bf16.msra.mxu0 %v8220_v9  ;;  %6969 = vmatprep.mubr.msk.bf16.mxu0 %vm3160_vm7, %v6171_v29  ;;  %v3430_v3 = vrot.slane %v3429_v50, 4  ;;  %v3450_v57 = vshll.u32 %v3317_v4, 16  ;;  %v3456_v9 = vshll.u32 %v3318_v14, 16  ;;  %v3748_v15 = vrot.slane %v3746_v60, 4  ;;  %v3322_v29 = vld [vmem:[%s7399_s13 + $0x50] sm:$0x1] }
  0xd5   : > { %v3440_v33 = vrot.slane %v3439_v51, 4  ;;  %v3747_v11 = vsel %vm7632_vm5, %v6189_v54, %v3746_v60  ;;  %v3449_v16 = vrot.slane %v3447_v5, 4  ;;  %v3460_v52 = vshrl.u32 %v3318_v14, 16  ;;  %7112 = vmatprep.subr.msk.bf16.mxu0 %vm3185_vm6, %v8305_v55  ;;  %v3324_v38 = vld [vmem:[%s7399_s13 + $0x58] sm:$0xf] }
  0xd6   : > { %v3435_v58 = vsel %vm7459_vm2, %v3430_v3, %v3434_v12  ;;  %v3452_v25 = vrot.slane %v3450_v57, 5  ;;  %v3458_v21 = vrot.slane %v3456_v9, 5  ;;  %v3750_v10 = vsel %vm7632_vm5, %v3748_v15, %v3749_v63  ;;  %v3325_v63 = vld [vmem:[%s7399_s13 + $0x5c] sm:$0x1]  ;;  %v3691_v57 = vld [vmem:[%s7399_s13 + $0x54] sm:$0xe] }
  0xd7   : > { %v3445_v53 = vsel %vm7459_vm2, %v3440_v33, %v3444_v0  ;;  %v3466_v45 = vshll.u32 %v3319_v59, 16  ;;  %v6190_v23 = vrot.slane %v3689_v2, 9  ;;  %v6198_v1 = vcombine.low %v3747_v11, %v3750_v10 }
  0xd8   : > { %6984 = vmatmul.mubr.msk.bf16.vlgmr.msra.gmra.mxu1 %vm3160_vm7, %v6195_v24  ;;  %v6173_v26 = vcombine.low %v3435_v58, %v3445_v53  ;;  %v3453_v35 = vor.u32 %v3452_v25, %v3449_v16  ;;  %v3462_v24 = vrot.slane %v3460_v52, 4  ;;  %v3753_v28 = vrot.slane %v3318_v14, 5  ;;  %v8366_v53 = vld [vmem:[%s7399_s13 + $0x10] sm:$0xf] }
  0xd9   : > { %7018 = vmatpush3.bf16.msra.mxu1 %v8228_v61  ;;  %6987 = vmatprep.mubr.msk.bf16.mxu1 %vm3160_vm7, %v6196_v8  ;;  %v3468_v18 = vrot.slane %v3466_v45, 5  ;;  %v3756_v30 = vrot.slane %v3319_v59, 5  ;;  %v3471_v6 = vshrl.u32 %v3320_v31, 16  ;;  %v3474_v20 = vshll.u32 %v3320_v31, 16  ;;  %v6245_v31 = vld [vmem:[%s7399_s13 + $0xc] sm:$0xf] }
  0xda   : > { %7113 = vmatprep.subr.msk.bf16.mxu1 %vm3185_vm6, %v8314_v19  ;;  %v3454_v61 = vrot.slane %v3453_v35, 4  ;;  %v3463_v7 = vor.u32 %v3462_v24, %v3458_v21  ;;  %v3480_v8 = vshll.u32 %v3321_v17, 16  ;;  %v8337_v13 = vsel %vm7632_vm5, %v6190_v23, %v3753_v28  ;;  %v8369_v35 = vld [vmem:[%s7399_s13 + $0x14] sm:$0x1] }
  0xdb   : > { %6970 = vmatmul.mubr.msk.bf16.gmra.mxu0 %vm3160_vm7, %v6172_v44  ;;  %v3755_v27 = vrot.slane %v3753_v28, 4  ;;  %v3473_v46 = vrot.slane %v3471_v6, 4  ;;  %v3484_v43 = vshrl.u32 %v3321_v17, 16  ;;  %v3476_v37 = vrot.slane %v3474_v20, 5  ;;  %v3323_v44 = vld [vmem:[%s7399_s13 + $0x54] sm:$0xf] }
  0xdc   : > { %6973 = vmatprep.mubr.msk.bf16.mxu0 %vm3160_vm7, %v6173_v26  ;;  %v3459_v47 = vsel %vm7459_vm2, %v3454_v61, %v3458_v21  ;;  %v3464_v48 = vrot.slane %v3463_v7, 4  ;;  %v3482_v39 = vrot.slane %v3480_v8, 5  ;;  %v3490_v49 = vshll.u32 %v3322_v29, 16 }
  0xdd   : > { %v3757_v40 = vsel %vm7632_vm5, %v3755_v27, %v3756_v30  ;;  %v3486_v42 = vrot.slane %v3484_v43, 4  ;;  %v6191_v4 = vrot.slane %v3690_v22, 9  ;;  %v3477_v14 = vor.u32 %v3476_v37, %v3473_v46 }
  0xde   : > { %v3469_v12 = vsel %vm7459_vm2, %v3464_v48, %v3468_v18  ;;  %v6199_v62 = vcombine.low %v8337_v13, %v3757_v40  ;;  %v3760_v50 = vrot.slane %v3321_v17, 5  ;;  %v3492_v51 = vrot.slane %v3490_v49, 5 }
  0xdf   : > { %v6174_v54 = vcombine.low %v3459_v47, %v3469_v12  ;;  %v3487_v59 = vor.u32 %v3486_v42, %v3482_v39  ;;  %v3763_v60 = vrot.slane %v3322_v29, 5  ;;  %v3478_v5 = vrot.slane %v3477_v14, 4  ;;  %v6248_v42 = vld [vmem:[%s7399_s13 + $0x18] sm:$0xf]  ;;  %v8393_v14 = vld [vmem:[%s7399_s13 + $0x1c] sm:$0xf] }
  0xe0   : > { %6988 = vmatmul.mubr.msk.bf16.gmra.mxu1 %vm3160_vm7, %v6197_v56  ;;  %v3761_v2 = vsel %vm7632_vm5, %v6191_v4, %v3760_v50  ;;  %v3762_v3 = vrot.slane %v3760_v50, 4  ;;  %v3495_v0 = vshrl.u32 %v3323_v44, 16  ;;  %v3498_v41 = vshll.u32 %v3323_v44, 16 }
  0xe1   : > { %6991 = vmatprep.mubr.msk.bf16.mxu1 %vm3160_vm7, %v6198_v1  ;;  %v3488_v34 = vrot.slane %v3487_v59, 4  ;;  %v3504_v56 = vshll.u32 %v3324_v38, 16  ;;  %v3508_v9 = vshrl.u32 %v3324_v38, 16  ;;  %v3483_v33 = vsel %vm7459_vm2, %v3478_v5, %v3482_v39  ;;  %v7261_v59 = vld [vmem:[%s7399_s13 + $0xc] sm:$0xff]  }
  0xe2   : > { %v3764_v11 = vsel %vm7632_vm5, %v3762_v3, %v3763_v60  ;;  %v3497_v15 = vrot.slane %v3495_v0, 4  ;;  %v3514_v16 = vshll.u32 %v3325_v63, 16  ;;  %v3500_v21 = vrot.slane %v3498_v41, 5 }
  0xe3   : > { %6974 = vmatmul.mubr.msk.bf16.gmra.mxu0 %vm3160_vm7, %v6174_v54  ;;  %v3493_v58 = vsel %vm7459_vm2, %v3488_v34, %v3492_v51  ;;  %v6200_v25 = vcombine.low %v3761_v2, %v3764_v11  ;;  %v3506_v52 = vrot.slane %v3504_v56, 5  ;;  %v3510_v23 = vrot.slane %v3508_v9, 4 }
  0xe4   : > { %v6175_v45 = vcombine.low %v3483_v33, %v3493_v58  ;;  %v3516_v26 = vrot.slane %v3514_v16, 5  ;;  %v6192_v1 = vrot.slane %v3691_v57, 9  ;;  %v3501_v29 = vor.u32 %v3500_v21, %v3497_v15  ;;  %v6251_v33 = vld [vmem:[%s7399_s13 + $0x24] sm:$0xf] }
  0xe5   : > { %v3767_v18 = vrot.slane %v3324_v38, 5  ;;  %v3770_v28 = vrot.slane %v3325_v63, 5  ;;  %v4163_v30 = vshrl.u32 %v6245_v31, 16  ;;  %v3511_v22 = vor.u32 %v3510_v23, %v3506_v52  ;;  %v8399_v63 = vld [vmem:[%s7399_s13 + $0x20] sm:$0x1] }
  0xe6   : > { %6977 = vmatprep.mubr.msk.bf16.mxu0 %vm3160_vm7, %v6175_v45  ;;  %v4166_v61 = vshll.u32 %v6245_v31, 16  ;;  %v4172_v7 = vshll.u32 %v8366_v53, 16  ;;  %v4176_v20 = vshrl.u32 %v8366_v53, 16  ;;  %v3502_v13 = vrot.slane %v3501_v29, 4  ;;  %v8417_v23 = vld [vmem:[%s7399_s13 + $0x28] sm:$0xf] }
  0xe7   : > { %v3768_v27 = vsel %vm7632_vm5, %v6192_v1, %v3767_v18  ;;  %v3769_v46 = vrot.slane %v3767_v18, 4  ;;  %v4165_v43 = vrot.slane %v4163_v30, 4  ;;  %v3512_v48 = vrot.slane %v3511_v22, 4  ;;  %v7262_v1 = vld [vmem:[%s7399_s13 + $0x18] sm:$0xff]  }
  0xe8   : > { %6992 = vmatmul.mubr.msk.bf16.gmra.mxu1 %vm3160_vm7, %v6199_v62  ;;  %v4168_v37 = vrot.slane %v4166_v61, 5  ;;  %v4174_v39 = vrot.slane %v4172_v7, 5  ;;  %v4178_v40 = vrot.slane %v4176_v20, 4  ;;  %v3507_v4 = vsel %vm7459_vm2, %v3502_v13, %v3506_v52 }
  0xe9   : > { %6995 = vmatprep.mubr.msk.bf16.mxu1 %vm3160_vm7, %v6200_v25  ;;  %v3771_v44 = vsel %vm7632_vm5, %v3769_v46, %v3770_v28  ;;  %v4182_v12 = vshll.u32 %v8369_v35, 16  ;;  %v3517_v38 = vsel %vm7459_vm2, %v3512_v48, %v3516_v26  ;;  %v4187_v3 = vshrl.u32 %v6248_v42, 16  ;;  %v8436_v46 = vld [vmem:[%s7399_s13 + $0x2c] sm:$0x1] }
  0xea   : > { %v6201_v54 = vcombine.low %v3768_v27, %v3771_v44  ;;  %v4169_v51 = vor.u32 %v4168_v37, %v4165_v43  ;;  %v4179_v60 = vor.u32 %v4178_v40, %v4174_v39  ;;  %v6176_v5 = vcombine.low %v3507_v4, %v3517_v38  ;;  %v7263_v27 = vld [vmem:[%s7399_s13 + $0x24] sm:$0xff]   ;;  %v6254_v43 = vld [vmem:[%s7399_s13 + $0x30] sm:$0xf]  ;;  %v8446_v40 = vld [vmem:[%s7399_s13 + $0x34] sm:$0xf] }
  0xeb   : > { %v4184_v2 = vrot.slane %v4182_v12, 5  ;;  %v4190_v0 = vshll.u32 %v6248_v42, 16  ;;  %v4196_v9 = vshll.u32 %v8393_v14, 16  ;;  %v4200_v31 = vshrl.u32 %v8393_v14, 16  ;;  %v8451_v12 = vld [vmem:[%s7399_s13 + $0x38] sm:$0x1] }
  0xec   : > { %v4170_v41 = vrot.slane %v4169_v51, 4  ;;  %v4180_v56 = vrot.slane %v4179_v60, 4  ;;  %6978 = vmatmul.mubr.msk.bf16.gmra.mxu0 %vm3160_vm7, %v6176_v5  ;;  %v4189_v11 = vrot.slane %v4187_v3, 4  ;;  %v4206_v16 = vshll.u32 %v8399_v63, 16 }
  0xed   : > { %v4192_v15 = vrot.slane %v4190_v0, 5  ;;  %7001 = vmatprep.mubr.msk.bf16.mxu0 %vm3160_vm7, %v7261_v59  ;;  %v4202_v45 = vrot.slane %v4200_v31, 4  ;;  %v4659_v7 = vsel %vm3185_vm6, %v8305_v55, 0  ;;  %v4859_v13 = vsel %vm3185_vm6, %v8314_v19, 0 }
  0xee   : > { %v4175_v21 = vsel %vm7459_vm2, %v4170_v41, %v4174_v39  ;;  %v4185_v52 = vsel %vm7459_vm2, %v4180_v56, %v4184_v2  ;;  %v4208_v18 = vrot.slane %v4206_v16, 5  ;;  %v4211_v55 = vshrl.u32 %v6251_v33, 16  ;;  %v8473_v56 = vld [vmem:[%s9249_s3 + $0x20] sm:$0xf]  ;;  %v7264_v16 = vld [vmem:[%s7399_s13 + $0x30] sm:$0xff]  }
  0xef   : > { %v6675_v17 = vpop.f32.mrf.mxu0  ;;  %v6270_v26 = vcombine.low %v4175_v21, %v4185_v52  ;;  %v4193_v29 = vor.u32 %v4192_v15, %v4189_v11  ;;  %v4214_v19 = vshll.u32 %v6251_v33, 16  ;;  %v4220_v4 = vshll.u32 %v8417_v23, 16  ;;  %v6257_v15 = vld [vmem:[%s7399_s13 + $0x3c] sm:$0xf] }
  0xf0   : > { %v6707_v10 = vpop.f32.mrf.mxu1  ;;  %6996 = vmatmul.mubr.msk.bf16.gmra.mxu1 %vm3160_vm7, %v6201_v54  ;;  %v4224_v44 = vshrl.u32 %v8417_v23, 16  ;;  %v8463_v54 = vld [vmem:[%s9249_s3 + $0x1c] sm:$0xf]  ;;  %v4235_v0 = vshrl.u32 %v6254_v43, 16  ;;  %v4244_v33 = vshll.u32 %v8446_v40, 16  ;;  %v4248_v11 = vshrl.u32 %v8446_v40, 16 }
  0xf1   : > { %v8371_v24 = vpop.f32.mrf.mxu0  ;;  %v8390_v62 = vadd.f32 %v6707_v10, %v6675_v17  ;;  %v4198_v10 = vrot.slane %v4196_v9, 5  ;;  %7019 = vmatprep.mubr.msk.bf16.mxu1 %vm3160_vm7, %v6270_v26  ;;  %v4194_v48 = vrot.slane %v4193_v29, 4  ;;  %v4216_v51 = vrot.slane %v4214_v19, 5  ;;  %v8484_v26 = vld [vmem:[%s7399_s13 + $0x40] sm:$0xf] }
  0xf2   : > { %v8373_v6 = vpop.f32.mrf.mxu1  ;;  %v4222_v60 = vrot.slane %v4220_v4, 5  ;;  %v4226_v5 = vrot.slane %v4224_v44, 4  ;;  %v4237_v21 = vrot.slane %v4235_v0, 4  ;;  %v7265_v19 = vld [vmem:[%s7399_s13 + $0x3c] sm:$0xff]   ;;  %v8502_v4 = vld [vmem:[%s7399_s13 + $0x44] sm:$0x1] }
  0xf3   : > { %v8378_v8 = vpop.f32.mrf.mxu0  ;;  %v4203_v61 = vor.u32 %v4202_v45, %v4198_v10  ;;  %v8430_v20 = vadd.f32 %v8373_v6, %v8371_v24  ;;  %v4199_v38 = vsel %vm7459_vm2, %v4194_v48, %v4198_v10  ;;  %v4254_v10 = vshll.u32 %v8451_v12, 16 }
  0xf4   : > { %v6708_v47 = vpop.f32.mrf.mxu1  ;;  %7002 = vmatmul.mubr.msk.bf16.vlgmr.msra.gmra.mxu0 %vm3160_vm7, %v7262_v1  ;;  %v4227_v31 = vor.u32 %v4226_v5, %v4222_v60 }
  0xf5   : > { %v615_v49 = vpop.f32.mrf.mxu0  ;;  %v8441_v37 = vadd.f32 %v6708_v47, %v8378_v8  ;;  %v4204_v42 = vrot.slane %v4203_v61, 4  ;;  %v4213_v8 = vrot.slane %v4211_v55, 4  ;;  %v4230_v47 = vshll.u32 %v8436_v46, 16  ;;  %7036 = vmatpush3.bf16.msra.mxu0 %v4659_v7  ;;  %7005 = vmatprep.mubr.msk.bf16.mxu0 %vm3160_vm7, %v7263_v27 }
  0xf6   : > { %v808_v50 = vpop.f32.mrf.mxu1  ;;  %7114 = vmatprep.subr.msk.bf16.mxu0 %vm3185_vm6, %v8463_v54  ;;  %v4228_v61 = vrot.slane %v4227_v31, 4  ;;  %v4246_v7 = vrot.slane %v4244_v33, 5  ;;  %v4250_v27 = vrot.slane %v4248_v11, 4  ;;  %v4256_v48 = vrot.slane %v4254_v10, 5  ;;  %v8528_v33 = vld [vmem:[%s7399_s13 + $0x4c] sm:$0xf] }
  0xf7   : > { %v6679_v57 = vpop.f32.mrf.mxu0  ;;  %v8443_v39 = vadd.f32 %v808_v50, %v615_v49  ;;  %v4209_v59 = vsel %vm7459_vm2, %v4204_v42, %v4208_v18  ;;  %v4232_v3 = vrot.slane %v4230_v47, 5  ;;  %v4217_v9 = vor.u32 %v4216_v51, %v4213_v8  ;;  %v8531_v11 = vld [vmem:[%s7399_s13 + $0x50] sm:$0x1] }
  0xf8   : > { %v6711_v34 = vpop.f32.mrf.mxu1  ;;  %v6271_v2 = vcombine.low %v4199_v38, %v4209_v59  ;;  %v4259_v59 = vshrl.u32 %v6257_v15, 16  ;;  %v4262_v51 = vshll.u32 %v6257_v15, 16  ;;  %9257 = vst [vmem:[#allocation2_spill] sm:$0xff] %v8531_v11 }
  0xf9   : > { %v8407_v58 = vpop.f32.mrf.mxu0  ;;  %v8456_v49 = vadd.f32 %v6711_v34, %v6679_v57  ;;  %v4238_v57 = vshll.u32 %v6254_v43, 16  ;;  %v4218_v18 = vrot.slane %v4217_v9, 4 }
  0xfa   : > { %v8409_v25 = vpop.f32.mrf.mxu1  ;;  %7020 = vmatmul.mubr.msk.bf16.vlgmr.msra.gmra.mxu1 %vm3160_vm7, %v6271_v2  ;;  %v4264_v9 = vrot.slane %v4262_v51, 5  ;;  %v6263_v51 = vld [vmem:[%s7399_s13 + $0x54] sm:$0xf] }
  0xfb   : > { %v8422_v30 = vpop.f32.mrf.mxu0  ;;  %v4240_v52 = vrot.slane %v4238_v57, 5  ;;  %7054 = vmatpush3.bf16.msra.mxu1 %v4859_v13  ;;  %v8494_v55 = vadd.f32 %v8409_v25, %v8407_v58  ;;  %v4223_v38 = vsel %vm7459_vm2, %v4218_v18, %v4222_v60  ;;  %v4233_v58 = vsel %vm7459_vm2, %v4228_v61, %v4232_v3 }
  0xfc   : > { %v8424_v22 = vpop.f32.mrf.mxu1  ;;  %7115 = vmatprep.subr.msk.bf16.mxu1 %vm3185_vm6, %v8473_v56  ;;  %v4251_v25 = vor.u32 %v4250_v27, %v4246_v7  ;;  %v4268_v57 = vshll.u32 %v8484_v26, 16  ;;  %v4272_v60 = vshrl.u32 %v8484_v26, 16  ;;  %v4278_v3 = vshll.u32 %v8502_v4, 16  ;;  %7006 = vmatmul.mubr.msk.bf16.gmra.mxu0 %vm3160_vm7, %v7264_v16 }
  0xfd   : > { %v631_v24 = vpop.f32.mrf.mxu0  ;;  %v4241_v43 = vor.u32 %v4240_v52, %v4237_v21  ;;  %v8498_v42 = vadd.f32 %v8424_v22, %v8422_v30  ;;  %v6260_v30 = vld [vmem:[%s7399_s13 + $0x48] sm:$0xf]  ;;  %v6272_v22 = vcombine.low %v4223_v38, %v4233_v58  ;;  %7009 = vmatprep.mubr.msk.bf16.mxu0 %vm3160_vm7, %v7265_v19  ;;  %v4292_v58 = vshll.u32 %v8528_v33, 16 }
  0xfe   : > { %v824_v6 = vpop.f32.mrf.mxu1  ;;  %v4252_v0 = vrot.slane %v4251_v25, 4  ;;  %v4270_v16 = vrot.slane %v4268_v57, 5  ;;  %v4274_v52 = vrot.slane %v4272_v60, 4  ;;  %v4280_v10 = vrot.slane %v4278_v3, 5  ;;  %v7266_v38 = vld [vmem:[%s7399_s13 + $0x48] sm:$0xff]   ;;  %v7267_v25 = vld [vmem:[%s7399_s13 + $0x54] sm:$0xff]  }
  0xff   : > { %v6683_v34 = vpop.f32.mrf.mxu0  ;;  %v8512_v8 = vadd.f32 %v824_v6, %v631_v24  ;;  %v4242_v47 = vrot.slane %v4241_v43, 4  ;;  %7023 = vmatprep.mubr.msk.bf16.mxu1 %vm3160_vm7, %v6272_v22  ;;  %v4261_v6 = vrot.slane %v4259_v59, 4  ;;  %v4302_v19 = vshll.u32 %v8531_v11, 16 }
 0x100   : > { %v8458_v50 = vpop.f32.mrf.mxu1  ;;  %v4257_v21 = vsel %vm7459_vm2, %v4252_v0, %v4256_v48  ;;  %v4275_v43 = vor.u32 %v4274_v52, %v4270_v16  ;;  %v4296_v48 = vshrl.u32 %v8528_v33, 16  ;;  %v4294_v3 = vrot.slane %v4292_v58, 5 }
 0x101   : > { %v8486_v1 = vpop.f32.mrf.mxu0  ;;  %v4247_v24 = vsel %vm7459_vm2, %v4242_v47, %v4246_v7  ;;  %v8525_v31 = vadd.f32 %v8458_v50, %v6683_v34  ;;  %v4265_v61 = vor.u32 %v4264_v9, %v4261_v6  ;;  %v4283_v50 = vshrl.u32 %v6260_v30, 16  ;;  %v8553_v9 = vld [vmem:[%s7399_s13 + $0x58] sm:$0xf] }
 0x102   : > { %v8468_v41 = vpop.f32.mrf.mxu1  ;;  %v6273_v18 = vcombine.low %v4247_v24, %v4257_v21  ;;  %v4286_v34 = vshll.u32 %v6260_v30, 16  ;;  %v4276_v60 = vrot.slane %v4275_v43, 4  ;;  %v4298_v24 = vrot.slane %v4296_v48, 4 }
 0x103   : > { %v6684_v44 = vpop.f32.mrf.mxu0  ;;  %v4266_v22 = vrot.slane %v4265_v61, 4  ;;  %v4285_v47 = vrot.slane %v4283_v50, 4  ;;  %v4304_v6 = vrot.slane %v4302_v19, 5  ;;  %v8565_v50 = vld [vmem:[%s7399_s13 + $0x5c] sm:$0x1]  ;;  %v4307_v19 = vshrl.u32 %v6263_v51, 16 }
 0x104   : > { %v8488_v29 = vpop.f32.mrf.mxu1  ;;  %7024 = vmatmul.mubr.msk.bf16.gmra.mxu1 %vm3160_vm7, %v6273_v18  ;;  %v4288_v59 = vrot.slane %v4286_v34, 5  ;;  %v8559_v18 = vadd.f32 %v8468_v41, %v8486_v1  ;;  %9258 = vst [vmem:[#allocation3_spill] sm:$0xff] %v8565_v50  ;;  %v4281_v58 = vsel %vm7459_vm2, %v4276_v60, %v4280_v10  ;;  %v4299_v48 = vor.u32 %v4298_v24, %v4294_v3  ;;  %v8583_v60 = vld [vmem:[%s7399_s13 + $0x64] sm:$0xf] }
 0x105   : > { %v647_v5 = vpop.f32.mrf.mxu0  ;;  %v4271_v21 = vsel %vm7459_vm2, %v4266_v22, %v4270_v16  ;;  %v8562_v61 = vadd.f32 %v8488_v29, %v6684_v44  ;;  %7010 = vmatmul.mubr.msk.bf16.gmra.mxu0 %vm3160_vm7, %v7266_v38  ;;  %v4310_v1 = vshll.u32 %v6263_v51, 16  ;;  %v4316_v29 = vshll.u32 %v8553_v9, 16  ;;  %v6266_v44 = vld [vmem:[%s7399_s13 + $0x60] sm:$0xf] }
 0x106   : > { %v8504_v13 = vpop.f32.mrf.mxu1  ;;  %v4289_v52 = vor.u32 %v4288_v59, %v4285_v47  ;;  %v6274_v22 = vcombine.low %v4271_v21, %v4281_v58  ;;  %v4300_v30 = vrot.slane %v4299_v48, 4  ;;  %7013 = vmatprep.mubr.msk.bf16.mxu0 %vm3160_vm7, %v7267_v25  ;;  %v4309_v10 = vrot.slane %v4307_v19, 4 }
 0x107   : > { %v6687_v7 = vpop.f32.mrf.mxu0  ;;  %v8572_v16 = vadd.f32 %v8504_v13, %v647_v5  ;;  %v4320_v13 = vshrl.u32 %v8553_v9, 16  ;;  %v4326_v5 = vshll.u32 %v8565_v50, 16  ;;  %v4312_v51 = vrot.slane %v4310_v1, 5 }
 0x108   : > { %v8515_v2 = vpop.f32.mrf.mxu1  ;;  %v4290_v41 = vrot.slane %v4289_v52, 4  ;;  %7027 = vmatprep.mubr.msk.bf16.mxu1 %vm3160_vm7, %v6274_v22  ;;  %v4318_v24 = vrot.slane %v4316_v29, 5  ;;  %v8592_v52 = vld [vmem:[%s7399_s13 + $0x68] sm:$0x1]  ;;  %v4305_v48 = vsel %vm7459_vm2, %v4300_v30, %v4304_v6  ;;  %v4331_v28 = vshrl.u32 %v6266_v44, 16 }
 0x109   : > { %v8548_v0 = vpop.f32.mrf.mxu0  ;;  %v8589_v21 = vadd.f32 %v8515_v2, %v6687_v7  ;;  %v4322_v19 = vrot.slane %v4320_v13, 4  ;;  %v4328_v45 = vrot.slane %v4326_v5, 5  ;;  %v4313_v17 = vor.u32 %v4312_v51, %v4309_v10  ;;  %v6287_v10 = vld [vmem:[%s7399_s13 + $0x18] sm:$0xe] }
 0x10a   : > { %v8533_v15 = vpop.f32.mrf.mxu1  ;;  %v4295_v38 = vsel %vm7459_vm2, %v4290_v41, %v4294_v3  ;;  %v7268_v3 = vld [vmem:[%s7399_s13 + $0x60] sm:$0xff]   ;;  %v4334_v41 = vshll.u32 %v6266_v44, 16  ;;  %v4340_v1 = vshll.u32 %v8583_v60, 16  ;;  %v4344_v50 = vshrl.u32 %v8583_v60, 16  ;;  %v6286_v44 = vld [vmem:[%s7399_s13 + $0xc] sm:$0xe] }
 0x10b   : > { %v6688_v34 = vpop.f32.mrf.mxu0  ;;  %9259 = vst [vmem:[#allocation4_spill] sm:$0xff] %v8589_v21  ;;  %v6275_v22 = vcombine.low %v4295_v38, %v4305_v48  ;;  %v4323_v29 = vor.u32 %v4322_v19, %v4318_v24  ;;  %v4333_v21 = vrot.slane %v4331_v28, 4  ;;  %v4350_v11 = vshll.u32 %v8592_v52, 16 }
 0x10c   : > { %v8538_v27 = vpop.f32.mrf.mxu1  ;;  %v4314_v30 = vrot.slane %v4313_v17, 4  ;;  %v4336_v6 = vrot.slane %v4334_v41, 5  ;;  %v4342_v13 = vrot.slane %v4340_v1, 5  ;;  %v4346_v48 = vrot.slane %v4344_v50, 4 }
 0x10d   : > { %v663_v47 = vpop.f32.mrf.mxu0  ;;  %7028 = vmatmul.mubr.msk.bf16.gmra.mxu1 %vm3160_vm7, %v6275_v22  ;;  %v4324_v51 = vrot.slane %v4323_v29, 4  ;;  %v4352_v19 = vrot.slane %v4350_v11, 5  ;;  %v8611_v28 = vadd.f32 %v8533_v15, %v8548_v0  ;;  %7014 = vmatmul.mubr.msk.bf16.gmra.mxu0 %vm3160_vm7, %v7268_v3  ;;  %v8617_v41 = vadd.f32 %v8538_v27, %v6688_v34 }
 0x10e   : > { %v8550_v57 = vpop.f32.mrf.mxu1  ;;  %v4319_v22 = vsel %vm7459_vm2, %v4314_v30, %v4318_v24  ;;  %v4337_v17 = vor.u32 %v4336_v6, %v4333_v21  ;;  %v4347_v15 = vor.u32 %v4346_v48, %v4342_v13  ;;  %v6294_v0 = vrot.slane %v6286_v44, 9 }
 0x10f   : > { %v6739_v25 = vpop.f32.mrf.mxu0  ;;  %v8620_v1 = vadd.f32 %v8550_v57, %v663_v47  ;;  %v4329_v11 = vsel %vm7459_vm2, %v4324_v51, %v4328_v45  ;;  %v4554_v24 = vrot.slane %v8366_v53, 5  ;;  %v4557_v21 = vrot.slane %v8369_v35, 5 }
 0x110   : > { %v8567_v43 = vpop.f32.mrf.mxu1  ;;  %v6276_v30 = vcombine.low %v4319_v22, %v4329_v11  ;;  %v4338_v3 = vrot.slane %v4337_v17, 4  ;;  %v1147_v27 = vadd.f32 %v6739_v25, %v8390_v62  ;;  %v4348_v47 = vrot.slane %v4347_v15, 4  ;;  %v7269_v11 = vld [vmem:[%s7399_s13 + $0x18] sm:$0xff]  }
 0x111   : > { %v1082_v2 = vpop.f32.mrf.mxu0  ;;  %v4555_v6 = vsel %vm7632_vm5, %v6294_v0, %v4554_v24  ;;  %v4556_v45 = vrot.slane %v4554_v24, 4  ;;  %v6295_v51 = vrot.slane %v6287_v10, 9  ;;  %v9260_v62 = vrot.slane %v8393_v14, 5  ;;  %v6288_v0 = vld [vmem:[%s7399_s13 + $0x24] sm:$0xe] }
 0x112   : > { %v8577_v59 = vpop.f32.mrf.mxu1  ;;  %7031 = vmatprep.mubr.msk.bf16.mxu1 %vm3160_vm7, %v6276_v30  ;;  %v4343_v53 = vsel %vm7459_vm2, %v4338_v3, %v4342_v13  ;;  %v8638_v35 = vadd.f32 %v8567_v43, %v1147_v27  ;;  %v5241_v44 = vsel %vm3185_vm6, %v8463_v54, 0  ;;  %v4353_v10 = vsel %vm7459_vm2, %v4348_v47, %v4352_v19 }
 0x113   : > { %v6740_v5 = vpop.f32.mrf.mxu0  ;;  %v4563_v25 = vrot.slane %v9260_v62, 4  ;;  %v4558_v17 = vsel %vm7632_vm5, %v4556_v45, %v4557_v21  ;;  %v9261_v13 = vmov %v9260_v62  ;;  %v1145_v15 = vadd.f32 %v1082_v2, %v8430_v20  ;;  %v6289_v21 = vld [vmem:[%s7399_s13 + $0x30] sm:$0xe] }
 0x114   : > { %v8594_v58 = vpop.f32.mrf.mxu1  ;;  %v4562_v43 = vsel %vm7632_vm5, %v6295_v51, %v9261_v13  ;;  %v6277_v24 = vcombine.low %v4343_v53, %v4353_v10  ;;  %v6303_v30 = vcombine.low %v4555_v6, %v4558_v17  ;;  %v9262_v54 = vrot.slane %v8399_v63, 5  ;;  %v7270_v17 = vld [vmem:[%s7399_s13 + $0x24] sm:$0xff]  }
 0x115   : > { %v1085_v29 = vpop.f32.mrf.mxu0  ;;  %v8661_v19 = vsel %vm3185_vm6, %v8473_v56, 0  ;;  %v8667_v45 = vadd.f32 %v8577_v59, %v1145_v15  ;;  %v1148_v20 = vadd.f32 %v6740_v5, %v8441_v37  ;;  %v6296_v2 = vrot.slane %v6288_v0, 9  ;;  %v6290_v5 = vld [vmem:[%s7399_s13 + $0x3c] sm:$0xe]  ;;  %v6291_v13 = vld [vmem:[%s7399_s13 + $0x48] sm:$0xe] }
 0x116   : > { %v8600_v7 = vpop.f32.mrf.mxu1  ;;  %v4565_v3 = vsel %vm7632_vm5, %v4563_v25, %v9262_v54  ;;  %v1146_v63 = vadd.f32 %v1085_v29, %v8443_v39  ;;  %7032 = vmatmul.mubr.msk.bf16.gmra.mxu1 %vm3160_vm7, %v6277_v24  ;;  %7037 = vmatprep.mubr.msk.bf16.mxu0 %vm3160_vm7, %v6303_v30  ;;  %v4568_v56 = vrot.slane %v8417_v23, 5  ;;  %v4571_v6 = vrot.slane %v8436_v46, 5  ;;  %v7271_v24 = vld [vmem:[%s7399_s13 + $0x30] sm:$0xff]  }
 0x117   : > { %v6743_v57 = vpop.f32.mrf.mxu0  ;;  %v6304_v47 = vcombine.low %v4562_v43, %v4565_v3  ;;  %7055 = vmatprep.mubr.msk.bf16.mxu1 %vm3160_vm7, %v7269_v11  ;;  %v8679_v37 = vadd.f32 %v8594_v58, %v1148_v20  ;;  %v6297_v59 = vrot.slane %v6289_v21, 9  ;;  %v4575_v23 = vrot.slane %v8446_v40, 5 }
 0x118   : > { %v8607_v38 = vpop.f32.mrf.mxu1  ;;  %v1151_v51 = vadd.f32 %v6743_v57, %v8456_v49  ;;  %v8682_v39 = vadd.f32 %v8600_v7, %v1146_v63  ;;  %v4569_v46 = vsel %vm7632_vm5, %v6296_v2, %v4568_v56  ;;  %v4570_v49 = vrot.slane %v4568_v56, 4 }
 0x119   : > { %v1098_v48 = vpop.f32.mrf.mxu0  ;;  %7038 = vmatmul.mubr.msk.bf16.vlgmr.msra.gmra.mxu0 %vm3160_vm7, %v6304_v47  ;;  %v4576_v7 = vsel %vm7632_vm5, %v6297_v59, %v4575_v23  ;;  %v4577_v10 = vrot.slane %v4575_v23, 4  ;;  %v9263_v30 = vrot.slane %v8451_v12, 5  ;;  %v6299_v63 = vrot.slane %v6291_v13, 9 }
 0x11a   : > { %v8623_v50 = vpop.f32.mrf.mxu1  ;;  %7072 = vmatpush3.bf16.msra.mxu0 %v5241_v44  ;;  %v8689_v29 = vadd.f32 %v8607_v38, %v1151_v51  ;;  %v1149_v58 = vadd.f32 %v1098_v48, %v8494_v55  ;;  %v4572_v11 = vsel %vm7632_vm5, %v4570_v49, %v4571_v6  ;;  %v6298_v55 = vrot.slane %v6290_v5, 9  ;;  %v6354_v49 = vld [vmem:[%s7399_s13 + $0x18] sm:$0xf] }
 0x11b   : > { %v6744_v27 = vpop.f32.mrf.mxu0  ;;  %v4582_v48 = vrot.slane %v8484_v26, 5  ;;  %v6305_v0 = vcombine.low %v4569_v46, %v4572_v11  ;;  %v4596_v51 = vrot.slane %v8553_v9, 5 }
 0x11c   : > { %v8630_v34 = vpop.f32.mrf.mxu1  ;;  %v1152_v40 = vadd.f32 %v6744_v27, %v8498_v42  ;;  %v8700_v38 = vadd.f32 %v8623_v50, %v1149_v58  ;;  %v4579_v42 = vsel %vm7632_vm5, %v4577_v10, %v9263_v30  ;;  %v6292_v50 = vld [vmem:[%s7399_s13 + $0x54] sm:$0xe]  ;;  %v4585_v27 = vrot.slane %v8502_v4, 5  ;;  %v9264_v58 = vld [vmem:[#allocation2_spill] sm:$0xff] }
 0x11d   : > { %v1101_v53 = vpop.f32.mrf.mxu0  ;;  %v6306_v3 = vcombine.low %v4576_v7, %v4579_v42  ;;  %v4583_v26 = vsel %vm7632_vm5, %v6298_v55, %v4582_v48  ;;  %v4584_v21 = vrot.slane %v4582_v48, 4  ;;  %7041 = vmatprep.mubr.msk.bf16.mxu0 %vm3160_vm7, %v6305_v0  ;;  %v6300_v6 = vrot.slane %v6292_v50, 9  ;;  %v9266_v7 = vld [vmem:[#allocation3_spill] sm:$0xff]  ;;  %v6355_v0 = vld [vmem:[%s7399_s13 + $0x1c] sm:$0xf] }
 0x11e   : > { %v1347_v22 = vpop.f32.mrf.mxu1  ;;  %v1150_v44 = vadd.f32 %v1101_v53, %v8512_v8  ;;  %v8710_v8 = vadd.f32 %v8630_v34, %v1152_v40  ;;  %v4589_v34 = vrot.slane %v8528_v33, 5  ;;  %7056 = vmatmul.mubr.msk.bf16.vlgmr.msra.gmra.mxu1 %vm3160_vm7, %v7270_v17  ;;  %v4599_v10 = vrot.slane %v9266_v7, 5 }
 0x11f   : > { %v6747_v57 = vpop.f32.mrf.mxu0  ;;  %v4586_v2 = vsel %vm7632_vm5, %v4584_v21, %v4585_v27  ;;  %7090 = vmatpush3.bf16.msra.mxu1 %v8661_v19  ;;  %7059 = vmatprep.mubr.msk.bf16.mxu1 %vm3160_vm7, %v7271_v24  ;;  %v4597_v5 = vsel %vm7632_vm5, %v6300_v6, %v4596_v51  ;;  %v4603_v48 = vrot.slane %v8583_v60, 5  ;;  %v7273_v24 = vld [vmem:[%s7399_s13 + $0x48] sm:$0xff]  }
 0x120   : > { %v8664_v14 = vpop.f32.mrf.mxu1  ;;  %v8712_v54 = vadd.f32 %v1347_v22, %v1150_v44  ;;  %v1155_v12 = vadd.f32 %v6747_v57, %v8525_v31  ;;  %v6307_v31 = vcombine.low %v4583_v26, %v4586_v2  ;;  %v4591_v59 = vrot.slane %v4589_v34, 4  ;;  %v7272_v44 = vld [vmem:[%s7399_s13 + $0x3c] sm:$0xff]   ;;  %v6395_v2 = vld [vmem:[%s7399_s13 + $0x18] sm:$0xe] }
 0x121   : > { %v1114_v43 = vpop.f32.mrf.mxu0  ;;  %7042 = vmatmul.mubr.msk.bf16.gmra.mxu0 %vm3160_vm7, %v6306_v3  ;;  %v9265_v57 = vrot.slane %v9264_v58, 5  ;;  %v6356_v3 = vld [vmem:[%s7399_s13 + $0x20] sm:$0x1]  ;;  %v4999_v26 = vshrl.u32 %v6354_v49, 16  ;;  %v4605_v60 = vrot.slane %v4603_v48, 4 }
 0x122   : > { %v1360_v62 = vpop.f32.mrf.mxu1  ;;  %v1153_v22 = vadd.f32 %v1114_v43, %v8559_v18  ;;  %v8730_v33 = vadd.f32 %v8664_v14, %v1155_v12  ;;  %v4590_v18 = vsel %vm7632_vm5, %v6299_v63, %v4589_v34  ;;  %7045 = vmatprep.mubr.msk.bf16.mxu0 %vm3160_vm7, %v6307_v31  ;;  %v5018_v31 = vshll.u32 %v6356_v3, 16 }
 0x123   : > { %v6748_v47 = vpop.f32.mrf.mxu0 }
 0x124   : > { %v6780_v25 = vpop.f32.mrf.mxu1  ;;  %v1156_v56 = vadd.f32 %v6748_v47, %v8562_v61  ;;  %v6293_v61 = vld [vmem:[%s7399_s13 + $0x60] sm:$0xe]  ;;  %v8736_v23 = vadd.f32 %v1360_v62, %v1153_v22  ;;  %v4593_v62 = vsel %vm7632_vm5, %v4591_v59, %v9265_v57  ;;  %v5002_v47 = vshll.u32 %v6354_v49, 16  ;;  %v6358_v57 = vld [vmem:[%s7399_s13 + $0x28] sm:$0xf] }
 0x125   : > { %v1117_v4 = vpop.f32.mrf.mxu0  ;;  %v6308_v17 = vcombine.low %v4590_v18, %v4593_v62  ;;  %v6301_v55 = vrot.slane %v6293_v61, 9  ;;  %v5008_v22 = vshll.u32 %v6355_v0, 16  ;;  %v6357_v61 = vld [vmem:[%s7399_s13 + $0x24] sm:$0xf]  ;;  %v6403_v49 = vrot.slane %v6395_v2, 9 }
 0x126   : > { %v1363_v15 = vpop.f32.mrf.mxu1  ;;  %v8738_v9 = vadd.f32 %v6780_v25, %v1156_v56  ;;  %v1154_v19 = vadd.f32 %v1117_v4, %v8572_v16  ;;  %v4598_v25 = vrot.slane %v4596_v51, 4  ;;  %v9267_v16 = vld [vmem:[#allocation4_spill] sm:$0xff]  ;;  %7060 = vmatmul.mubr.msk.bf16.gmra.mxu1 %vm3160_vm7, %v7272_v44  ;;  %v5004_v6 = vrot.slane %v5002_v47, 5  ;;  %v6359_v44 = vld [vmem:[%s7399_s13 + $0x2c] sm:$0x1] }
 0x127   : > { %v6751_v14 = vpop.f32.mrf.mxu0  ;;  %v5012_v51 = vshrl.u32 %v6355_v0, 16  ;;  %7063 = vmatprep.mubr.msk.bf16.mxu1 %vm3160_vm7, %v7273_v24  ;;  %v5036_v47 = vshrl.u32 %v6358_v57, 16 }
 0x128   : > { %v6783_v20 = vpop.f32.mrf.mxu1  ;;  %v1159_v40 = vadd.f32 %v6751_v14, %v9267_v16  ;;  %v8752_v11 = vadd.f32 %v1363_v15, %v1154_v19  ;;  %v4600_v30 = vsel %vm7632_vm5, %v4598_v25, %v4599_v10  ;;  %v8765_v15 = vsel %vm7632_vm5, %v6301_v55, %v4603_v48  ;;  %v7274_v10 = vld [vmem:[%s7399_s13 + $0x54] sm:$0xff]  }
 0x129   : > { %v1130_v13 = vpop.f32.mrf.mxu0  ;;  %v6309_v21 = vcombine.low %v4597_v5, %v4600_v30  ;;  %7046 = vmatmul.mubr.msk.bf16.gmra.mxu0 %vm3160_vm7, %v6308_v17  ;;  %v5014_v5 = vrot.slane %v5012_v51, 4  ;;  %v5020_v14 = vrot.slane %v5018_v31, 5  ;;  %v5023_v17 = vshrl.u32 %v6357_v61, 16 }
 0x12a   : > { %v1376_v53 = vpop.f32.mrf.mxu1  ;;  %v8759_v42 = vadd.f32 %v6783_v20, %v1159_v40  ;;  %v1157_v50 = vadd.f32 %v1130_v13, %v8611_v28  ;;  %v5001_v20 = vrot.slane %v4999_v26, 4  ;;  %v9268_v28 = vrot.slane %v8592_v52, 5  ;;  %v7275_v13 = vld [vmem:[%s7399_s13 + $0x60] sm:$0xff]  }
 0x12b   : > { %v6752_v27 = vpop.f32.mrf.mxu0  ;;  %v5010_v52 = vrot.slane %v5008_v22, 5  ;;  %7049 = vmatprep.mubr.msk.bf16.mxu0 %vm3160_vm7, %v6309_v21  ;;  %v5026_v55 = vshll.u32 %v6357_v61, 16  ;;  %v5025_v26 = vrot.slane %v5023_v17, 4  ;;  %v5397_v31 = vrot.slane %v6358_v57, 5 }
 0x12c   : > { %v6784_v46 = vpop.f32.mrf.mxu1  ;;  %v8767_v63 = vadd.f32 %v1376_v53, %v1157_v50  ;;  %v1160_v34 = vadd.f32 %v6752_v27, %v8617_v41  ;;  %v4607_v56 = vsel %vm7632_vm5, %v4605_v60, %v9268_v28  ;;  %v5005_v19 = vor.u32 %v5004_v6, %v5001_v20  ;;  %v6396_v50 = vld [vmem:[%s7399_s13 + $0x24] sm:$0xe] }
 0x12d   : > { %v1133_v4 = vpop.f32.mrf.mxu0  ;;  %v6310_v41 = vcombine.low %v8765_v15, %v4607_v56  ;;  %v5015_v40 = vor.u32 %v5014_v5, %v5010_v52  ;;  %v5028_v21 = vrot.slane %v5026_v55, 5  ;;  %v6404_v28 = vrot.slane %v6396_v50, 9 }
 0x12e   : > { %v1379_v43 = vpop.f32.mrf.mxu1  ;;  %v8780_v18 = vadd.f32 %v6784_v46, %v1160_v34  ;;  %v1158_v59 = vadd.f32 %v1133_v4, %v8620_v1  ;;  %v5390_v46 = vrot.slane %v6355_v0, 5  ;;  %v5393_v1 = vrot.slane %v6356_v3, 5  ;;  %7064 = vmatmul.mubr.msk.bf16.gmra.mxu1 %vm3160_vm7, %v7274_v10 }
 0x12f   : > { %v6803_v58 = vpop.f32.mrf.mxu0  ;;  %v5006_v16 = vrot.slane %v5005_v19, 4  ;;  %v5032_v0 = vshll.u32 %v6358_v57, 16  ;;  %v5016_v3 = vrot.slane %v5015_v40, 4  ;;  %v5042_v34 = vshll.u32 %v6359_v44, 16  ;;  %7067 = vmatprep.mubr.msk.bf16.mxu1 %vm3160_vm7, %v7275_v13 }
 0x130   : > { %v6835_v12 = vpop.f32.mrf.mxu1  ;;  %v8787_v62 = vadd.f32 %v1379_v43, %v1158_v59  ;;  %v1819_v25 = vadd.f32 %v6803_v58, %v8638_v35  ;;  %v8795_v24 = vsel %vm7632_vm5, %v6403_v49, %v5390_v46  ;;  %v5392_v43 = vrot.slane %v5390_v46, 4  ;;  %v6360_v59 = vld [vmem:[%s7399_s13 + $0x30] sm:$0xf]  ;;  %v6361_v46 = vld [vmem:[%s7399_s13 + $0x34] sm:$0xf] }
 0x131   : > { %v1754_v48 = vpop.f32.mrf.mxu0  ;;  %v5011_v35 = vsel %vm7459_vm2, %v5006_v16, %v5010_v52  ;;  %v5034_v27 = vrot.slane %v5032_v0, 5  ;;  %v5029_v2 = vor.u32 %v5028_v21, %v5025_v26  ;;  %v5038_v6 = vrot.slane %v5036_v47, 4  ;;  %7050 = vmatmul.mubr.msk.bf16.gmra.mxu0 %vm3160_vm7, %v6310_v41  ;;  %v6362_v16 = vld [vmem:[%s7399_s13 + $0x38] sm:$0x1]  ;;  %v6363_v21 = vld [vmem:[%s7399_s13 + $0x3c] sm:$0xf] }
 0x132   : > { %v8776_v53 = vpop.f32.mrf.mxu1  ;;  %v8797_v30 = vadd.f32 %v6835_v12, %v1819_v25  ;;  %v5394_v60 = vsel %vm7632_vm5, %v5392_v43, %v5393_v1  ;;  %v5021_v12 = vsel %vm7459_vm2, %v5016_v3, %v5020_v14  ;;  %v5044_v51 = vrot.slane %v5042_v34, 5  ;;  %v7276_v25 = vld [vmem:[%s7399_s13 + $0x6c] sm:$0xff]  }
 0x133   : > { %v6804_v15 = vpop.f32.mrf.mxu0  ;;  %v6412_v22 = vcombine.low %v8795_v24, %v5394_v60  ;;  %v6379_v4 = vcombine.low %v5011_v35, %v5021_v12  ;;  %v5030_v52 = vrot.slane %v5029_v2, 4  ;;  %v5400_v61 = vrot.slane %v6359_v44, 5  ;;  %v6397_v44 = vld [vmem:[%s7399_s13 + $0x30] sm:$0xe]  ;;  %v6364_v12 = vld [vmem:[%s7399_s13 + $0x40] sm:$0xf] }
 0x134   : > { %v6836_v7 = vpop.f32.mrf.mxu1  ;;  %v1817_v19 = vadd.f32 %v1754_v48, %v8667_v45  ;;  %v1820_v5 = vadd.f32 %v6804_v15, %v8679_v37  ;;  %v5039_v14 = vor.u32 %v5038_v6, %v5034_v27  ;;  %v8816_v49 = vsel %vm7632_vm5, %v6404_v28, %v5397_v31 }
 0x135   : > { %v1757_v56 = vpop.f32.mrf.mxu0  ;;  %7073 = vmatprep.mubr.msk.bf16.mxu0 %vm3160_vm7, %v6379_v4  ;;  %v5399_v58 = vrot.slane %v5397_v31, 4  ;;  %v5035_v45 = vsel %vm7459_vm2, %v5030_v52, %v5034_v27  ;;  %v5047_v40 = vshrl.u32 %v6360_v59, 16  ;;  %v5050_v48 = vshll.u32 %v6360_v59, 16  ;;  %v6365_v59 = vld [vmem:[%s7399_s13 + $0x44] sm:$0x1] }
 0x136   : > { %v2055_v20 = vpop.f32.mrf.mxu1  ;;  %v1818_v57 = vadd.f32 %v1757_v56, %v8682_v39  ;;  %v8824_v10 = vadd.f32 %v8776_v53, %v1817_v19  ;;  %v8826_v37 = vadd.f32 %v6836_v7, %v1820_v5  ;;  %v5040_v17 = vrot.slane %v5039_v14, 4  ;;  %7068 = vmatmul.mubr.msk.bf16.gmra.mxu1 %vm3160_vm7, %v7276_v25 }
 0x137   : > { %v5401_v39 = vsel %vm7632_vm5, %v5399_v58, %v5400_v61  ;;  %v5049_v53 = vrot.slane %v5047_v40, 4  ;;  %v5056_v7 = vshll.u32 %v6361_v46, 16  ;;  %v5060_v0 = vshrl.u32 %v6361_v46, 16  ;;  %7091 = vmatprep.mubr.msk.bf16.mxu1 %vm3160_vm7, %v6412_v22  ;;  %v6398_v22 = vld [vmem:[%s7399_s13 + $0x3c] sm:$0xe] }
 0x138   : > { %v6807_v41 = vpop.f32.mrf.mxu0  ;;  %v6839_v1 = vpop.f32.mrf.mxu1  ;;  %v8832_v55 = vadd.f32 %v2055_v20, %v1818_v57  ;;  %v6413_v43 = vcombine.low %v8816_v49, %v5401_v39  ;;  %v5045_v50 = vsel %vm7459_vm2, %v5040_v17, %v5044_v51  ;;  %v5052_v35 = vrot.slane %v5050_v48, 5 }
 0x139   : > { %v5066_v3 = vshll.u32 %v6362_v16, 16  ;;  %v6405_v26 = vrot.slane %v6397_v44, 9  ;;  %v6380_v27 = vcombine.low %v5035_v45, %v5045_v50  ;;  %v5058_v47 = vrot.slane %v5056_v7, 5  ;;  %v6366_v50 = vld [vmem:[%s7399_s13 + $0x48] sm:$0xf] }
 0x13a   : > { %v1770_v13 = vpop.f32.mrf.mxu0  ;;  %v8834_v24 = vpop.f32.mrf.mxu1  ;;  %v5062_v34 = vrot.slane %v5060_v0, 4  ;;  %v5404_v20 = vrot.slane %v6361_v46, 5  ;;  %v5053_v2 = vor.u32 %v5052_v35, %v5049_v53  ;;  %v5407_v56 = vrot.slane %v6362_v16, 5 }
 0x13b   : > { %v5068_v28 = vrot.slane %v5066_v3, 5  ;;  %v1823_v4 = vadd.f32 %v6807_v41, %v8689_v29  ;;  %7074 = vmatmul.mubr.msk.bf16.vlgmr.msra.gmra.mxu0 %vm3160_vm7, %v6380_v27  ;;  %v5071_v52 = vshrl.u32 %v6363_v21, 16  ;;  %v5074_v5 = vshll.u32 %v6363_v21, 16 }
 0x13c   : > { %v6808_v15 = vpop.f32.mrf.mxu0  ;;  %v6840_v60 = vpop.f32.mrf.mxu1  ;;  %v5063_v6 = vor.u32 %v5062_v34, %v5058_v47  ;;  %v5405_v51 = vsel %vm7632_vm5, %v6405_v26, %v5404_v20  ;;  %v5406_v31 = vrot.slane %v5404_v20, 4  ;;  %v5054_v61 = vrot.slane %v5053_v2, 4 }
 0x13d   : > { %v8848_v19 = vadd.f32 %v6839_v1, %v1823_v4  ;;  %v5080_v14 = vshll.u32 %v6364_v12, 16  ;;  %v5073_v46 = vrot.slane %v5071_v52, 4  ;;  %v5084_v41 = vshrl.u32 %v6364_v12, 16 }
 0x13e   : > { %v1773_v49 = vpop.f32.mrf.mxu0  ;;  %v2071_v58 = vpop.f32.mrf.mxu1  ;;  %v5064_v57 = vrot.slane %v5063_v6, 4  ;;  %v5408_v29 = vsel %vm7632_vm5, %v5406_v31, %v5407_v56  ;;  %v5059_v25 = vsel %vm7459_vm2, %v5054_v61, %v5058_v47  ;;  %v5076_v16 = vrot.slane %v5074_v5, 5  ;;  %7092 = vmatmul.mubr.msk.bf16.vlgmr.msra.gmra.mxu1 %vm3160_vm7, %v6413_v43  ;;  %v6367_v43 = vld [vmem:[%s7399_s13 + $0x4c] sm:$0xf] }
 0x13f   : > { %v6414_v45 = vcombine.low %v5405_v51, %v5408_v29  ;;  %v5082_v40 = vrot.slane %v5080_v14, 5  ;;  %v5086_v44 = vrot.slane %v5084_v41, 4  ;;  %v5090_v17 = vshll.u32 %v6365_v59, 16 }
 0x140   : > { %v5069_v1 = vsel %vm7459_vm2, %v5064_v57, %v5068_v28  ;;  %v6406_v39 = vrot.slane %v6398_v22, 9  ;;  %v5077_v53 = vor.u32 %v5076_v16, %v5073_v46  ;;  %v5411_v7 = vrot.slane %v6364_v12, 5  ;;  %v6811_v35 = vpop.f32.mrf.mxu0  ;;  %v6843_v3 = vpop.f32.mrf.mxu1  ;;  %v6369_v46 = vld [vmem:[%s7399_s13 + $0x54] sm:$0xf]  ;;  %v6370_v16 = vld [vmem:[%s7399_s13 + $0x58] sm:$0xf] }
 0x141   : > { %v6381_v48 = vcombine.low %v5059_v25, %v5069_v1  ;;  %v5414_v0 = vrot.slane %v6365_v59, 5  ;;  %v5087_v26 = vor.u32 %v5086_v44, %v5082_v40  ;;  %v5092_v21 = vrot.slane %v5090_v17, 5  ;;  %7095 = vmatprep.mubr.msk.bf16.mxu1 %vm3160_vm7, %v6414_v45  ;;  %v6399_v59 = vld [vmem:[%s7399_s13 + $0x48] sm:$0xe] }
 0x142   : > { %v1821_v27 = vadd.f32 %v1770_v13, %v8700_v38  ;;  %v1824_v47 = vadd.f32 %v6808_v15, %v8710_v8  ;;  %v5078_v34 = vrot.slane %v5077_v53, 4  ;;  %v5412_v20 = vsel %vm7632_vm5, %v6406_v39, %v5411_v7  ;;  %v8867_v28 = vpop.f32.mrf.mxu0  ;;  %v8869_v56 = vpop.f32.mrf.mxu1  ;;  %v6368_v15 = vld [vmem:[%s7399_s13 + $0x50] sm:$0x1] }
 0x143   : > { %7077 = vmatprep.mubr.msk.bf16.mxu0 %vm3160_vm7, %v6381_v48  ;;  %v5413_v12 = vrot.slane %v5411_v7, 4  ;;  %v1822_v2 = vadd.f32 %v1773_v49, %v8712_v54  ;;  %v5088_v38 = vrot.slane %v5087_v26, 4  ;;  %v5095_v4 = vshrl.u32 %v6366_v50, 16 }
 0x144   : > { %v8872_v8 = vadd.f32 %v8834_v24, %v1821_v27  ;;  %v8874_v13 = vadd.f32 %v6840_v60, %v1824_v47  ;;  %v5083_v6 = vsel %vm7459_vm2, %v5078_v34, %v5082_v40  ;;  %v5098_v31 = vshll.u32 %v6366_v50, 16  ;;  %v8884_v52 = vpop.f32.mrf.mxu0  ;;  %v8886_v24 = vpop.f32.mrf.mxu1  ;;  %v6371_v47 = vld [vmem:[%s7399_s13 + $0x5c] sm:$0x1] }
 0x145   : > { %v5415_v54 = vsel %vm7632_vm5, %v5413_v12, %v5414_v0  ;;  %v8881_v51 = vadd.f32 %v2071_v58, %v1822_v2  ;;  %v5093_v60 = vsel %vm7459_vm2, %v5088_v38, %v5092_v21  ;;  %v5097_v5 = vrot.slane %v5095_v4, 4 }
 0x146   : > { %v6415_v61 = vcombine.low %v5412_v20, %v5415_v54  ;;  %v5104_v14 = vshll.u32 %v6367_v43, 16  ;;  %v6382_v22 = vcombine.low %v5083_v6, %v5093_v60  ;;  %v5100_v49 = vrot.slane %v5098_v31, 5  ;;  %v1789_v39 = vpop.f32.mrf.mxu0  ;;  %v2087_v48 = vpop.f32.mrf.mxu1  ;;  %v6400_v20 = vld [vmem:[%s7399_s13 + $0x54] sm:$0xe] }
 0x147   : > { %v5108_v57 = vshrl.u32 %v6367_v43, 16  ;;  %v5114_v29 = vshll.u32 %v6368_v15, 16  ;;  %v6407_v41 = vrot.slane %v6399_v59, 9  ;;  %v5418_v25 = vrot.slane %v6367_v43, 5 }
 0x148   : > { %v5106_v58 = vrot.slane %v5104_v14, 5  ;;  %v5421_v45 = vrot.slane %v6368_v15, 5  ;;  %7078 = vmatmul.mubr.msk.bf16.gmra.mxu0 %vm3160_vm7, %v6382_v22  ;;  %v5101_v40 = vor.u32 %v5100_v49, %v5097_v5  ;;  %v1827_v17 = vadd.f32 %v6811_v35, %v8730_v33  ;;  %7096 = vmatmul.mubr.msk.bf16.gmra.mxu1 %vm3160_vm7, %v6415_v61  ;;  %v6372_v49 = vld [vmem:[%s7399_s13 + $0x60] sm:$0xf] }
 0x149   : > { %v5110_v1 = vrot.slane %v5108_v57, 4  ;;  %v5116_v44 = vrot.slane %v5114_v29, 5  ;;  %v5419_v53 = vsel %vm7632_vm5, %v6407_v41, %v5418_v25  ;;  %v5420_v7 = vrot.slane %v5418_v25, 4 }
 0x14a   : > { %v5119_v0 = vshrl.u32 %v6369_v46, 16  ;;  %v5122_v50 = vshll.u32 %v6369_v46, 16  ;;  %v5102_v26 = vrot.slane %v5101_v40, 4  ;;  %v8897_v27 = vadd.f32 %v6843_v3, %v1827_v17 }
 0x14b   : > { %v5111_v21 = vor.u32 %v5110_v1, %v5106_v58  ;;  %v5128_v34 = vshll.u32 %v6370_v16, 16  ;;  %v5422_v33 = vsel %vm7632_vm5, %v5420_v7, %v5421_v45  ;;  %v5132_v2 = vshrl.u32 %v6370_v16, 16  ;;  %v6815_v6 = vpop.f32.mrf.mxu0  ;;  %v8905_v54 = vpop.f32.mrf.mxu1  ;;  %v6373_v45 = vld [vmem:[%s7399_s13 + $0x64] sm:$0xf] }
 0x14c   : > { %v5121_v35 = vrot.slane %v5119_v0, 4  ;;  %v5124_v12 = vrot.slane %v5122_v50, 5  ;;  %v5107_v43 = vsel %vm7459_vm2, %v5102_v26, %v5106_v58  ;;  %v6416_v15 = vcombine.low %v5419_v53, %v5422_v33 }
 0x14d   : > { %v5112_v38 = vrot.slane %v5111_v21, 4  ;;  %v5130_v4 = vrot.slane %v5128_v34, 5  ;;  %v5134_v31 = vrot.slane %v5132_v2, 4  ;;  %v5138_v59 = vshll.u32 %v6371_v47, 16  ;;  %v8913_v57 = vpop.f32.mrf.mxu0  ;;  %v8915_v29 = vpop.f32.mrf.mxu1  ;;  %v6401_v21 = vld [vmem:[%s7399_s13 + $0x60] sm:$0xe] }
 0x14e   : > { %v5125_v3 = vor.u32 %v5124_v12, %v5121_v35  ;;  %v6408_v60 = vrot.slane %v6400_v20, 9  ;;  %7099 = vmatprep.mubr.msk.bf16.mxu1 %vm3160_vm7, %v6416_v15  ;;  %v5425_v5 = vrot.slane %v6370_v16, 5  ;;  %v5428_v14 = vrot.slane %v6371_v47, 5 }
 0x14f   : > { %v5117_v61 = vsel %vm7459_vm2, %v5112_v38, %v5116_v44  ;;  %v1825_v22 = vadd.f32 %v8867_v28, %v8736_v23  ;;  %v5135_v41 = vor.u32 %v5134_v31, %v5130_v4  ;;  %v5140_v25 = vrot.slane %v5138_v59, 5  ;;  %v8925_v28 = vpop.f32.mrf.mxu0  ;;  %v8927_v44 = vpop.f32.mrf.mxu1 }
 0x150   : > { %v6383_v46 = vcombine.low %v5107_v43, %v5117_v61  ;;  %v5126_v58 = vrot.slane %v5125_v3, 4  ;;  %v5426_v40 = vsel %vm7632_vm5, %v6408_v60, %v5425_v5  ;;  %v5427_v16 = vrot.slane %v5425_v5, 4  ;;  %v6376_v61 = vld [vmem:[%s7399_s13 + $0x70] sm:$0xf] }
 0x151   : > { %v8921_v1 = vadd.f32 %v8869_v56, %v1825_v22  ;;  %v1828_v23 = vadd.f32 %v8884_v52, %v8738_v9  ;;  %v5136_v53 = vrot.slane %v5135_v41, 4  ;;  %v1826_v7 = vadd.f32 %v1789_v39, %v8752_v11  ;;  %v6374_v9 = vld [vmem:[%s7399_s13 + $0x68] sm:$0x1]  ;;  %v8940_v47 = vpop.f32.mrf.mxu0  ;;  %v6375_v39 = vld [vmem:[%s7399_s13 + $0x6c] sm:$0xf]  ;;  %v8947_v35 = vpop.f32.mrf.mxu1 }
 0x152   : > { %7081 = vmatprep.mubr.msk.bf16.mxu0 %vm3160_vm7, %v6383_v46  ;;  %v5131_v17 = vsel %vm7459_vm2, %v5126_v58, %v5130_v4  ;;  %v5143_v0 = vshrl.u32 %v6372_v49, 16  ;;  %v5429_v56 = vsel %vm7632_vm5, %v5427_v16, %v5428_v14  ;;  %v5146_v52 = vshll.u32 %v6372_v49, 16  ;;  %v6377_v58 = vld [vmem:[%s7399_s13 + $0x74] sm:$0x1] }
 0x153   : > { %v8936_v50 = vadd.f32 %v8886_v24, %v1828_v23  ;;  %v5152_v26 = vshll.u32 %v6373_v45, 16  ;;  %v5141_v34 = vsel %vm7459_vm2, %v5136_v53, %v5140_v25  ;;  %v6417_v20 = vcombine.low %v5426_v40, %v5429_v56  ;;  %v6867_v38 = vpop.f32.mrf.mxu0 }
 0x154   : > { %v8944_v33 = vadd.f32 %v2087_v48, %v1826_v7  ;;  %v5145_v11 = vrot.slane %v5143_v0, 4  ;;  %v6384_v12 = vcombine.low %v5131_v17, %v5141_v34  ;;  %v5148_v24 = vrot.slane %v5146_v52, 5  ;;  %v6402_v17 = vld [vmem:[%s7399_s13 + $0x6c] sm:$0xe]  ;;  %s5749_s13 = sshll.u32 %s7299_s15, 4  ;;  %s5750_s15 = sshll.u32 %s9302_s16, 5 }
 0x155   : > { %v5154_v2 = vrot.slane %v5152_v26, 5  ;;  %v5156_v43 = vshrl.u32 %v6373_v45, 16  ;;  %7100 = vmatmul.mubr.msk.bf16.gmra.mxu1 %vm3160_vm7, %v6417_v20  ;;  %v5162_v15 = vshll.u32 %v6374_v9, 16  ;;  %v6409_v4 = vrot.slane %v6401_v21, 9  ;;  %v2298_v14 = vpop.f32.mrf.mxu0  ;;  %p234_p6 = scmp.lt.s32.totalorder %s5749_s13, 31 }
 0x156   : > { %v5432_v3 = vrot.slane %v6373_v45, 5  ;;  %v5435_v31 = vrot.slane %v6374_v9, 5  ;;  %7082 = vmatmul.mubr.msk.bf16.gmra.mxu0 %vm3160_vm7, %v6384_v12  ;;  %v5149_v48 = vor.u32 %v5148_v24, %v5145_v11  ;;  %v1831_v60 = vadd.f32 %v6815_v6, %v8759_v42 }
 0x157   : > { %v5158_v59 = vrot.slane %v5156_v43, 4  ;;  %v5167_v5 = vshrl.u32 %v6375_v39, 16  ;;  %v5164_v22 = vrot.slane %v5162_v15, 5  ;;  %v5170_v41 = vshll.u32 %v6375_v39, 16  ;;  %v6868_v53 = vpop.f32.mrf.mxu0  ;;  %s9304_s13 = smov (!%p234_p6, %s5749_s13), 31 }
 0x158   : > { %v5433_v49 = vsel %vm7632_vm5, %v6409_v4, %v5432_v3  ;;  %v5434_v46 = vrot.slane %v5432_v3, 4  ;;  %v6899_v25 = vpop.f32.mrf.mxu1  ;;  %v5150_v45 = vrot.slane %v5149_v48, 4  ;;  %v8957_v16 = vadd.f32 %v8905_v54, %v1831_v60  ;;  %s237_s12 = sadd.s32 %s5750_s15, %s9304_s13 }
 0x159   : > { %v5159_v40 = vor.u32 %v5158_v59, %v5154_v2  ;;  %v5169_v23 = vrot.slane %v5167_v5, 4  ;;  %v5172_v6 = vrot.slane %v5170_v41, 5  ;;  %v5176_v7 = vshll.u32 %v6376_v61, 16  ;;  %v2301_v34 = vpop.f32.mrf.mxu0  ;;  %s5751_s16 = sshll.u32 %s237_s12, 3 }
 0x15a   : > { %v5436_v42 = vsel %vm7632_vm5, %v5434_v46, %v5435_v31  ;;  %v5180_v0 = vshrl.u32 %v6376_v61, 16  ;;  %v2724_v56 = vpop.f32.mrf.mxu1  ;;  %v5155_v9 = vsel %vm7459_vm2, %v5150_v45, %v5154_v2  ;;  %v5186_v21 = vshll.u32 %v6377_v58, 16  ;;  %s9152_s23 = scalar_lea.vmem %s9250_s4, %s5751_s16 }
 0x15b   : > { %v5160_v52 = vrot.slane %v5159_v40, 4  ;;  %v6418_v26 = vcombine.low %v5433_v49, %v5436_v42  ;;  %v5173_v20 = vor.u32 %v5172_v6, %v5169_v23  ;;  %v5178_v54 = vrot.slane %v5176_v7, 5  ;;  %v6871_v3 = vpop.f32.mrf.mxu0 }
 0x15c   : > { %v5182_v11 = vrot.slane %v5180_v0, 4  ;;  %v6410_v39 = vrot.slane %v6402_v17, 9  ;;  %v6900_v12 = vpop.f32.mrf.mxu1  ;;  %v5188_v43 = vrot.slane %v5186_v21, 5  ;;  %v5439_v15 = vrot.slane %v6376_v61, 5 }
 0x15d   : > { %v5165_v24 = vsel %vm7459_vm2, %v5160_v52, %v5164_v22  ;;  %7103 = vmatprep.mubr.msk.bf16.mxu1 %vm3160_vm7, %v6418_v26  ;;  %v5442_v4 = vrot.slane %v6377_v58, 5  ;;  %v5174_v2 = vrot.slane %v5173_v20, 4  ;;  %v1829_v59 = vadd.f32 %v8913_v57, %v8767_v63  ;;  %v2314_v61 = vpop.f32.mrf.mxu0 }
 0x15e   : > { %v6385_v31 = vcombine.low %v5155_v9, %v5165_v24  ;;  %v5183_v48 = vor.u32 %v5182_v11, %v5178_v54  ;;  %v2727_v60 = vpop.f32.mrf.mxu1  ;;  %v5440_v5 = vsel %vm7632_vm5, %v6410_v39, %v5439_v15  ;;  %v5441_v49 = vrot.slane %v5439_v15, 4 }
 0x15f   : > { %v1832_v22 = vadd.f32 %v8925_v28, %v8780_v18  ;;  %v1830_v46 = vadd.f32 %v8940_v47, %v8787_v62  ;;  %v5179_v58 = vsel %vm7459_vm2, %v5174_v2, %v5178_v54  ;;  %v2127_v63 = vadd.f32 %v8915_v29, %v1829_v59  ;;  %v6872_v28 = vpop.f32.mrf.mxu0 }
 0x160   : > { %7085 = vmatprep.mubr.msk.bf16.mxu0 %vm3160_vm7, %v6385_v31  ;;  %v5184_v41 = vrot.slane %v5183_v48, 4  ;;  %v2363_v57 = vadd.f32 %v6867_v38, %v8797_v30  ;;  %v5443_v45 = vsel %vm7632_vm5, %v5441_v49, %v5442_v4  ;;  %v2361_v62 = vadd.f32 %v2298_v14, %v8824_v10  ;;  %v6903_v29 = vpop.f32.mrf.mxu1 }
 0x161   : > { %v2130_v40 = vadd.f32 %v8927_v44, %v1832_v22  ;;  %v2128_v18 = vadd.f32 %v8947_v35, %v1830_v46  ;;  %v6419_v23 = vcombine.low %v5440_v5, %v5443_v45  ;;  %v2364_v42 = vadd.f32 %v6868_v53, %v8826_v37  ;;  %v2317_v44 = vpop.f32.mrf.mxu0 }
 0x162   : > { %v5189_v47 = vsel %vm7459_vm2, %v5184_v41, %v5188_v43  ;;  %v2789_v17 = vadd.f32 %v6899_v25, %v2363_v57  ;;  %v2787_v30 = vadd.f32 %v2724_v56, %v2361_v62  ;;  %v2362_v32 = vadd.f32 %v2301_v34, %v8832_v55  ;;  %v2740_v14 = vpop.f32.mrf.mxu1 }
 0x163   : > { %v6386_v6 = vcombine.low %v5179_v58, %v5189_v47  ;;  %v2367_v38 = vadd.f32 %v6871_v3, %v8848_v19  ;;  %7104 = vmatmul.mubr.msk.bf16.gmra.mxu1 %vm3160_vm7, %v6419_v23  ;;  %v2790_v35 = vadd.f32 %v6900_v12, %v2364_v42  ;;  %v2365_v10 = vadd.f32 %v2314_v61, %v8872_v8  ;;  %v6875_v7 = vpop.f32.mrf.mxu0 }
 0x164   : > { %v2368_v36 = vadd.f32 %v6872_v28, %v8874_v13  ;;  %v2366_v25 = vadd.f32 %v2317_v44, %v8881_v51  ;;  %v2788_v37 = vadd.f32 %v2727_v60, %v2362_v32  ;;  %v6904_v55 = vpop.f32.mrf.mxu1  ;;  %v2371_v19 = vadd.f32 %v6875_v7, %v8897_v27 }
 0x165   : > { %7086 = vmatmul.mubr.msk.bf16.gmra.mxu0 %vm3160_vm7, %v6386_v6  ;;  %v2793_v53 = vadd.f32 %v6903_v29, %v2367_v38  ;;  %v2791_v0 = vadd.f32 %v2740_v14, %v2365_v10  ;;  %v2330_v9 = vpop.f32.mrf.mxu0 }
 0x166   : > { %v2794_v56 = vadd.f32 %v6904_v55, %v2368_v36  ;;  %v2743_v52 = vpop.f32.mrf.mxu1  ;;  %v2369_v26 = vadd.f32 %v2330_v9, %v8921_v1 }
 0x167   : > { %v2792_v8 = vadd.f32 %v2743_v52, %v2366_v25  ;;  %v6876_v21 = vpop.f32.mrf.mxu0 }
 0x168   : > { %v2372_v13 = vadd.f32 %v6876_v21, %v8936_v50  ;;  %v6907_v34 = vpop.f32.mrf.mxu1 }
 0x169   : > { %v2333_v51 = vpop.f32.mrf.mxu0  ;;  %v2797_v20 = vadd.f32 %v6907_v34, %v2371_v19 }
 0x16a   : > { %v2370_v54 = vadd.f32 %v2333_v51, %v8944_v33  ;;  %v2756_v11 = vpop.f32.mrf.mxu1 }
 0x16b   : > { %v6879_v39 = vpop.f32.mrf.mxu0  ;;  %v2795_v12 = vadd.f32 %v2756_v11, %v2369_v26 }
 0x16c   : > { %v2375_v24 = vadd.f32 %v6879_v39, %v8957_v16  ;;  %v6908_v27 = vpop.f32.mrf.mxu1 }
 0x16d   : > { %v2346_v43 = vpop.f32.mrf.mxu0  ;;  %v2798_v15 = vadd.f32 %v6908_v27, %v2372_v13 }
 0x16e   : > { %v2373_v4 = vadd.f32 %v2346_v43, %v2127_v63  ;;  %v2759_v3 = vpop.f32.mrf.mxu1 }
 0x16f   : > { %v6880_v1 = vpop.f32.mrf.mxu0  ;;  %v2796_v31 = vadd.f32 %v2759_v3, %v2370_v54 }
 0x170   : > { %v2376_v2 = vadd.f32 %v6880_v1, %v2130_v40  ;;  %v6911_v50 = vpop.f32.mrf.mxu1 }
 0x171   : > { %v2349_v48 = vpop.f32.mrf.mxu0  ;;  %v2801_v60 = vadd.f32 %v6911_v50, %v2375_v24 }
 0x172   : > { %v2374_v59 = vadd.f32 %v2349_v48, %v2128_v18  ;;  %v2772_v49 = vpop.f32.mrf.mxu1 }
 0x173   : > { %v6931_v5 = vpop.f32.mrf.mxu0  ;;  %v2799_v22 = vadd.f32 %v2772_v49, %v2373_v4 }
 0x174   : > { %v3087_v33 = vadd.f32 %v6931_v5, %v2789_v17  ;;  %v6912_v61 = vpop.f32.mrf.mxu1 }
 0x175   : > { %v3022_v46 = vpop.f32.mrf.mxu0  ;;  %v2802_v16 = vadd.f32 %v6912_v61, %v2376_v2 }
 0x176   : > { %v3085_v58 = vadd.f32 %v3022_v46, %v2787_v30  ;;  %v2775_v57 = vpop.f32.mrf.mxu1 }
 0x177   : > { %v6932_v41 = vpop.f32.mrf.mxu0  ;;  %v2800_v63 = vadd.f32 %v2775_v57, %v2374_v59 }
 0x178   : > { %v3088_v45 = vadd.f32 %v6932_v41, %v2790_v35  ;;  %v6949_v28 = vpop.f32.mrf.mxu1 }
 0x179   : > { %v3025_v62 = vpop.f32.mrf.mxu0  ;;  %v3288_v40 = vadd.f32 %v6949_v28, %v3087_v33 }
 0x17a   : > { %v3086_v47 = vadd.f32 %v3025_v62, %v2788_v37  ;;  %v3223_v23 = vpop.f32.mrf.mxu1 }
 0x17b   : > { %v6935_v42 = vpop.f32.mrf.mxu0  ;;  %v3286_v18 = vadd.f32 %v3223_v23, %v3085_v58 }
 0x17c   : > { %v3091_v29 = vadd.f32 %v6935_v42, %v2793_v53  ;;  %v6950_v6 = vpop.f32.mrf.mxu1 }
 0x17d   : > { %v3038_v32 = vpop.f32.mrf.mxu0  ;;  %v3289_v17 = vadd.f32 %v6950_v6, %v3088_v45 }
 0x17e   : > { %v3089_v38 = vadd.f32 %v3038_v32, %v2791_v0  ;;  %v3226_v44 = vpop.f32.mrf.mxu1 }
 0x17f   : > { %v6936_v10 = vpop.f32.mrf.mxu0  ;;  %v3287_v30 = vadd.f32 %v3226_v44, %v3086_v47 }
 0x180   : > { %v3092_v14 = vadd.f32 %v6936_v10, %v2794_v56  ;;  %v6953_v36 = vpop.f32.mrf.mxu1 }
 0x181   : > { %v3041_v25 = vpop.f32.mrf.mxu0  ;;  %v3292_v35 = vadd.f32 %v6953_v36, %v3091_v29 }
 0x182   : > { %v3090_v7 = vadd.f32 %v3041_v25, %v2792_v8  ;;  %v3239_v55 = vpop.f32.mrf.mxu1 }
 0x183   : > { %v6939_v19 = vpop.f32.mrf.mxu0  ;;  %v3290_v37 = vadd.f32 %v3239_v55, %v3089_v38 }
 0x184   : > { %v3095_v9 = vadd.f32 %v6939_v19, %v2797_v20  ;;  %v6954_v52 = vpop.f32.mrf.mxu1 }
 0x185   : > { %v3054_v26 = vpop.f32.mrf.mxu0  ;;  %v3293_v21 = vadd.f32 %v6954_v52, %v3092_v14 }
 0x186   : > { %v3093_v53 = vadd.f32 %v3054_v26, %v2795_v12  ;;  %v3242_v13 = vpop.f32.mrf.mxu1 }
 0x187   : > { %v6940_v34 = vpop.f32.mrf.mxu0  ;;  %v3291_v51 = vadd.f32 %v3242_v13, %v3090_v7 }
 0x188   : > { %v3096_v0 = vadd.f32 %v6940_v34, %v2798_v15  ;;  %v6957_v54 = vpop.f32.mrf.mxu1 }
 0x189   : > { %v3057_v11 = vpop.f32.mrf.mxu0  ;;  %v3296_v39 = vadd.f32 %v6957_v54, %v3095_v9 }
 0x18a   : > { %v3094_v56 = vadd.f32 %v3057_v11, %v2796_v31  ;;  %v3255_v24 = vpop.f32.mrf.mxu1 }
 0x18b   : > { %v6943_v27 = vpop.f32.mrf.mxu0  ;;  %v3294_v43 = vadd.f32 %v3255_v24, %v3093_v53 }
 0x18c   : > { %v3099_v8 = vadd.f32 %v6943_v27, %v2801_v60  ;;  %v6958_v4 = vpop.f32.mrf.mxu1 }
 0x18d   : > { %v3070_v3 = vpop.f32.mrf.mxu0  ;;  %v3297_v1 = vadd.f32 %v6958_v4, %v3096_v0 }
 0x18e   : > { %v3097_v20 = vadd.f32 %v3070_v3, %v2799_v22  ;;  %v3258_v2 = vpop.f32.mrf.mxu1 }
 0x18f   : > { %v6944_v48 = vpop.f32.mrf.mxu0  ;;  %v3295_v50 = vadd.f32 %v3258_v2, %v3094_v56 }
 0x190   : > { %v3100_v12 = vadd.f32 %v6944_v48, %v2802_v16  ;;  %v6961_v59 = vpop.f32.mrf.mxu1 }
 0x191   : > { %v3073_v5 = vpop.f32.mrf.mxu0  ;;  %v3300_v49 = vadd.f32 %v6961_v59, %v3099_v8 }
 0x192   : > { %v3098_v15 = vadd.f32 %v3073_v5, %v2800_v63  ;;  %v3271_v33 = vpop.f32.mrf.mxu1 }
 0x193   : > { %v6967_v46 = vpop.f32.mrf.mxu0  ;;  %v3298_v61 = vadd.f32 %v3271_v33, %v3097_v20 }
 0x194   : > { %v3670_v31 = vadd.f32 %v6967_v46, %v3288_v40  ;;  %v6962_v58 = vpop.f32.mrf.mxu1 }
 0x195   : > { %v3605_v41 = vpop.f32.mrf.mxu0  ;;  %v3301_v57 = vadd.f32 %v6962_v58, %v3100_v12 }
 0x196   : > { %v3668_v60 = vadd.f32 %v3605_v41, %v3286_v18  ;;  %v3274_v45 = vpop.f32.mrf.mxu1 }
 0x197   : > { %v6968_v62 = vpop.f32.mrf.mxu0  ;;  %v3299_v28 = vadd.f32 %v3274_v45, %v3098_v15 }
 0x198   : > { %v3671_v22 = vadd.f32 %v6968_v62, %v3289_v17  ;;  %v6985_v47 = vpop.f32.mrf.mxu1 }
 0x199   : > { %v3608_v23 = vpop.f32.mrf.mxu0  ;;  %v9000_v42 = vadd.f32 %v6985_v47, %v3670_v31 }
 0x19a   : > { %v3669_v16 = vadd.f32 %v3608_v23, %v3287_v30  ;;  %v3859_v29 = vpop.f32.mrf.mxu1 }
 0x19b   : > { %v6971_v6 = vpop.f32.mrf.mxu0  ;;  %v9002_v63 = vadd.f32 %v3859_v29, %v3668_v60 }
 0x19c   : > { %v3674_v32 = vadd.f32 %v6971_v6, %v3292_v35  ;;  %v6986_v38 = vpop.f32.mrf.mxu1 }
 0x19d   : > { %v3621_v40 = vpop.f32.mrf.mxu0  ;;  %v9004_v44 = vadd.f32 %v6986_v38, %v3671_v22 }
 0x19e   : > { %v3672_v10 = vadd.f32 %v3621_v40, %v3290_v37  ;;  %v3862_v18 = vpop.f32.mrf.mxu1 }
 0x19f   : > { %v6972_v14 = vpop.f32.mrf.mxu0  ;;  %v9006_v36 = vadd.f32 %v3862_v18, %v3669_v16 }
 0x1a0   : > { %v3675_v17 = vadd.f32 %v6972_v14, %v3293_v21  ;;  %v6989_v25 = vpop.f32.mrf.mxu1 }
 0x1a1   : > { %v3624_v7 = vpop.f32.mrf.mxu0  ;;  %v9008_v55 = vadd.f32 %v6989_v25, %v3674_v32 }
 0x1a2   : > { %v3673_v30 = vadd.f32 %v3624_v7, %v3291_v51  ;;  %v3875_v19 = vpop.f32.mrf.mxu1 }
 0x1a3   : > { %v6975_v9 = vpop.f32.mrf.mxu0  ;;  %v9010_v52 = vadd.f32 %v3875_v19, %v3672_v10 }
 0x1a4   : > { %v3678_v35 = vadd.f32 %v6975_v9, %v3296_v39  ;;  %v6990_v26 = vpop.f32.mrf.mxu1 }
 0x1a5   : > { %v3637_v53 = vpop.f32.mrf.mxu0  ;;  %v9012_v13 = vadd.f32 %v6990_v26, %v3675_v17 }
 0x1a6   : > { %v3676_v37 = vadd.f32 %v3637_v53, %v3294_v43  ;;  %v3878_v34 = vpop.f32.mrf.mxu1 }
 0x1a7   : > { %v6976_v0 = vpop.f32.mrf.mxu0  ;;  %v9014_v54 = vadd.f32 %v3878_v34, %v3673_v30 }
 0x1a8   : > { %v3679_v21 = vadd.f32 %v6976_v0, %v3297_v1  ;;  %v6993_v11 = vpop.f32.mrf.mxu1 }
 0x1a9   : > { %v3640_v56 = vpop.f32.mrf.mxu0  ;;  %v9016_v24 = vadd.f32 %v6993_v11, %v3678_v35 }
 0x1aa   : > { %v3677_v51 = vadd.f32 %v3640_v56, %v3295_v50  ;;  %v3891_v27 = vpop.f32.mrf.mxu1 }
 0x1ab   : > { %v9018_v8 = vadd.f32 %v3891_v27, %v3676_v37 }
 0x1ac   : > { %v6994_v4 = vpop.f32.mrf.mxu1  ;;  %v6979_v20 = vpop.f32.mrf.mxu0 }
 0x1ad   : > { %v9020_v39 = vadd.f32 %v6994_v4, %v3679_v21  ;;  %v3682_v43 = vadd.f32 %v6979_v20, %v3300_v49 }
 0x1ae   : > { %v3894_v3 = vpop.f32.mrf.mxu1  ;;  %v3653_v12 = vpop.f32.mrf.mxu0 }
 0x1af   : > { %v9022_v2 = vadd.f32 %v3894_v3, %v3677_v51  ;;  %v3680_v1 = vadd.f32 %v3653_v12, %v3298_v61 }
 0x1b0   : > { %v6997_v48 = vpop.f32.mrf.mxu1  ;;  %v6980_v15 = vpop.f32.mrf.mxu0 }
 0x1b1   : > { %v3936_v59 = vadd.f32 %v6997_v48, %v3682_v43  ;;  %v3683_v46 = vadd.f32 %v6980_v15, %v3301_v57 }
 0x1b2   : > { %v3907_v5 = vpop.f32.mrf.mxu1  ;;  %v3656_v31 = vpop.f32.mrf.mxu0 }
 0x1b3   : > { %v3934_v33 = vadd.f32 %v3907_v5, %v3680_v1  ;;  %v3681_v41 = vadd.f32 %v3656_v31, %v3299_v28 }
 0x1b4   : > { %v6998_v50 = vpop.f32.mrf.mxu1  ;;  %v9024_v45 = vpop.f32.mrf.mxu0 }
 0x1b5   : > { %v3937_v58 = vadd.f32 %v6998_v50, %v3683_v46 }
 0x1b6   : > { %v3910_v60 = vpop.f32.mrf.mxu1  ;;  %v9028_v47 = vpop.f32.mrf.mxu0 }
 0x1b7   : > { %v3935_v62 = vadd.f32 %v3910_v60, %v3681_v41 }
 0x1b8   : > { %v9032_v23 = vpop.f32.mrf.mxu0 }
 0x1ba   : > { %v9026_v22 = vpop.f32.mrf.mxu1  ;;  %v9036_v16 = vpop.f32.mrf.mxu0 }
 0x1bc   : > { %v9030_v49 = vpop.f32.mrf.mxu1  ;;  %v9040_v29 = vpop.f32.mrf.mxu0 }
 0x1be   : > { %v9034_v61 = vpop.f32.mrf.mxu1  ;;  %v9042_v28 = vpop.f32.mrf.mxu0 }
 0x1c0   : > { %v9038_v57 = vpop.f32.mrf.mxu1  ;;  %v9046_v32 = vpop.f32.mrf.mxu0 }
 0x1c2   : > { %v9050_v40 = vpop.f32.mrf.mxu0 }
 0x1c4   : > { %v9044_v6 = vpop.f32.mrf.mxu1 }
 0x1c5   : > { %v9054_v18 = vpop.f32.mrf.mxu0 }
 0x1c6   : > { %v9048_v38 = vpop.f32.mrf.mxu1 }
 0x1c7   : > { %v9058_v17 = vpop.f32.mrf.mxu0 }
 0x1c8   : > { %v9052_v10 = vpop.f32.mrf.mxu1 }
 0x1c9   : > { %v9060_v25 = vpop.f32.mrf.mxu0 }
 0x1ca   : > { %v9056_v14 = vpop.f32.mrf.mxu1 }
 0x1cb   : > { %v9064_v30 = vpop.f32.mrf.mxu0 }
 0x1cd   : > { %v9062_v7 = vpop.f32.mrf.mxu1  ;;  %v7015_v9 = vpop.f32.mrf.mxu0 }
 0x1ce   : > { %v4136_v35 = vadd.f32 %v7015_v9, %v3936_v59 }
 0x1cf   : > { %v9066_v19 = vpop.f32.mrf.mxu1  ;;  %v4107_v53 = vpop.f32.mrf.mxu0 }
 0x1d0   : > { %v4134_v37 = vadd.f32 %v4107_v53, %v3934_v33 }
 0x1d1   : > { %v9068_v26 = vpop.f32.mrf.mxu1  ;;  %v7016_v0 = vpop.f32.mrf.mxu0 }
 0x1d2   : > { %v4137_v21 = vadd.f32 %v7016_v0, %v3937_v58 }
 0x1d3   : > { %v9070_v34 = vpop.f32.mrf.mxu1  ;;  %v4110_v11 = vpop.f32.mrf.mxu0 }
 0x1d4   : > { %v4135_v56 = vadd.f32 %v4110_v11, %v3935_v62 }
 0x1d6   : > { %v7033_v51 = vpop.f32.mrf.mxu1 }
 0x1d7   : > { %v9072_v27 = vadd.f32 %v7033_v51, %v4136_v35 }
 0x1d8   : > { %v4489_v3 = vpop.f32.mrf.mxu1 }
 0x1d9   : > { %9269 = vst [vmem:[#allocation2_spill] sm:$0xff] %v9072_v27  ;;  %v7039_v4 = vpop.f32.mrf.mxu0  ;;  %v9074_v20 = vadd.f32 %v4489_v3, %v4134_v37  ;;  %v4124_v3 = vadd.f32 %v9024_v45, %v9000_v42 }
 0x1da   : > { %v7034_v48 = vpop.f32.mrf.mxu1 }
 0x1db   : > { %9270 = vst [vmem:[#allocation3_spill] sm:$0xff] %v9074_v20  ;;  %v4695_v43 = vpop.f32.mrf.mxu0  ;;  %v9076_v12 = vadd.f32 %v7034_v48, %v4137_v21  ;;  %v4506_v27 = vadd.f32 %v9026_v22, %v4124_v3 }
 0x1dc   : > { %v4492_v1 = vpop.f32.mrf.mxu1 }
 0x1dd   : > { %9271 = vst [vmem:[#allocation4_spill] sm:$0xff] %v9076_v12  ;;  %v7040_v59 = vpop.f32.mrf.mxu0  ;;  %v9078_v5 = vadd.f32 %v4492_v1, %v4135_v56 }
 0x1de   : > { %v7057_v33 = vpop.f32.mrf.mxu1 }
 0x1df   : > { %9272 = vst [vmem:[#allocation5_spill] sm:$0xff] %v9078_v5  ;;  %v4698_v15 = vpop.f32.mrf.mxu0  ;;  %v4122_v5 = vadd.f32 %v9028_v47, %v9002_v63  ;;  %v4760_v63 = vadd.f32 %v7039_v4, %v4506_v27 }
 0x1e0   : > { %v4895_v46 = vpop.f32.mrf.mxu1 }
 0x1e1   : > { %v9080_v50 = vpop.f32.mrf.mxu0  ;;  %v4504_v45 = vadd.f32 %v9030_v49, %v4122_v5 }
 0x1e2   : > { %v7058_v31 = vpop.f32.mrf.mxu1 }
 0x1e3   : > { %v9082_v58 = vpop.f32.mrf.mxu0  ;;  %v4758_v3 = vadd.f32 %v4695_v43, %v4504_v45 }
 0x1e4   : > { %v4898_v41 = vpop.f32.mrf.mxu1 }
 0x1e5   : > { %v9084_v60 = vpop.f32.mrf.mxu0  ;;  %v4958_v4 = vadd.f32 %v4895_v46, %v4758_v3 }
 0x1e6   : > { %v9086_v62 = vpop.f32.mrf.mxu1 }
 0x1e7   : > { %v9088_v9 = vpop.f32.mrf.mxu0 }
 0x1e8   : > { %v9090_v35 = vpop.f32.mrf.mxu1 }
 0x1e9   : > { %v9092_v53 = vpop.f32.mrf.mxu0 }
 0x1ea   : > { %v9094_v37 = vpop.f32.mrf.mxu1 }
 0x1eb   : > { %v9096_v0 = vpop.f32.mrf.mxu0 }
 0x1ec   : > { %v9098_v21 = vpop.f32.mrf.mxu1 }
 0x1ed   : > { %v9100_v11 = vpop.f32.mrf.mxu0 }
 0x1ee   : > { %9273 = vst [vmem:[#allocation6_spill] sm:$0xff] %v9100_v11  ;;  %v9103_v56 = vpop.f32.mrf.mxu1 }
 0x1ef   : > { %v9105_v51 = vpop.f32.mrf.mxu0 }
 0x1f0   : > { %9274 = vst [vmem:[#allocation7_spill] sm:$0xff] %v9105_v51  ;;  %v9109_v48 = vpop.f32.mrf.mxu1  ;;  %v4125_v51 = vadd.f32 %v9032_v23, %v9004_v44 }
 0x1f1   : > { %v9111_v1 = vpop.f32.mrf.mxu0 }
 0x1f2   : > { %9275 = vst [vmem:[#allocation8_spill] sm:$0xff] %v9111_v1  ;;  %v9115_v12 = vpop.f32.mrf.mxu1  ;;  %v4123_v1 = vadd.f32 %v9036_v16, %v9006_v36  ;;  %v4507_v22 = vadd.f32 %v9034_v61, %v4125_v51  ;;  %v4128_v36 = vadd.f32 %v9040_v29, %v9008_v55  ;;  %v4126_v61 = vadd.f32 %v9042_v28, %v9010_v52 }
 0x1f3   : > { %v9117_v20 = vpop.f32.mrf.mxu0  ;;  %v4129_v55 = vadd.f32 %v9046_v32, %v9012_v13 }
 0x1f4   : > { %9276 = vst [vmem:[#allocation9_spill] sm:$0xff] %v9117_v20  ;;  %v9122_v11 = vpop.f32.mrf.mxu1  ;;  %v4761_v49 = vadd.f32 %v7040_v59, %v4507_v22  ;;  %v4510_v59 = vadd.f32 %v9044_v6, %v4128_v36  ;;  %v4508_v46 = vadd.f32 %v9048_v38, %v4126_v61  ;;  %v4127_v6 = vadd.f32 %v9050_v40, %v9014_v54 }
 0x1f5   : > { %9277 = vst [vmem:[#allocation10_spill] sm:$0xff] %v9122_v11  ;;  %v9124_v42 = vpop.f32.mrf.mxu0  ;;  %v4960_v11 = vadd.f32 %v7057_v33, %v4760_v63 }
 0x1f6   : > { %9278 = vst [vmem:[#allocation11_spill] sm:$0xff] %v9124_v42  ;;  %v9130_v47 = vpop.f32.mrf.mxu1  ;;  %v4505_v42 = vadd.f32 %v9038_v57, %v4123_v1  ;;  %v4961_v45 = vadd.f32 %v7058_v31, %v4761_v49  ;;  %v4764_v13 = vadd.f32 %v9080_v50, %v4510_v59  ;;  %v4511_v1 = vadd.f32 %v9052_v10, %v4129_v55 }
 0x1f7   : > { %v9132_v20 = vpop.f32.mrf.mxu0 }
 0x1f8   : > { %9279 = vst [vmem:[#allocation12_spill] sm:$0xff] %v9132_v20  ;;  %v9135_v44 = vpop.f32.mrf.mxu1  ;;  %v4759_v5 = vadd.f32 %v4698_v15, %v4505_v42  ;;  %v4509_v42 = vadd.f32 %v9056_v14, %v4127_v6  ;;  %v4964_v54 = vadd.f32 %v9086_v62, %v4764_v13  ;;  %v4765_v40 = vadd.f32 %v9084_v60, %v4511_v1 }
 0x1f9   : > { %v4132_v14 = vadd.f32 %v9054_v18, %v9016_v24  ;;  %v4133_v18 = vadd.f32 %v9060_v25, %v9020_v39 }
 0x1fa   : > { %v9140_v16 = vpop.f32.mrf.mxu1  ;;  %v4959_v52 = vadd.f32 %v4898_v41, %v4759_v5  ;;  %v4762_v41 = vadd.f32 %v9082_v58, %v4508_v46  ;;  %v4763_v58 = vadd.f32 %v9088_v9, %v4509_v42  ;;  %v4965_v60 = vadd.f32 %v9094_v37, %v4765_v40  ;;  %v9283_v42 = vld [vmem:[#allocation2_spill] sm:$0xff] }
 0x1fb   : > { %v7075_v23 = vpop.f32.mrf.mxu0  ;;  %v4514_v24 = vadd.f32 %v9062_v7, %v4132_v14  ;;  %v4515_v7 = vadd.f32 %v9068_v26, %v4133_v18 }
 0x1fc   : > { %v5342_v20 = vadd.f32 %v7075_v23, %v4960_v11  ;;  %v9144_v43 = vpop.f32.mrf.mxu1  ;;  %v4962_v10 = vadd.f32 %v9090_v35, %v4762_v41  ;;  %v4130_v35 = vadd.f32 %v9058_v17, %v9018_v8  ;;  %v4963_v9 = vadd.f32 %v9098_v21, %v4763_v58  ;;  %v9287_v58 = vld [vmem:[#allocation4_spill] sm:$0xff] }
 0x1fd   : > { %v5277_v27 = vpop.f32.mrf.mxu0  ;;  %v4131_v21 = vadd.f32 %v9064_v30, %v9022_v2  ;;  %v4768_v59 = vadd.f32 %v9092_v53, %v4514_v24  ;;  %v9281_v53 = vld [vmem:[#allocation7_spill] sm:$0xff] }
 0x1fe   : > { %v5340_v57 = vadd.f32 %v5277_v27, %v4958_v4  ;;  %v7093_v29 = vpop.f32.mrf.mxu1  ;;  %v4512_v17 = vadd.f32 %v9066_v19, %v4130_v35  ;;  %v9280_v19 = vld [vmem:[#allocation6_spill] sm:$0xff] }
 0x1ff   : > { %v7076_v51 = vpop.f32.mrf.mxu0  ;;  %v5596_v28 = vadd.f32 %v7093_v29, %v5342_v20  ;;  %v4513_v39 = vadd.f32 %v9070_v34, %v4131_v21  ;;  %v4968_v25 = vadd.f32 %v9103_v56, %v4768_v59 }
 0x200   : > { %v5343_v33 = vadd.f32 %v7076_v51, %v4961_v45  ;;  %v5531_v32 = vpop.f32.mrf.mxu1  ;;  %v4766_v29 = vadd.f32 %v9096_v0, %v4512_v17 }
 0x201   : > { %v5280_v15 = vpop.f32.mrf.mxu0  ;;  %5612 = vst.msk [vmem:[%s9152_s23 + $0x10] sm:$0xff] %vm3160_vm7, %v5596_v28  ;;  %v5594_v31 = vadd.f32 %v5531_v32, %v5340_v57  ;;  %v4767_v28 = vadd.f32 %v9281_v53, %v4513_v39  ;;  %v9282_v32 = vld [vmem:[#allocation10_spill] sm:$0xff] }
 0x202   : > { %v5341_v11 = vadd.f32 %v5280_v15, %v4959_v52  ;;  %v7094_v20 = vpop.f32.mrf.mxu1  ;;  %v4769_v15 = vadd.f32 %v9280_v19, %v4515_v7  ;;  %v4966_v30 = vadd.f32 %v9109_v48, %v4766_v29 }
 0x203   : > { %5610 = vst.msk [vmem:[%s9152_s23] sm:$0xff] %vm3160_vm7, %v5594_v31  ;;  %v5597_v38 = vadd.f32 %v7094_v20, %v5343_v33  ;;  %v4967_v31 = vadd.f32 %v9282_v32, %v4767_v28 }
 0x204   : > { %v5534_v50 = vpop.f32.mrf.mxu1  ;;  %v4969_v0 = vadd.f32 %v9115_v12, %v4769_v15 }
 0x205   : > { %5613 = vst.msk [vmem:[%s9152_s23 + $0x18] sm:$0xff] %vm3160_vm7, %v5597_v38  ;;  %v5595_v63 = vadd.f32 %v5534_v50, %v5341_v11  ;;  %v9285_v50 = vld [vmem:[#allocation3_spill] sm:$0xff] }
 0x207   : > { %5611 = vst.msk [vmem:[%s9152_s23 + $0x8] sm:$0xff] %vm3160_vm7, %v5595_v63  ;;  %v9286_v63 = vld [vmem:[#allocation9_spill] sm:$0xff] }
 0x208   : > { %v7079_v22 = vpop.f32.mrf.mxu0  ;;  %v7097_v23 = vpop.f32.mrf.mxu1 }
 0x209   : > { %v5346_v3 = vadd.f32 %v7079_v22, %v4964_v54  ;;  %v9284_v54 = vld [vmem:[#allocation8_spill] sm:$0xff]  ;;  %v4770_v22 = vadd.f32 %v9286_v63, %v9285_v50 }
 0x20a   : > { %v5293_v49 = vpop.f32.mrf.mxu0  ;;  %v5547_v27 = vpop.f32.mrf.mxu1  ;;  %v4772_v12 = vadd.f32 %v9284_v54, %v9283_v42 }
 0x20b   : > { %v5600_v62 = vadd.f32 %v7097_v23, %v5346_v3  ;;  %v5344_v36 = vadd.f32 %v5293_v49, %v4962_v10  ;;  %v9288_v3 = vld [vmem:[#allocation11_spill] sm:$0xff] }
 0x20c   : > { %v7080_v4 = vpop.f32.mrf.mxu0  ;;  %v7098_v51 = vpop.f32.mrf.mxu1  ;;  %v4972_v10 = vadd.f32 %v9130_v47, %v4772_v12  ;;  %v4773_v23 = vadd.f32 %v9288_v3, %v9287_v58 }
 0x20d   : > { %5616 = vst.msk [vmem:[%s9152_s23 + $0x30] sm:$0xff] %vm3160_vm7, %v5600_v62  ;;  %v5598_v5 = vadd.f32 %v5547_v27, %v5344_v36  ;;  %v5347_v61 = vadd.f32 %v7080_v4, %v4965_v60  ;;  %v4970_v60 = vadd.f32 %v9135_v44, %v4770_v22  ;;  %v9289_v62 = vld [vmem:[#allocation5_spill] sm:$0xff]  ;;  %v9290_v36 = vld [vmem:[#allocation12_spill] sm:$0xff] }
 0x20e   : > { %v5296_v45 = vpop.f32.mrf.mxu0  ;;  %v5550_v8 = vpop.f32.mrf.mxu1  ;;  %v4771_v27 = vadd.f32 %v9290_v36, %v9289_v62 }
 0x20f   : > { %5614 = vst.msk [vmem:[%s9152_s23 + $0x20] sm:$0xff] %vm3160_vm7, %v5598_v5  ;;  %v5601_v37 = vadd.f32 %v7098_v51, %v5347_v61  ;;  %v5345_v57 = vadd.f32 %v5296_v45, %v4963_v9  ;;  %v4973_v5 = vadd.f32 %v9140_v16, %v4773_v23 }
 0x210   : > { %v4971_v24 = vadd.f32 %v9144_v43, %v4771_v27 }
 0x211   : > { %5617 = vst.msk [vmem:[%s9152_s23 + $0x38] sm:$0xff] %vm3160_vm7, %v5601_v37  ;;  %v5599_v55 = vadd.f32 %v5550_v8, %v5345_v57 }
 0x213   : > { %5615 = vst.msk [vmem:[%s9152_s23 + $0x28] sm:$0xff] %vm3160_vm7, %v5599_v55 }
 0x215   : > { %v7101_v52 = vpop.f32.mrf.mxu1 }
 0x216   : > { %v7083_v2 = vpop.f32.mrf.mxu0 }
 0x217   : > { %v5350_v33 = vadd.f32 %v7083_v2, %v4968_v25  ;;  %v5563_v26 = vpop.f32.mrf.mxu1 }
 0x218   : > { %v5309_v46 = vpop.f32.mrf.mxu0 }
 0x219   : > { %v5604_v6 = vadd.f32 %v7101_v52, %v5350_v33  ;;  %v5348_v34 = vadd.f32 %v5309_v46, %v4966_v30  ;;  %v7102_v56 = vpop.f32.mrf.mxu1 }
 0x21a   : > { %v7084_v13 = vpop.f32.mrf.mxu0 }
 0x21b   : > { %5620 = vst.msk [vmem:[%s9152_s23 + $0x50] sm:$0xff] %vm3160_vm7, %v5604_v6  ;;  %v5602_v11 = vadd.f32 %v5563_v26, %v5348_v34  ;;  %v5351_v1 = vadd.f32 %v7084_v13, %v4969_v0  ;;  %v5566_v38 = vpop.f32.mrf.mxu1 }
 0x21c   : > { %v5312_v48 = vpop.f32.mrf.mxu0 }
 0x21d   : > { %5618 = vst.msk [vmem:[%s9152_s23 + $0x40] sm:$0xff] %vm3160_vm7, %v5602_v11  ;;  %v5605_v41 = vadd.f32 %v7102_v56, %v5351_v1  ;;  %v5349_v20 = vadd.f32 %v5312_v48, %v4967_v31 }
 0x21f   : > { %5621 = vst.msk [vmem:[%s9152_s23 + $0x58] sm:$0xff] %vm3160_vm7, %v5605_v41  ;;  %v5603_v40 = vadd.f32 %v5566_v38, %v5349_v20 }
 0x221   : > { %5619 = vst.msk [vmem:[%s9152_s23 + $0x48] sm:$0xff] %vm3160_vm7, %v5603_v40 }
 0x223   : > { %v7105_v49 = vpop.f32.mrf.mxu1 }
 0x225   : > { %v7087_v14 = vpop.f32.mrf.mxu0  ;;  %v5579_v35 = vpop.f32.mrf.mxu1 }
 0x226   : > { %v5354_v4 = vadd.f32 %v7087_v14, %v4972_v10 }
 0x227   : > { %v5325_v9 = vpop.f32.mrf.mxu0  ;;  %v7106_v45 = vpop.f32.mrf.mxu1 }
 0x228   : > { %v5608_v61 = vadd.f32 %v7105_v49, %v5354_v4  ;;  %v5352_v47 = vadd.f32 %v5325_v9, %v4970_v60 }
 0x229   : > { %v7088_v51 = vpop.f32.mrf.mxu0  ;;  %v5582_v17 = vpop.f32.mrf.mxu1 }
 0x22a   : > { %5624 = vst.msk [vmem:[%s9152_s23 + $0x70] sm:$0xff] %vm3160_vm7, %v5608_v61  ;;  %v5606_v18 = vadd.f32 %v5579_v35, %v5352_v47  ;;  %v5355_v44 = vadd.f32 %v7088_v51, %v4973_v5 }
 0x22b   : > { %v5328_v37 = vpop.f32.mrf.mxu0 }
 0x22c   : > { %5622 = vst.msk [vmem:[%s9152_s23 + $0x60] sm:$0xff] %vm3160_vm7, %v5606_v18  ;;  %v5609_v57 = vadd.f32 %v7106_v45, %v5355_v44  ;;  %v5353_v8 = vadd.f32 %v5328_v37, %v4971_v24 }
 0x22e   : > { %5625 = vst.msk [vmem:[%s9152_s23 + $0x78] sm:$0xff] %vm3160_vm7, %v5609_v57  ;;  %v5607_v16 = vadd.f32 %v5582_v17, %v5353_v8 }
 0x230   : > { %5623 = vst.msk [vmem:[%s9152_s23 + $0x68] sm:$0xff] %vm3160_vm7, %v5607_v16 }
 0x231 PF: > { %s14_s19 = sadd.s32 1, %s7315_s19   ;;  %s9291_s15 = smov %s7307_s17 }
 0x232   : > { %p11_p7 = scmp.ge.s32.totalorder %s14_s19, 6   ;;  %s9292_s16 = smov %s7311_s18 }
 0x233   : > { %s9293_s17 = smov %s9296_s20  ;;  %s9294_s18 = smov %s9300_s21 }
 0x234   :  { %13 = sbr.rel (!%p11_p7) target bundleno = 3 (0x3), region = 91 }

</bundles_post_ra>
